<compile_context>
chip_gen: v5e
topology: v5e:2x2
jax: 0.10.0
libtpu: 0.0.40
codegen_flags: <defaults>
</compile_context>

<pallas_src>
import jax
import jax.numpy as jnp
from jax.experimental import pallas as pl
from jax.experimental.pallas import tpu as pltpu


# ------------------------------------------------------------------ fused kernel
def make_conformer_stack_kernel(num_heads: int):
    def kernel(x_ref, mask_ref,
               f1_lnw, f1_lnb, f1_w1, f1_b1, f1_w2, f1_b2,
               a_lnw, a_lnb, wq, bq, wk, bk, wv, bv, wo_h, bo,
               c_lnw, c_lnb, c1_w, c1_b, c2_w, c2_b, bn_g, bn_b, c3_w, c3_b,
               f2_lnw, f2_lnb, f2_w1, f2_b1, f2_w2, f2_b2,
               fin_lnw, fin_lnb,
               out_ref, act_ref):
        B, T, D = x_ref.shape
        C = c1_w.shape[0] // 2        # conv-module channels (== D here)
        K = c2_w.shape[0]             # depthwise kernel size, weight stored (K, C)
        H = num_heads
        hd = D // H
        layer = pl.program_id(0)

        # Layer 0 loads the input; later layers read the VMEM-resident activation.
        @pl.when(layer == 0)
        def _():
            act_ref[...] = x_ref[...].astype(jnp.float32)

        x = act_ref[...]
        mask = mask_ref[...]          # (B, T) float, 1.0 == padded

        # ---------------- helpers ----------------
        def layer_norm(v, w_ref_, b_ref_):
            mu = jnp.mean(v, axis=-1, keepdims=True)
            var = jnp.mean((v - mu) ** 2, axis=-1, keepdims=True)
            return (v - mu) * jax.lax.rsqrt(var + 1e-5) * w_ref_[...] + b_ref_[...]

        def matmul_nt(a, w):          # a (M, Kc) f32/bf16, w (N, Kc) bf16 -> (M, N) f32
            return jax.lax.dot_general(
                a.astype(jnp.bfloat16), w,
                (((1,), (1,)), ((), ())),
                preferred_element_type=jnp.float32)

        def linear3(v, w_ref_, b_ref_):   # v (B, T, Din), w (Dout, Din) bf16
            w = w_ref_[...]
            Bv, Tv, Dv = v.shape
            o = matmul_nt(v.reshape(Bv * Tv, Dv), w)
            return o.reshape(Bv, Tv, w.shape[0]) + b_ref_[...]

        def silu(v):
            return v * jax.nn.sigmoid(v)

        def ffn(v, lnw, lnb, w1, b1, w2, b2):
            h = layer_norm(v, lnw, lnb)
            h = silu(linear3(h, w1, b1))
            return linear3(h, w2, b2)

        # ---------------- FFN1 (half-step residual) ----------------
        x = 0.5 * ffn(x, f1_lnw, f1_lnb, f1_w1, f1_b1, f1_w2, f1_b2) + x

        # ---------------- multi-head self-attention ----------------
        residual = x
        hln = layer_norm(x, a_lnw, a_lnb)
        scale = 1.0 / (hd ** 0.5)
        q = linear3(hln, wq, bq) * scale          # fold 1/sqrt(hd) into q once
        k = linear3(hln, wk, bk)
        v = linear3(hln, wv, bv)
        neg = mask[:, None, :] * 1e30             # (B, 1, T_k) additive mask
        wo_all = wo_h[...]                        # (H, D, hd) bf16, per-head out-proj
        attn_out = jnp.zeros((B, T, D), jnp.float32)
        for i in range(H):                        # unrolled, H small
            sl = slice(i * hd, (i + 1) * hd)
            qh = q[:, :, sl].astype(jnp.bfloat16)
            kh = k[:, :, sl].astype(jnp.bfloat16)
            vh = v[:, :, sl].astype(jnp.bfloat16)
            s = jnp.einsum('btd,bsd->bts', qh, kh,
                           preferred_element_type=jnp.float32) - neg
            m = jnp.max(s, axis=-1, keepdims=True)
            e = jnp.exp(s - m)
            p = e * pl.reciprocal(jnp.sum(e, axis=-1, keepdims=True), approx=True)
            oh = jnp.einsum('bts,bsd->btd', p.astype(jnp.bfloat16), vh,
                            preferred_element_type=jnp.float32)
            # fold output projection for this head: (B*T, hd) @ (hd, D) -> lane-dense D
            attn_out = attn_out + matmul_nt(oh.reshape(B * T, hd),
                                            wo_all[i]).reshape(B, T, D)
        x = attn_out + bo[...] + residual

        # ---------------- convolution module ----------------
        residual = x
        h = layer_norm(x, c_lnw, c_lnb)
        # pointwise conv1 (kernel_size=1) == matmul over channels, out = 2*C
        h = linear3(h, c1_w, c1_b)
        # GLU along channel axis
        h = h[:, :, :C] * jax.nn.sigmoid(h[:, :, C:])
        # depthwise conv along T, SAME zero padding, via XLU rolls + validity mask
        P = (K - 1) // 2
        w_dw = c2_w[...]                                           # (K, C) f32
        t_idx = jax.lax.broadcasted_iota(jnp.int32, (B, T, C), 1)
        acc = jnp.broadcast_to(c2_b[...], (B, T, C)).astype(jnp.float32)  # bias-init
        for kk in range(K):                                        # unrolled, K small
            shift = P - kk                                         # out[t] += w[kk]*h[t-shift]
            lo, hi = max(shift, 0), min(T + shift, T)
            if lo >= hi:
                continue
            rolled = h if shift % T == 0 else pltpu.roll(h, shift=shift % T, axis=1)
            valid = (t_idx >= lo) & (t_idx < hi)
            acc = acc + jnp.where(valid, rolled, 0.0) * w_dw[kk][None, None, :]
        # BatchNorm1d (training-mode batch statistics over (B, T)), affine fused
        mu = jnp.mean(acc, axis=(0, 1), keepdims=True)
        var = jnp.mean((acc - mu) ** 2, axis=(0, 1), keepdims=True)
        bn_scale = bn_g[...] * jax.lax.rsqrt(var + 1e-5)           # (1, 1, C)
        bn_shift = bn_b[...] - mu * bn_scale
        h = silu(acc * bn_scale + bn_shift)
        # pointwise conv3 (kernel_size=1)
        h = linear3(h, c3_w, c3_b)
        x = residual + h

        # ---------------- FFN2 (half-step residual) + final LN ----------------
        x = 0.5 * ffn(x, f2_lnw, f2_lnb, f2_w1, f2_b1, f2_w2, f2_b2) + x
        x = layer_norm(x, fin_lnw, fin_lnb)

        act_ref[...] = x                                           # carry to next layer

        @pl.when(layer == pl.num_programs(0) - 1)
        def _():
            out_ref[...] = x.astype(out_ref.dtype)

    return kernel


# ------------------------------------------------------------------ pallas_call glue
def _rep_spec(a):
    nd = a.ndim
    return pl.BlockSpec(a.shape, lambda l, nd=nd: (0,) * nd)


def _layer_spec(a):
    nd = a.ndim
    return pl.BlockSpec((None,) + a.shape[1:],
                        lambda l, nd=nd: (l,) + (0,) * (nd - 1))


def run_conformer_stack(x, mask, stacked_params, num_heads):
    B, T, D = x.shape
    L = stacked_params[0].shape[0]
    kernel = make_conformer_stack_kernel(num_heads)
    return pl.pallas_call(
        kernel,
        grid=(L,),
        in_specs=[_rep_spec(x), _rep_spec(mask)]
                 + [_layer_spec(a) for a in stacked_params],
        out_specs=_rep_spec(x),
        out_shape=jax.ShapeDtypeStruct(x.shape, x.dtype),
        scratch_shapes=[pltpu.VMEM((B, T, D), jnp.float32)],
        compiler_params=pltpu.CompilerParams(dimension_semantics=("arbitrary",)),
    )(x, mask, *stacked_params)


# ------------------------------------------------------------------ parameters
def init_layer_params(key, input_dim, ffn_dim, kernel_size):
    """Full-width (switch=1.0) parameters, deterministic synthetic init."""
    D, F, C, K = input_dim, ffn_dim, input_dim, kernel_size
    ks = iter(jax.random.split(key, 16))

    def W(shape):
        fan_in = shape[-1]
        return jax.random.normal(next(ks), shape, jnp.float32) * (1.0 / (fan_in ** 0.5))

    ones = lambda n: jnp.ones((1, n), jnp.float32)
    zeros = lambda n: jnp.zeros((1, n), jnp.float32)

    return {
        'f1_lnw': ones(D), 'f1_lnb': zeros(D),
        'f1_w1': W((F, D)), 'f1_b1': zeros(F),
        'f1_w2': W((D, F)), 'f1_b2': zeros(D),
        'a_lnw': ones(D), 'a_lnb': zeros(D),
        'wq': W((D, D)), 'bq': zeros(D),
        'wk': W((D, D)), 'bk': zeros(D),
        'wv': W((D, D)), 'bv': zeros(D),
        'wo': W((D, D)), 'bo': zeros(D),
        'c_lnw': ones(D), 'c_lnb': zeros(D),
        'c1_w': W((2 * C, D)), 'c1_b': zeros(2 * C),
        'c2_w': W((K, C)), 'c2_b': zeros(C),          # depthwise weight stored (K, C)
        'bn_g': ones(C), 'bn_b': zeros(C),
        'c3_w': W((D, C)), 'c3_b': zeros(D),
        'f2_lnw': ones(D), 'f2_lnb': zeros(D),
        'f2_w1': W((F, D)), 'f2_b1': zeros(F),
        'f2_w2': W((D, F)), 'f2_b2': zeros(D),
        'fin_lnw': ones(D), 'fin_lnb': zeros(D),
    }


def slice_and_pack_layer(p, d_eff, f_eff, num_heads):
    """Slimmable slicing (first d_eff/f_eff rows & cols) + bf16 cast for matmul
    weights + per-head re-layout of the attention output projection."""
    c_eff = d_eff
    hd = d_eff // num_heads
    bf = lambda a: a.astype(jnp.bfloat16)
    s2 = lambda a, r, c: a[:r, :c]
    s1 = lambda a, c: a[:, :c]
    wo = s2(p['wo'], d_eff, d_eff)
    # wo_heads[h] == Wo[:, h*hd:(h+1)*hd]  -> shape (H, D, hd)
    wo_heads = bf(wo.reshape(d_eff, num_heads, hd).transpose(1, 0, 2))
    return [
        s1(p['f1_lnw'], d_eff), s1(p['f1_lnb'], d_eff),
        bf(s2(p['f1_w1'], f_eff, d_eff)), s1(p['f1_b1'], f_eff),
        bf(s2(p['f1_w2'], d_eff, f_eff)), s1(p['f1_b2'], d_eff),
        s1(p['a_lnw'], d_eff), s1(p['a_lnb'], d_eff),
        bf(s2(p['wq'], d_eff, d_eff)), s1(p['bq'], d_eff),
        bf(s2(p['wk'], d_eff, d_eff)), s1(p['bk'], d_eff),
        bf(s2(p['wv'], d_eff, d_eff)), s1(p['bv'], d_eff),
        wo_heads, s1(p['bo'], d_eff),
        s1(p['c_lnw'], d_eff), s1(p['c_lnb'], d_eff),
        bf(s2(p['c1_w'], 2 * c_eff, d_eff)), s1(p['c1_b'], 2 * c_eff),
        s1(p['c2_w'], c_eff), s1(p['c2_b'], c_eff),
        s1(p['bn_g'], c_eff), s1(p['bn_b'], c_eff),
        bf(s2(p['c3_w'], d_eff, c_eff)), s1(p['c3_b'], d_eff),
        s1(p['f2_lnw'], d_eff), s1(p['f2_lnb'], d_eff),
        bf(s2(p['f2_w1'], f_eff, d_eff)), s1(p['f2_b1'], f_eff),
        bf(s2(p['f2_w2'], d_eff, f_eff)), s1(p['f2_b2'], d_eff),
        s1(p['fin_lnw'], d_eff), s1(p['fin_lnb'], d_eff),
    ]


def conformer_forward(x, lengths, full_layer_params, idx, num_heads,
                      input_dim, ffn_dim, switches=(0.75, 1.0)):
    """x: (B, T, D_eff) where D_eff = int(switches[idx] * input_dim)."""
    B, T, D_eff = x.shape
    F_eff = int(switches[idx] * ffn_dim)
    assert D_eff == int(switches[idx] * input_dim)
    # _lengths_to_padding_mask: True (1.0) where position >= length
    mask = (jnp.arange(T)[None, :] >= lengths[:, None]).astype(jnp.float32)
    per_layer = [slice_and_pack_layer(p, D_eff, F_eff, num_heads)
                 for p in full_layer_params]
    n_params = len(per_layer[0])
    stacked = [jnp.stack([lp[i] for lp in per_layer], axis=0) for i in range(n_params)]
    out = run_conformer_stack(x, mask, stacked, num_heads)
    return out, lengths


# ------------------------------------------------------------------ main
if __name__ == "__main__":
    input_dim = 32
    num_heads = 4
    ffn_dim = 64
    num_layers = 2
    depthwise_conv_kernel_size = 7
    switches = (0.75, 1.0)
    idx = 1                                   # full-width switch
    B, T = 2, 8

    D_eff = int(switches[idx] * input_dim)

    key = jax.random.PRNGKey(0)
    kx, *lkeys = jax.random.split(key, num_layers + 1)
    x = jax.random.normal(kx, (B, T, D_eff), jnp.float32)     # (B, T, input_dim)
    lengths = jnp.array([T, T - 3], dtype=jnp.int32)          # (B,)

    params = [init_layer_params(k, input_dim, ffn_dim, depthwise_conv_kernel_size)
              for k in lkeys]

    out, out_lengths = conformer_forward(
        x, lengths, params, idx, num_heads, input_dim, ffn_dim, switches)
    out = jax.block_until_ready(out)

    assert out.shape == (B, T, D_eff)
    assert bool(jnp.all(jnp.isfinite(out)))
    print("KERNEL_OK")
</pallas_src>

<mosaic_0001>
module attributes {stable_mosaic.version = 11 : i64} {
  func.func @kernel(%arg0: i32, %arg1: memref<2x8x32xf32, #tpu.memory_space<vmem>>, %arg2: memref<2x8xf32, #tpu.memory_space<vmem>>, %arg3: memref<1x1x32xf32, #tpu.memory_space<vmem>>, %arg4: memref<1x1x32xf32, #tpu.memory_space<vmem>>, %arg5: memref<1x64x32xbf16, #tpu.memory_space<vmem>>, %arg6: memref<1x1x64xf32, #tpu.memory_space<vmem>>, %arg7: memref<1x32x64xbf16, #tpu.memory_space<vmem>>, %arg8: memref<1x1x32xf32, #tpu.memory_space<vmem>>, %arg9: memref<1x1x32xf32, #tpu.memory_space<vmem>>, %arg10: memref<1x1x32xf32, #tpu.memory_space<vmem>>, %arg11: memref<1x32x32xbf16, #tpu.memory_space<vmem>>, %arg12: memref<1x1x32xf32, #tpu.memory_space<vmem>>, %arg13: memref<1x32x32xbf16, #tpu.memory_space<vmem>>, %arg14: memref<1x1x32xf32, #tpu.memory_space<vmem>>, %arg15: memref<1x32x32xbf16, #tpu.memory_space<vmem>>, %arg16: memref<1x1x32xf32, #tpu.memory_space<vmem>>, %arg17: memref<1x4x32x8xbf16, #tpu.memory_space<vmem>>, %arg18: memref<1x1x32xf32, #tpu.memory_space<vmem>>, %arg19: memref<1x1x32xf32, #tpu.memory_space<vmem>>, %arg20: memref<1x1x32xf32, #tpu.memory_space<vmem>>, %arg21: memref<1x64x32xbf16, #tpu.memory_space<vmem>>, %arg22: memref<1x1x64xf32, #tpu.memory_space<vmem>>, %arg23: memref<1x7x32xf32, #tpu.memory_space<vmem>>, %arg24: memref<1x1x32xf32, #tpu.memory_space<vmem>>, %arg25: memref<1x1x32xf32, #tpu.memory_space<vmem>>, %arg26: memref<1x1x32xf32, #tpu.memory_space<vmem>>, %arg27: memref<1x32x32xbf16, #tpu.memory_space<vmem>>, %arg28: memref<1x1x32xf32, #tpu.memory_space<vmem>>, %arg29: memref<1x1x32xf32, #tpu.memory_space<vmem>>, %arg30: memref<1x1x32xf32, #tpu.memory_space<vmem>>, %arg31: memref<1x64x32xbf16, #tpu.memory_space<vmem>>, %arg32: memref<1x1x64xf32, #tpu.memory_space<vmem>>, %arg33: memref<1x32x64xbf16, #tpu.memory_space<vmem>>, %arg34: memref<1x1x32xf32, #tpu.memory_space<vmem>>, %arg35: memref<1x1x32xf32, #tpu.memory_space<vmem>>, %arg36: memref<1x1x32xf32, #tpu.memory_space<vmem>>, %arg37: memref<2x8x32xf32, #tpu.memory_space<vmem>>, %arg38: memref<2x8x32xf32, #tpu.memory_space<vmem>>) attributes {dimension_semantics = [#tpu.dimension_semantics<arbitrary>], iteration_bounds = array<i64: 2>, scalar_prefetch = 0 : i64, scratch_operands = 1 : i64, tpu.core_type = #tpu.core_type<tc>, window_params = [{pipeline_mode = #tpu.pipeline_mode<synchronous>, transform_indices = @transform_0, window_bounds = array<i64: 2, 8, 32>}, {pipeline_mode = #tpu.pipeline_mode<synchronous>, transform_indices = @transform_1, window_bounds = array<i64: 2, 8>}, {transform_indices = @transform_2, window_bounds = array<i64: 1, 1, 32>}, {transform_indices = @transform_3, window_bounds = array<i64: 1, 1, 32>}, {transform_indices = @transform_4, window_bounds = array<i64: 1, 64, 32>}, {transform_indices = @transform_5, window_bounds = array<i64: 1, 1, 64>}, {transform_indices = @transform_6, window_bounds = array<i64: 1, 32, 64>}, {transform_indices = @transform_7, window_bounds = array<i64: 1, 1, 32>}, {transform_indices = @transform_8, window_bounds = array<i64: 1, 1, 32>}, {transform_indices = @transform_9, window_bounds = array<i64: 1, 1, 32>}, {transform_indices = @transform_10, window_bounds = array<i64: 1, 32, 32>}, {transform_indices = @transform_11, window_bounds = array<i64: 1, 1, 32>}, {transform_indices = @transform_12, window_bounds = array<i64: 1, 32, 32>}, {transform_indices = @transform_13, window_bounds = array<i64: 1, 1, 32>}, {transform_indices = @transform_14, window_bounds = array<i64: 1, 32, 32>}, {transform_indices = @transform_15, window_bounds = array<i64: 1, 1, 32>}, {transform_indices = @transform_16, window_bounds = array<i64: 1, 4, 32, 8>}, {transform_indices = @transform_17, window_bounds = array<i64: 1, 1, 32>}, {transform_indices = @transform_18, window_bounds = array<i64: 1, 1, 32>}, {transform_indices = @transform_19, window_bounds = array<i64: 1, 1, 32>}, {transform_indices = @transform_20, window_bounds = array<i64: 1, 64, 32>}, {transform_indices = @transform_21, window_bounds = array<i64: 1, 1, 64>}, {transform_indices = @transform_22, window_bounds = array<i64: 1, 7, 32>}, {transform_indices = @transform_23, window_bounds = array<i64: 1, 1, 32>}, {transform_indices = @transform_24, window_bounds = array<i64: 1, 1, 32>}, {transform_indices = @transform_25, window_bounds = array<i64: 1, 1, 32>}, {transform_indices = @transform_26, window_bounds = array<i64: 1, 32, 32>}, {transform_indices = @transform_27, window_bounds = array<i64: 1, 1, 32>}, {transform_indices = @transform_28, window_bounds = array<i64: 1, 1, 32>}, {transform_indices = @transform_29, window_bounds = array<i64: 1, 1, 32>}, {transform_indices = @transform_30, window_bounds = array<i64: 1, 64, 32>}, {transform_indices = @transform_31, window_bounds = array<i64: 1, 1, 64>}, {transform_indices = @transform_32, window_bounds = array<i64: 1, 32, 64>}, {transform_indices = @transform_33, window_bounds = array<i64: 1, 1, 32>}, {transform_indices = @transform_34, window_bounds = array<i64: 1, 1, 32>}, {transform_indices = @transform_35, window_bounds = array<i64: 1, 1, 32>}, {pipeline_mode = #tpu.pipeline_mode<synchronous>, transform_indices = @transform_36, window_bounds = array<i64: 2, 8, 32>}]} {
    %c0_i32 = arith.constant 0 : i32
    %0 = arith.cmpi eq, %arg0, %c0_i32 : i32
    %1 = arith.extui %0 : i1 to i32
    %c0_i32_0 = arith.constant 0 : i32
    %2 = arith.cmpi ne, %1, %c0_i32_0 : i32
    scf.if %2 {
      %c0_200 = arith.constant 0 : index
      %c0_201 = arith.constant 0 : index
      %c0_202 = arith.constant 0 : index
      %538 = vector.load %arg1[%c0_200, %c0_201, %c0_202] : memref<2x8x32xf32, #tpu.memory_space<vmem>>, vector<2x8x32xf32>
      %c0_203 = arith.constant 0 : index
      %c0_204 = arith.constant 0 : index
      %c0_205 = arith.constant 0 : index
      %539 = vector.load %arg38[%c0_203, %c0_204, %c0_205] : memref<2x8x32xf32, #tpu.memory_space<vmem>>, vector<2x8x32xf32>
      tpu.vector_store %arg38[%c0_203, %c0_204, %c0_205], %538 {strides = array<i32>} : memref<2x8x32xf32, #tpu.memory_space<vmem>>, vector<2x8x32xf32>,
    } else {
    }
    %c0 = arith.constant 0 : index
    %c0_1 = arith.constant 0 : index
    %c0_2 = arith.constant 0 : index
    %3 = vector.load %arg38[%c0, %c0_1, %c0_2] : memref<2x8x32xf32, #tpu.memory_space<vmem>>, vector<2x8x32xf32>
    %c0_3 = arith.constant 0 : index
    %c0_4 = arith.constant 0 : index
    %4 = vector.load %arg2[%c0_3, %c0_4] : memref<2x8xf32, #tpu.memory_space<vmem>>, vector<2x8xf32>
    %cst = arith.constant dense<0.000000e+00> : vector<2x8xf32>
    %5 = vector.multi_reduction <add>, %3, %cst [2] : vector<2x8x32xf32> to vector<2x8xf32>
    %6 = vector.shape_cast %5 : vector<2x8xf32> to vector<2x8x1xf32>
    %cst_5 = arith.constant 3.200000e+01 : f32
    %7 = vector.broadcast %cst_5 : f32 to vector<2x8x1xf32>
    %8 = arith.divf %6, %7 : vector<2x8x1xf32>
    %9 = vector.broadcast %8 : vector<2x8x1xf32> to vector<2x8x32xf32>
    %10 = arith.subf %3, %9 : vector<2x8x32xf32>
    %11 = arith.mulf %10, %10 : vector<2x8x32xf32>
    %cst_6 = arith.constant dense<0.000000e+00> : vector<2x8xf32>
    %12 = vector.multi_reduction <add>, %11, %cst_6 [2] : vector<2x8x32xf32> to vector<2x8xf32>
    %13 = vector.shape_cast %12 : vector<2x8xf32> to vector<2x8x1xf32>
    %cst_7 = arith.constant 3.200000e+01 : f32
    %14 = vector.broadcast %cst_7 : f32 to vector<2x8x1xf32>
    %15 = arith.divf %13, %14 : vector<2x8x1xf32>
    %16 = vector.broadcast %8 : vector<2x8x1xf32> to vector<2x8x32xf32>
    %17 = arith.subf %3, %16 : vector<2x8x32xf32>
    %cst_8 = arith.constant 9.99999974E-6 : f32
    %18 = vector.broadcast %cst_8 : f32 to vector<2x8x1xf32>
    %19 = arith.addf %15, %18 : vector<2x8x1xf32>
    %20 = math.rsqrt %19 : vector<2x8x1xf32>
    %21 = vector.broadcast %20 : vector<2x8x1xf32> to vector<2x8x32xf32>
    %22 = arith.mulf %17, %21 : vector<2x8x32xf32>
    %c0_9 = arith.constant 0 : index
    %c0_10 = arith.constant 0 : index
    %c0_11 = arith.constant 0 : index
    %23 = vector.load %arg3[%c0_9, %c0_10, %c0_11] : memref<1x1x32xf32, #tpu.memory_space<vmem>>, vector<1x1x32xf32>
    %24 = vector.shape_cast %23 : vector<1x1x32xf32> to vector<1x32xf32>
    %25 = vector.shape_cast %24 : vector<1x32xf32> to vector<1x1x32xf32>
    %26 = vector.broadcast %25 : vector<1x1x32xf32> to vector<2x8x32xf32>
    %27 = arith.mulf %22, %26 : vector<2x8x32xf32>
    %c0_12 = arith.constant 0 : index
    %c0_13 = arith.constant 0 : index
    %c0_14 = arith.constant 0 : index
    %28 = vector.load %arg4[%c0_12, %c0_13, %c0_14] : memref<1x1x32xf32, #tpu.memory_space<vmem>>, vector<1x1x32xf32>
    %29 = vector.shape_cast %28 : vector<1x1x32xf32> to vector<1x32xf32>
    %30 = vector.shape_cast %29 : vector<1x32xf32> to vector<1x1x32xf32>
    %31 = vector.broadcast %30 : vector<1x1x32xf32> to vector<2x8x32xf32>
    %32 = arith.addf %27, %31 : vector<2x8x32xf32>
    %c0_15 = arith.constant 0 : index
    %c0_16 = arith.constant 0 : index
    %c0_17 = arith.constant 0 : index
    %33 = vector.load %arg5[%c0_15, %c0_16, %c0_17] : memref<1x64x32xbf16, #tpu.memory_space<vmem>>, vector<1x64x32xbf16>
    %34 = vector.shape_cast %33 : vector<1x64x32xbf16> to vector<64x32xbf16>
    %35 = vector.shape_cast %32 : vector<2x8x32xf32> to vector<16x32xf32>
    %36 = arith.truncf %35 : vector<16x32xf32> to vector<16x32xbf16>
    %cst_18 = arith.constant dense<0.000000e+00> : vector<16x64xf32>
    %37 = tpu.matmul %36, %34, %cst_18 {dimension_numbers = #tpu.dot_dimension_numbers<[1], [1], [0], [0], [0, 0, 1, 0], [], []>} : vector<16x32xbf16>, vector<64x32xbf16>, vector<16x64xf32> -> vector<16x64xf32>
    %38 = vector.shape_cast %37 : vector<16x64xf32> to vector<2x8x64xf32>
    %c0_19 = arith.constant 0 : index
    %c0_20 = arith.constant 0 : index
    %c0_21 = arith.constant 0 : index
    %39 = vector.load %arg6[%c0_19, %c0_20, %c0_21] : memref<1x1x64xf32, #tpu.memory_space<vmem>>, vector<1x1x64xf32>
    %40 = vector.shape_cast %39 : vector<1x1x64xf32> to vector<1x64xf32>
    %41 = vector.shape_cast %40 : vector<1x64xf32> to vector<1x1x64xf32>
    %42 = vector.broadcast %41 : vector<1x1x64xf32> to vector<2x8x64xf32>
    %43 = arith.addf %38, %42 : vector<2x8x64xf32>
    %44 = arith.negf %43 : vector<2x8x64xf32>
    %45 = math.exp %44 : vector<2x8x64xf32>
    %cst_22 = arith.constant 1.000000e+00 : f32
    %46 = vector.broadcast %cst_22 : f32 to vector<2x8x64xf32>
    %47 = arith.addf %46, %45 : vector<2x8x64xf32>
    %48 = arith.divf %46, %47 : vector<2x8x64xf32>
    %49 = arith.mulf %43, %48 : vector<2x8x64xf32>
    %c0_23 = arith.constant 0 : index
    %c0_24 = arith.constant 0 : index
    %c0_25 = arith.constant 0 : index
    %50 = vector.load %arg7[%c0_23, %c0_24, %c0_25] : memref<1x32x64xbf16, #tpu.memory_space<vmem>>, vector<1x32x64xbf16>
    %51 = vector.shape_cast %50 : vector<1x32x64xbf16> to vector<32x64xbf16>
    %52 = vector.shape_cast %49 : vector<2x8x64xf32> to vector<16x64xf32>
    %53 = arith.truncf %52 : vector<16x64xf32> to vector<16x64xbf16>
    %cst_26 = arith.constant dense<0.000000e+00> : vector<16x32xf32>
    %54 = tpu.matmul %53, %51, %cst_26 {dimension_numbers = #tpu.dot_dimension_numbers<[1], [1], [0], [0], [0, 0, 1, 0], [], []>} : vector<16x64xbf16>, vector<32x64xbf16>, vector<16x32xf32> -> vector<16x32xf32>
    %55 = vector.shape_cast %54 : vector<16x32xf32> to vector<2x8x32xf32>
    %c0_27 = arith.constant 0 : index
    %c0_28 = arith.constant 0 : index
    %c0_29 = arith.constant 0 : index
    %56 = vector.load %arg8[%c0_27, %c0_28, %c0_29] : memref<1x1x32xf32, #tpu.memory_space<vmem>>, vector<1x1x32xf32>
    %57 = vector.shape_cast %56 : vector<1x1x32xf32> to vector<1x32xf32>
    %58 = vector.shape_cast %57 : vector<1x32xf32> to vector<1x1x32xf32>
    %59 = vector.broadcast %58 : vector<1x1x32xf32> to vector<2x8x32xf32>
    %60 = arith.addf %55, %59 : vector<2x8x32xf32>
    %cst_30 = arith.constant 5.000000e-01 : f32
    %61 = vector.broadcast %cst_30 : f32 to vector<2x8x32xf32>
    %62 = arith.mulf %61, %60 : vector<2x8x32xf32>
    %63 = arith.addf %62, %3 : vector<2x8x32xf32>
    %cst_31 = arith.constant dense<0.000000e+00> : vector<2x8xf32>
    %64 = vector.multi_reduction <add>, %63, %cst_31 [2] : vector<2x8x32xf32> to vector<2x8xf32>
    %65 = vector.shape_cast %64 : vector<2x8xf32> to vector<2x8x1xf32>
    %cst_32 = arith.constant 3.200000e+01 : f32
    %66 = vector.broadcast %cst_32 : f32 to vector<2x8x1xf32>
    %67 = arith.divf %65, %66 : vector<2x8x1xf32>
    %68 = vector.broadcast %67 : vector<2x8x1xf32> to vector<2x8x32xf32>
    %69 = arith.subf %63, %68 : vector<2x8x32xf32>
    %70 = arith.mulf %69, %69 : vector<2x8x32xf32>
    %cst_33 = arith.constant dense<0.000000e+00> : vector<2x8xf32>
    %71 = vector.multi_reduction <add>, %70, %cst_33 [2] : vector<2x8x32xf32> to vector<2x8xf32>
    %72 = vector.shape_cast %71 : vector<2x8xf32> to vector<2x8x1xf32>
    %cst_34 = arith.constant 3.200000e+01 : f32
    %73 = vector.broadcast %cst_34 : f32 to vector<2x8x1xf32>
    %74 = arith.divf %72, %73 : vector<2x8x1xf32>
    %75 = vector.broadcast %67 : vector<2x8x1xf32> to vector<2x8x32xf32>
    %76 = arith.subf %63, %75 : vector<2x8x32xf32>
    %cst_35 = arith.constant 9.99999974E-6 : f32
    %77 = vector.broadcast %cst_35 : f32 to vector<2x8x1xf32>
    %78 = arith.addf %74, %77 : vector<2x8x1xf32>
    %79 = math.rsqrt %78 : vector<2x8x1xf32>
    %80 = vector.broadcast %79 : vector<2x8x1xf32> to vector<2x8x32xf32>
    %81 = arith.mulf %76, %80 : vector<2x8x32xf32>
    %c0_36 = arith.constant 0 : index
    %c0_37 = arith.constant 0 : index
    %c0_38 = arith.constant 0 : index
    %82 = vector.load %arg9[%c0_36, %c0_37, %c0_38] : memref<1x1x32xf32, #tpu.memory_space<vmem>>, vector<1x1x32xf32>
    %83 = vector.shape_cast %82 : vector<1x1x32xf32> to vector<1x32xf32>
    %84 = vector.shape_cast %83 : vector<1x32xf32> to vector<1x1x32xf32>
    %85 = vector.broadcast %84 : vector<1x1x32xf32> to vector<2x8x32xf32>
    %86 = arith.mulf %81, %85 : vector<2x8x32xf32>
    %c0_39 = arith.constant 0 : index
    %c0_40 = arith.constant 0 : index
    %c0_41 = arith.constant 0 : index
    %87 = vector.load %arg10[%c0_39, %c0_40, %c0_41] : memref<1x1x32xf32, #tpu.memory_space<vmem>>, vector<1x1x32xf32>
    %88 = vector.shape_cast %87 : vector<1x1x32xf32> to vector<1x32xf32>
    %89 = vector.shape_cast %88 : vector<1x32xf32> to vector<1x1x32xf32>
    %90 = vector.broadcast %89 : vector<1x1x32xf32> to vector<2x8x32xf32>
    %91 = arith.addf %86, %90 : vector<2x8x32xf32>
    %c0_42 = arith.constant 0 : index
    %c0_43 = arith.constant 0 : index
    %c0_44 = arith.constant 0 : index
    %92 = vector.load %arg11[%c0_42, %c0_43, %c0_44] : memref<1x32x32xbf16, #tpu.memory_space<vmem>>, vector<1x32x32xbf16>
    %93 = vector.shape_cast %92 : vector<1x32x32xbf16> to vector<32x32xbf16>
    %94 = vector.shape_cast %91 : vector<2x8x32xf32> to vector<16x32xf32>
    %95 = arith.truncf %94 : vector<16x32xf32> to vector<16x32xbf16>
    %cst_45 = arith.constant dense<0.000000e+00> : vector<16x32xf32>
    %96 = tpu.matmul %95, %93, %cst_45 {dimension_numbers = #tpu.dot_dimension_numbers<[1], [1], [0], [0], [0, 0, 1, 0], [], []>} : vector<16x32xbf16>, vector<32x32xbf16>, vector<16x32xf32> -> vector<16x32xf32>
    %97 = vector.shape_cast %96 : vector<16x32xf32> to vector<2x8x32xf32>
    %c0_46 = arith.constant 0 : index
    %c0_47 = arith.constant 0 : index
    %c0_48 = arith.constant 0 : index
    %98 = vector.load %arg12[%c0_46, %c0_47, %c0_48] : memref<1x1x32xf32, #tpu.memory_space<vmem>>, vector<1x1x32xf32>
    %99 = vector.shape_cast %98 : vector<1x1x32xf32> to vector<1x32xf32>
    %100 = vector.shape_cast %99 : vector<1x32xf32> to vector<1x1x32xf32>
    %101 = vector.broadcast %100 : vector<1x1x32xf32> to vector<2x8x32xf32>
    %102 = arith.addf %97, %101 : vector<2x8x32xf32>
    %cst_49 = arith.constant 0.353553385 : f32
    %103 = vector.broadcast %cst_49 : f32 to vector<2x8x32xf32>
    %104 = arith.mulf %102, %103 : vector<2x8x32xf32>
    %c0_50 = arith.constant 0 : index
    %c0_51 = arith.constant 0 : index
    %c0_52 = arith.constant 0 : index
    %105 = vector.load %arg13[%c0_50, %c0_51, %c0_52] : memref<1x32x32xbf16, #tpu.memory_space<vmem>>, vector<1x32x32xbf16>
    %106 = vector.shape_cast %105 : vector<1x32x32xbf16> to vector<32x32xbf16>
    %107 = vector.shape_cast %91 : vector<2x8x32xf32> to vector<16x32xf32>
    %108 = arith.truncf %107 : vector<16x32xf32> to vector<16x32xbf16>
    %cst_53 = arith.constant dense<0.000000e+00> : vector<16x32xf32>
    %109 = tpu.matmul %108, %106, %cst_53 {dimension_numbers = #tpu.dot_dimension_numbers<[1], [1], [0], [0], [0, 0, 1, 0], [], []>} : vector<16x32xbf16>, vector<32x32xbf16>, vector<16x32xf32> -> vector<16x32xf32>
    %110 = vector.shape_cast %109 : vector<16x32xf32> to vector<2x8x32xf32>
    %c0_54 = arith.constant 0 : index
    %c0_55 = arith.constant 0 : index
    %c0_56 = arith.constant 0 : index
    %111 = vector.load %arg14[%c0_54, %c0_55, %c0_56] : memref<1x1x32xf32, #tpu.memory_space<vmem>>, vector<1x1x32xf32>
    %112 = vector.shape_cast %111 : vector<1x1x32xf32> to vector<1x32xf32>
    %113 = vector.shape_cast %112 : vector<1x32xf32> to vector<1x1x32xf32>
    %114 = vector.broadcast %113 : vector<1x1x32xf32> to vector<2x8x32xf32>
    %115 = arith.addf %110, %114 : vector<2x8x32xf32>
    %c0_57 = arith.constant 0 : index
    %c0_58 = arith.constant 0 : index
    %c0_59 = arith.constant 0 : index
    %116 = vector.load %arg15[%c0_57, %c0_58, %c0_59] : memref<1x32x32xbf16, #tpu.memory_space<vmem>>, vector<1x32x32xbf16>
    %117 = vector.shape_cast %116 : vector<1x32x32xbf16> to vector<32x32xbf16>
    %118 = vector.shape_cast %91 : vector<2x8x32xf32> to vector<16x32xf32>
    %119 = arith.truncf %118 : vector<16x32xf32> to vector<16x32xbf16>
    %cst_60 = arith.constant dense<0.000000e+00> : vector<16x32xf32>
    %120 = tpu.matmul %119, %117, %cst_60 {dimension_numbers = #tpu.dot_dimension_numbers<[1], [1], [0], [0], [0, 0, 1, 0], [], []>} : vector<16x32xbf16>, vector<32x32xbf16>, vector<16x32xf32> -> vector<16x32xf32>
    %121 = vector.shape_cast %120 : vector<16x32xf32> to vector<2x8x32xf32>
    %c0_61 = arith.constant 0 : index
    %c0_62 = arith.constant 0 : index
    %c0_63 = arith.constant 0 : index
    %122 = vector.load %arg16[%c0_61, %c0_62, %c0_63] : memref<1x1x32xf32, #tpu.memory_space<vmem>>, vector<1x1x32xf32>
    %123 = vector.shape_cast %122 : vector<1x1x32xf32> to vector<1x32xf32>
    %124 = vector.shape_cast %123 : vector<1x32xf32> to vector<1x1x32xf32>
    %125 = vector.broadcast %124 : vector<1x1x32xf32> to vector<2x8x32xf32>
    %126 = arith.addf %121, %125 : vector<2x8x32xf32>
    %127 = vector.shape_cast %4 : vector<2x8xf32> to vector<2x1x8xf32>
    %cst_64 = arith.constant 1.000000e+30 : f32
    %128 = vector.broadcast %cst_64 : f32 to vector<2x1x8xf32>
    %129 = arith.mulf %127, %128 : vector<2x1x8xf32>
    %c0_65 = arith.constant 0 : index
    %c0_66 = arith.constant 0 : index
    %c0_67 = arith.constant 0 : index
    %c0_68 = arith.constant 0 : index
    %130 = vector.load %arg17[%c0_65, %c0_66, %c0_67, %c0_68] : memref<1x4x32x8xbf16, #tpu.memory_space<vmem>>, vector<1x4x32x8xbf16>
    %131 = vector.shape_cast %130 : vector<1x4x32x8xbf16> to vector<4x32x8xbf16>
    %cst_69 = arith.constant 0.000000e+00 : f32
    %132 = vector.broadcast %cst_69 : f32 to vector<2x8x32xf32>
    %133 = vector.extract_strided_slice %104 {offsets = [0, 0, 0], sizes = [2, 8, 8], strides = [1, 1, 1]} : vector<2x8x32xf32> to vector<2x8x8xf32>
    %134 = arith.truncf %133 : vector<2x8x8xf32> to vector<2x8x8xbf16>
    %135 = vector.extract_strided_slice %115 {offsets = [0, 0, 0], sizes = [2, 8, 8], strides = [1, 1, 1]} : vector<2x8x32xf32> to vector<2x8x8xf32>
    %136 = arith.truncf %135 : vector<2x8x8xf32> to vector<2x8x8xbf16>
    %137 = vector.extract_strided_slice %126 {offsets = [0, 0, 0], sizes = [2, 8, 8], strides = [1, 1, 1]} : vector<2x8x32xf32> to vector<2x8x8xf32>
    %138 = arith.truncf %137 : vector<2x8x8xf32> to vector<2x8x8xbf16>
    "tpu.trace_start"() <{level = 10 : i32, message = "btd,bsd->bts"}> : () -> ()
    %cst_70 = arith.constant dense<0.000000e+00> : vector<2x8x8xf32>
    %139 = tpu.matmul %134, %136, %cst_70 {dimension_numbers = #tpu.dot_dimension_numbers<[2], [2], [1], [1], [0, 0, 0, 1, 1, 1], [0], [0]>} : vector<2x8x8xbf16>, vector<2x8x8xbf16>, vector<2x8x8xf32> -> vector<2x8x8xf32>
    "tpu.trace_stop"() : () -> ()
    %140 = vector.broadcast %129 : vector<2x1x8xf32> to vector<2x8x8xf32>
    %141 = arith.subf %139, %140 : vector<2x8x8xf32>
    %cst_71 = arith.constant dense<0xFF800000> : vector<2x8xf32>
    %142 = vector.multi_reduction <maximumf>, %141, %cst_71 [2] : vector<2x8x8xf32> to vector<2x8xf32>
    %143 = vector.shape_cast %142 : vector<2x8xf32> to vector<2x8x1xf32>
    %144 = vector.broadcast %143 : vector<2x8x1xf32> to vector<2x8x8xf32>
    %145 = arith.subf %141, %144 : vector<2x8x8xf32>
    %146 = math.exp %145 : vector<2x8x8xf32>
    %cst_72 = arith.constant dense<0.000000e+00> : vector<2x8xf32>
    %147 = vector.multi_reduction <add>, %146, %cst_72 [2] : vector<2x8x8xf32> to vector<2x8xf32>
    %148 = vector.shape_cast %147 : vector<2x8xf32> to vector<2x8x1xf32>
    %149 = tpu.reciprocal %148 {approx = true} : vector<2x8x1xf32> -> vector<2x8x1xf32>
    %150 = vector.broadcast %149 : vector<2x8x1xf32> to vector<2x8x8xf32>
    %151 = arith.mulf %146, %150 : vector<2x8x8xf32>
    %152 = arith.truncf %151 : vector<2x8x8xf32> to vector<2x8x8xbf16>
    "tpu.trace_start"() <{level = 10 : i32, message = "bts,bsd->btd"}> : () -> ()
    %cst_73 = arith.constant dense<0.000000e+00> : vector<2x8x8xf32>
    %153 = tpu.matmul %152, %138, %cst_73 {dimension_numbers = #tpu.dot_dimension_numbers<[2], [1], [1], [2], [0, 0, 0, 1, 1, 2], [0], [0]>} : vector<2x8x8xbf16>, vector<2x8x8xbf16>, vector<2x8x8xf32> -> vector<2x8x8xf32>
    "tpu.trace_stop"() : () -> ()
    %154 = vector.shape_cast %153 : vector<2x8x8xf32> to vector<16x8xf32>
    %155 = vector.extract_strided_slice %131 {offsets = [0, 0, 0], sizes = [1, 32, 8], strides = [1, 1, 1]} : vector<4x32x8xbf16> to vector<1x32x8xbf16>
    %156 = vector.shape_cast %155 : vector<1x32x8xbf16> to vector<32x8xbf16>
    %157 = arith.truncf %154 : vector<16x8xf32> to vector<16x8xbf16>
    %cst_74 = arith.constant dense<0.000000e+00> : vector<16x32xf32>
    %158 = tpu.matmul %157, %156, %cst_74 {dimension_numbers = #tpu.dot_dimension_numbers<[1], [1], [0], [0], [0, 0, 1, 0], [], []>} : vector<16x8xbf16>, vector<32x8xbf16>, vector<16x32xf32> -> vector<16x32xf32>
    %159 = vector.shape_cast %158 : vector<16x32xf32> to vector<2x8x32xf32>
    %160 = arith.addf %132, %159 : vector<2x8x32xf32>
    %161 = vector.extract_strided_slice %104 {offsets = [0, 0, 8], sizes = [2, 8, 8], strides = [1, 1, 1]} : vector<2x8x32xf32> to vector<2x8x8xf32>
    %162 = arith.truncf %161 : vector<2x8x8xf32> to vector<2x8x8xbf16>
    %163 = vector.extract_strided_slice %115 {offsets = [0, 0, 8], sizes = [2, 8, 8], strides = [1, 1, 1]} : vector<2x8x32xf32> to vector<2x8x8xf32>
    %164 = arith.truncf %163 : vector<2x8x8xf32> to vector<2x8x8xbf16>
    %165 = vector.extract_strided_slice %126 {offsets = [0, 0, 8], sizes = [2, 8, 8], strides = [1, 1, 1]} : vector<2x8x32xf32> to vector<2x8x8xf32>
    %166 = arith.truncf %165 : vector<2x8x8xf32> to vector<2x8x8xbf16>
    "tpu.trace_start"() <{level = 10 : i32, message = "btd,bsd->bts"}> : () -> ()
    %cst_75 = arith.constant dense<0.000000e+00> : vector<2x8x8xf32>
    %167 = tpu.matmul %162, %164, %cst_75 {dimension_numbers = #tpu.dot_dimension_numbers<[2], [2], [1], [1], [0, 0, 0, 1, 1, 1], [0], [0]>} : vector<2x8x8xbf16>, vector<2x8x8xbf16>, vector<2x8x8xf32> -> vector<2x8x8xf32>
    "tpu.trace_stop"() : () -> ()
    %168 = vector.broadcast %129 : vector<2x1x8xf32> to vector<2x8x8xf32>
    %169 = arith.subf %167, %168 : vector<2x8x8xf32>
    %cst_76 = arith.constant dense<0xFF800000> : vector<2x8xf32>
    %170 = vector.multi_reduction <maximumf>, %169, %cst_76 [2] : vector<2x8x8xf32> to vector<2x8xf32>
    %171 = vector.shape_cast %170 : vector<2x8xf32> to vector<2x8x1xf32>
    %172 = vector.broadcast %171 : vector<2x8x1xf32> to vector<2x8x8xf32>
    %173 = arith.subf %169, %172 : vector<2x8x8xf32>
    %174 = math.exp %173 : vector<2x8x8xf32>
    %cst_77 = arith.constant dense<0.000000e+00> : vector<2x8xf32>
    %175 = vector.multi_reduction <add>, %174, %cst_77 [2] : vector<2x8x8xf32> to vector<2x8xf32>
    %176 = vector.shape_cast %175 : vector<2x8xf32> to vector<2x8x1xf32>
    %177 = tpu.reciprocal %176 {approx = true} : vector<2x8x1xf32> -> vector<2x8x1xf32>
    %178 = vector.broadcast %177 : vector<2x8x1xf32> to vector<2x8x8xf32>
    %179 = arith.mulf %174, %178 : vector<2x8x8xf32>
    %180 = arith.truncf %179 : vector<2x8x8xf32> to vector<2x8x8xbf16>
    "tpu.trace_start"() <{level = 10 : i32, message = "bts,bsd->btd"}> : () -> ()
    %cst_78 = arith.constant dense<0.000000e+00> : vector<2x8x8xf32>
    %181 = tpu.matmul %180, %166, %cst_78 {dimension_numbers = #tpu.dot_dimension_numbers<[2], [1], [1], [2], [0, 0, 0, 1, 1, 2], [0], [0]>} : vector<2x8x8xbf16>, vector<2x8x8xbf16>, vector<2x8x8xf32> -> vector<2x8x8xf32>
    "tpu.trace_stop"() : () -> ()
    %182 = vector.shape_cast %181 : vector<2x8x8xf32> to vector<16x8xf32>
    %183 = vector.extract_strided_slice %131 {offsets = [1, 0, 0], sizes = [1, 32, 8], strides = [1, 1, 1]} : vector<4x32x8xbf16> to vector<1x32x8xbf16>
    %184 = vector.shape_cast %183 : vector<1x32x8xbf16> to vector<32x8xbf16>
    %185 = arith.truncf %182 : vector<16x8xf32> to vector<16x8xbf16>
    %cst_79 = arith.constant dense<0.000000e+00> : vector<16x32xf32>
    %186 = tpu.matmul %185, %184, %cst_79 {dimension_numbers = #tpu.dot_dimension_numbers<[1], [1], [0], [0], [0, 0, 1, 0], [], []>} : vector<16x8xbf16>, vector<32x8xbf16>, vector<16x32xf32> -> vector<16x32xf32>
    %187 = vector.shape_cast %186 : vector<16x32xf32> to vector<2x8x32xf32>
    %188 = arith.addf %160, %187 : vector<2x8x32xf32>
    %189 = vector.extract_strided_slice %104 {offsets = [0, 0, 16], sizes = [2, 8, 8], strides = [1, 1, 1]} : vector<2x8x32xf32> to vector<2x8x8xf32>
    %190 = arith.truncf %189 : vector<2x8x8xf32> to vector<2x8x8xbf16>
    %191 = vector.extract_strided_slice %115 {offsets = [0, 0, 16], sizes = [2, 8, 8], strides = [1, 1, 1]} : vector<2x8x32xf32> to vector<2x8x8xf32>
    %192 = arith.truncf %191 : vector<2x8x8xf32> to vector<2x8x8xbf16>
    %193 = vector.extract_strided_slice %126 {offsets = [0, 0, 16], sizes = [2, 8, 8], strides = [1, 1, 1]} : vector<2x8x32xf32> to vector<2x8x8xf32>
    %194 = arith.truncf %193 : vector<2x8x8xf32> to vector<2x8x8xbf16>
    "tpu.trace_start"() <{level = 10 : i32, message = "btd,bsd->bts"}> : () -> ()
    %cst_80 = arith.constant dense<0.000000e+00> : vector<2x8x8xf32>
    %195 = tpu.matmul %190, %192, %cst_80 {dimension_numbers = #tpu.dot_dimension_numbers<[2], [2], [1], [1], [0, 0, 0, 1, 1, 1], [0], [0]>} : vector<2x8x8xbf16>, vector<2x8x8xbf16>, vector<2x8x8xf32> -> vector<2x8x8xf32>
    "tpu.trace_stop"() : () -> ()
    %196 = vector.broadcast %129 : vector<2x1x8xf32> to vector<2x8x8xf32>
    %197 = arith.subf %195, %196 : vector<2x8x8xf32>
    %cst_81 = arith.constant dense<0xFF800000> : vector<2x8xf32>
    %198 = vector.multi_reduction <maximumf>, %197, %cst_81 [2] : vector<2x8x8xf32> to vector<2x8xf32>
    %199 = vector.shape_cast %198 : vector<2x8xf32> to vector<2x8x1xf32>
    %200 = vector.broadcast %199 : vector<2x8x1xf32> to vector<2x8x8xf32>
    %201 = arith.subf %197, %200 : vector<2x8x8xf32>
    %202 = math.exp %201 : vector<2x8x8xf32>
    %cst_82 = arith.constant dense<0.000000e+00> : vector<2x8xf32>
    %203 = vector.multi_reduction <add>, %202, %cst_82 [2] : vector<2x8x8xf32> to vector<2x8xf32>
    %204 = vector.shape_cast %203 : vector<2x8xf32> to vector<2x8x1xf32>
    %205 = tpu.reciprocal %204 {approx = true} : vector<2x8x1xf32> -> vector<2x8x1xf32>
    %206 = vector.broadcast %205 : vector<2x8x1xf32> to vector<2x8x8xf32>
    %207 = arith.mulf %202, %206 : vector<2x8x8xf32>
    %208 = arith.truncf %207 : vector<2x8x8xf32> to vector<2x8x8xbf16>
    "tpu.trace_start"() <{level = 10 : i32, message = "bts,bsd->btd"}> : () -> ()
    %cst_83 = arith.constant dense<0.000000e+00> : vector<2x8x8xf32>
    %209 = tpu.matmul %208, %194, %cst_83 {dimension_numbers = #tpu.dot_dimension_numbers<[2], [1], [1], [2], [0, 0, 0, 1, 1, 2], [0], [0]>} : vector<2x8x8xbf16>, vector<2x8x8xbf16>, vector<2x8x8xf32> -> vector<2x8x8xf32>
    "tpu.trace_stop"() : () -> ()
    %210 = vector.shape_cast %209 : vector<2x8x8xf32> to vector<16x8xf32>
    %211 = vector.extract_strided_slice %131 {offsets = [2, 0, 0], sizes = [1, 32, 8], strides = [1, 1, 1]} : vector<4x32x8xbf16> to vector<1x32x8xbf16>
    %212 = vector.shape_cast %211 : vector<1x32x8xbf16> to vector<32x8xbf16>
    %213 = arith.truncf %210 : vector<16x8xf32> to vector<16x8xbf16>
    %cst_84 = arith.constant dense<0.000000e+00> : vector<16x32xf32>
    %214 = tpu.matmul %213, %212, %cst_84 {dimension_numbers = #tpu.dot_dimension_numbers<[1], [1], [0], [0], [0, 0, 1, 0], [], []>} : vector<16x8xbf16>, vector<32x8xbf16>, vector<16x32xf32> -> vector<16x32xf32>
    %215 = vector.shape_cast %214 : vector<16x32xf32> to vector<2x8x32xf32>
    %216 = arith.addf %188, %215 : vector<2x8x32xf32>
    %217 = vector.extract_strided_slice %104 {offsets = [0, 0, 24], sizes = [2, 8, 8], strides = [1, 1, 1]} : vector<2x8x32xf32> to vector<2x8x8xf32>
    %218 = arith.truncf %217 : vector<2x8x8xf32> to vector<2x8x8xbf16>
    %219 = vector.extract_strided_slice %115 {offsets = [0, 0, 24], sizes = [2, 8, 8], strides = [1, 1, 1]} : vector<2x8x32xf32> to vector<2x8x8xf32>
    %220 = arith.truncf %219 : vector<2x8x8xf32> to vector<2x8x8xbf16>
    %221 = vector.extract_strided_slice %126 {offsets = [0, 0, 24], sizes = [2, 8, 8], strides = [1, 1, 1]} : vector<2x8x32xf32> to vector<2x8x8xf32>
    %222 = arith.truncf %221 : vector<2x8x8xf32> to vector<2x8x8xbf16>
    "tpu.trace_start"() <{level = 10 : i32, message = "btd,bsd->bts"}> : () -> ()
    %cst_85 = arith.constant dense<0.000000e+00> : vector<2x8x8xf32>
    %223 = tpu.matmul %218, %220, %cst_85 {dimension_numbers = #tpu.dot_dimension_numbers<[2], [2], [1], [1], [0, 0, 0, 1, 1, 1], [0], [0]>} : vector<2x8x8xbf16>, vector<2x8x8xbf16>, vector<2x8x8xf32> -> vector<2x8x8xf32>
    "tpu.trace_stop"() : () -> ()
    %224 = vector.broadcast %129 : vector<2x1x8xf32> to vector<2x8x8xf32>
    %225 = arith.subf %223, %224 : vector<2x8x8xf32>
    %cst_86 = arith.constant dense<0xFF800000> : vector<2x8xf32>
    %226 = vector.multi_reduction <maximumf>, %225, %cst_86 [2] : vector<2x8x8xf32> to vector<2x8xf32>
    %227 = vector.shape_cast %226 : vector<2x8xf32> to vector<2x8x1xf32>
    %228 = vector.broadcast %227 : vector<2x8x1xf32> to vector<2x8x8xf32>
    %229 = arith.subf %225, %228 : vector<2x8x8xf32>
    %230 = math.exp %229 : vector<2x8x8xf32>
    %cst_87 = arith.constant dense<0.000000e+00> : vector<2x8xf32>
    %231 = vector.multi_reduction <add>, %230, %cst_87 [2] : vector<2x8x8xf32> to vector<2x8xf32>
    %232 = vector.shape_cast %231 : vector<2x8xf32> to vector<2x8x1xf32>
    %233 = tpu.reciprocal %232 {approx = true} : vector<2x8x1xf32> -> vector<2x8x1xf32>
    %234 = vector.broadcast %233 : vector<2x8x1xf32> to vector<2x8x8xf32>
    %235 = arith.mulf %230, %234 : vector<2x8x8xf32>
    %236 = arith.truncf %235 : vector<2x8x8xf32> to vector<2x8x8xbf16>
    "tpu.trace_start"() <{level = 10 : i32, message = "bts,bsd->btd"}> : () -> ()
    %cst_88 = arith.constant dense<0.000000e+00> : vector<2x8x8xf32>
    %237 = tpu.matmul %236, %222, %cst_88 {dimension_numbers = #tpu.dot_dimension_numbers<[2], [1], [1], [2], [0, 0, 0, 1, 1, 2], [0], [0]>} : vector<2x8x8xbf16>, vector<2x8x8xbf16>, vector<2x8x8xf32> -> vector<2x8x8xf32>
    "tpu.trace_stop"() : () -> ()
    %238 = vector.shape_cast %237 : vector<2x8x8xf32> to vector<16x8xf32>
    %239 = vector.extract_strided_slice %131 {offsets = [3, 0, 0], sizes = [1, 32, 8], strides = [1, 1, 1]} : vector<4x32x8xbf16> to vector<1x32x8xbf16>
    %240 = vector.shape_cast %239 : vector<1x32x8xbf16> to vector<32x8xbf16>
    %241 = arith.truncf %238 : vector<16x8xf32> to vector<16x8xbf16>
    %cst_89 = arith.constant dense<0.000000e+00> : vector<16x32xf32>
    %242 = tpu.matmul %241, %240, %cst_89 {dimension_numbers = #tpu.dot_dimension_numbers<[1], [1], [0], [0], [0, 0, 1, 0], [], []>} : vector<16x8xbf16>, vector<32x8xbf16>, vector<16x32xf32> -> vector<16x32xf32>
    %243 = vector.shape_cast %242 : vector<16x32xf32> to vector<2x8x32xf32>
    %244 = arith.addf %216, %243 : vector<2x8x32xf32>
    %c0_90 = arith.constant 0 : index
    %c0_91 = arith.constant 0 : index
    %c0_92 = arith.constant 0 : index
    %245 = vector.load %arg18[%c0_90, %c0_91, %c0_92] : memref<1x1x32xf32, #tpu.memory_space<vmem>>, vector<1x1x32xf32>
    %246 = vector.shape_cast %245 : vector<1x1x32xf32> to vector<1x32xf32>
    %247 = vector.shape_cast %246 : vector<1x32xf32> to vector<1x1x32xf32>
    %248 = vector.broadcast %247 : vector<1x1x32xf32> to vector<2x8x32xf32>
    %249 = arith.addf %244, %248 : vector<2x8x32xf32>
    %250 = arith.addf %249, %63 : vector<2x8x32xf32>
    %cst_93 = arith.constant dense<0.000000e+00> : vector<2x8xf32>
    %251 = vector.multi_reduction <add>, %250, %cst_93 [2] : vector<2x8x32xf32> to vector<2x8xf32>
    %252 = vector.shape_cast %251 : vector<2x8xf32> to vector<2x8x1xf32>
    %cst_94 = arith.constant 3.200000e+01 : f32
    %253 = vector.broadcast %cst_94 : f32 to vector<2x8x1xf32>
    %254 = arith.divf %252, %253 : vector<2x8x1xf32>
    %255 = vector.broadcast %254 : vector<2x8x1xf32> to vector<2x8x32xf32>
    %256 = arith.subf %250, %255 : vector<2x8x32xf32>
    %257 = arith.mulf %256, %256 : vector<2x8x32xf32>
    %cst_95 = arith.constant dense<0.000000e+00> : vector<2x8xf32>
    %258 = vector.multi_reduction <add>, %257, %cst_95 [2] : vector<2x8x32xf32> to vector<2x8xf32>
    %259 = vector.shape_cast %258 : vector<2x8xf32> to vector<2x8x1xf32>
    %cst_96 = arith.constant 3.200000e+01 : f32
    %260 = vector.broadcast %cst_96 : f32 to vector<2x8x1xf32>
    %261 = arith.divf %259, %260 : vector<2x8x1xf32>
    %262 = vector.broadcast %254 : vector<2x8x1xf32> to vector<2x8x32xf32>
    %263 = arith.subf %250, %262 : vector<2x8x32xf32>
    %cst_97 = arith.constant 9.99999974E-6 : f32
    %264 = vector.broadcast %cst_97 : f32 to vector<2x8x1xf32>
    %265 = arith.addf %261, %264 : vector<2x8x1xf32>
    %266 = math.rsqrt %265 : vector<2x8x1xf32>
    %267 = vector.broadcast %266 : vector<2x8x1xf32> to vector<2x8x32xf32>
    %268 = arith.mulf %263, %267 : vector<2x8x32xf32>
    %c0_98 = arith.constant 0 : index
    %c0_99 = arith.constant 0 : index
    %c0_100 = arith.constant 0 : index
    %269 = vector.load %arg19[%c0_98, %c0_99, %c0_100] : memref<1x1x32xf32, #tpu.memory_space<vmem>>, vector<1x1x32xf32>
    %270 = vector.shape_cast %269 : vector<1x1x32xf32> to vector<1x32xf32>
    %271 = vector.shape_cast %270 : vector<1x32xf32> to vector<1x1x32xf32>
    %272 = vector.broadcast %271 : vector<1x1x32xf32> to vector<2x8x32xf32>
    %273 = arith.mulf %268, %272 : vector<2x8x32xf32>
    %c0_101 = arith.constant 0 : index
    %c0_102 = arith.constant 0 : index
    %c0_103 = arith.constant 0 : index
    %274 = vector.load %arg20[%c0_101, %c0_102, %c0_103] : memref<1x1x32xf32, #tpu.memory_space<vmem>>, vector<1x1x32xf32>
    %275 = vector.shape_cast %274 : vector<1x1x32xf32> to vector<1x32xf32>
    %276 = vector.shape_cast %275 : vector<1x32xf32> to vector<1x1x32xf32>
    %277 = vector.broadcast %276 : vector<1x1x32xf32> to vector<2x8x32xf32>
    %278 = arith.addf %273, %277 : vector<2x8x32xf32>
    %c0_104 = arith.constant 0 : index
    %c0_105 = arith.constant 0 : index
    %c0_106 = arith.constant 0 : index
    %279 = vector.load %arg21[%c0_104, %c0_105, %c0_106] : memref<1x64x32xbf16, #tpu.memory_space<vmem>>, vector<1x64x32xbf16>
    %280 = vector.shape_cast %279 : vector<1x64x32xbf16> to vector<64x32xbf16>
    %281 = vector.shape_cast %278 : vector<2x8x32xf32> to vector<16x32xf32>
    %282 = arith.truncf %281 : vector<16x32xf32> to vector<16x32xbf16>
    %cst_107 = arith.constant dense<0.000000e+00> : vector<16x64xf32>
    %283 = tpu.matmul %282, %280, %cst_107 {dimension_numbers = #tpu.dot_dimension_numbers<[1], [1], [0], [0], [0, 0, 1, 0], [], []>} : vector<16x32xbf16>, vector<64x32xbf16>, vector<16x64xf32> -> vector<16x64xf32>
    %284 = vector.shape_cast %283 : vector<16x64xf32> to vector<2x8x64xf32>
    %c0_108 = arith.constant 0 : index
    %c0_109 = arith.constant 0 : index
    %c0_110 = arith.constant 0 : index
    %285 = vector.load %arg22[%c0_108, %c0_109, %c0_110] : memref<1x1x64xf32, #tpu.memory_space<vmem>>, vector<1x1x64xf32>
    %286 = vector.shape_cast %285 : vector<1x1x64xf32> to vector<1x64xf32>
    %287 = vector.shape_cast %286 : vector<1x64xf32> to vector<1x1x64xf32>
    %288 = vector.broadcast %287 : vector<1x1x64xf32> to vector<2x8x64xf32>
    %289 = arith.addf %284, %288 : vector<2x8x64xf32>
    %290 = vector.extract_strided_slice %289 {offsets = [0, 0, 0], sizes = [2, 8, 32], strides = [1, 1, 1]} : vector<2x8x64xf32> to vector<2x8x32xf32>
    %291 = vector.extract_strided_slice %289 {offsets = [0, 0, 32], sizes = [2, 8, 32], strides = [1, 1, 1]} : vector<2x8x64xf32> to vector<2x8x32xf32>
    %292 = arith.negf %291 : vector<2x8x32xf32>
    %293 = math.exp %292 : vector<2x8x32xf32>
    %cst_111 = arith.constant 1.000000e+00 : f32
    %294 = vector.broadcast %cst_111 : f32 to vector<2x8x32xf32>
    %295 = arith.addf %294, %293 : vector<2x8x32xf32>
    %296 = arith.divf %294, %295 : vector<2x8x32xf32>
    %297 = arith.mulf %290, %296 : vector<2x8x32xf32>
    %c0_112 = arith.constant 0 : index
    %c0_113 = arith.constant 0 : index
    %c0_114 = arith.constant 0 : index
    %298 = vector.load %arg23[%c0_112, %c0_113, %c0_114] : memref<1x7x32xf32, #tpu.memory_space<vmem>>, vector<1x7x32xf32>
    %299 = vector.shape_cast %298 : vector<1x7x32xf32> to vector<7x32xf32>
    %300 = tpu.iota {dimensions = array<i32: 1>} : vector<2x8x32xi32>
    %c0_115 = arith.constant 0 : index
    %c0_116 = arith.constant 0 : index
    %c0_117 = arith.constant 0 : index
    %301 = vector.load %arg24[%c0_115, %c0_116, %c0_117] : memref<1x1x32xf32, #tpu.memory_space<vmem>>, vector<1x1x32xf32>
    %302 = vector.shape_cast %301 : vector<1x1x32xf32> to vector<1x32xf32>
    %303 = vector.shape_cast %302 : vector<1x32xf32> to vector<1x1x32xf32>
    %304 = vector.broadcast %303 : vector<1x1x32xf32> to vector<2x8x32xf32>
    %c3_i32 = arith.constant 3 : i32
    %305 = tpu.dynamic_rotate %297 by %c3_i32 dim 1 : vector<2x8x32xf32>, i32 -> vector<2x8x32xf32>
    %c3_i32_118 = arith.constant 3 : i32
    %306 = vector.broadcast %c3_i32_118 : i32 to vector<2x8x32xi32>
    %307 = arith.cmpi sge, %300, %306 : vector<2x8x32xi32>
    %c8_i32 = arith.constant 8 : i32
    %308 = vector.broadcast %c8_i32 : i32 to vector<2x8x32xi32>
    %309 = arith.cmpi slt, %300, %308 : vector<2x8x32xi32>
    %310 = arith.andi %307, %309 : vector<2x8x32xi1>
    %cst_119 = arith.constant 0.000000e+00 : f32
    %311 = vector.broadcast %cst_119 : f32 to vector<2x8x32xf32>
    %312 = arith.select %310, %305, %311 : vector<2x8x32xi1>, vector<2x8x32xf32>
    %313 = vector.extract_strided_slice %299 {offsets = [0, 0], sizes = [1, 32], strides = [1, 1]} : vector<7x32xf32> to vector<1x32xf32>
    %314 = vector.shape_cast %313 : vector<1x32xf32> to vector<32xf32>
    %315 = vector.shape_cast %314 : vector<32xf32> to vector<1x1x32xf32>
    %316 = vector.broadcast %315 : vector<1x1x32xf32> to vector<2x8x32xf32>
    %317 = arith.mulf %312, %316 : vector<2x8x32xf32>
    %318 = arith.addf %304, %317 : vector<2x8x32xf32>
    %c2_i32 = arith.constant 2 : i32
    %319 = tpu.dynamic_rotate %297 by %c2_i32 dim 1 : vector<2x8x32xf32>, i32 -> vector<2x8x32xf32>
    %c2_i32_120 = arith.constant 2 : i32
    %320 = vector.broadcast %c2_i32_120 : i32 to vector<2x8x32xi32>
    %321 = arith.cmpi sge, %300, %320 : vector<2x8x32xi32>
    %c8_i32_121 = arith.constant 8 : i32
    %322 = vector.broadcast %c8_i32_121 : i32 to vector<2x8x32xi32>
    %323 = arith.cmpi slt, %300, %322 : vector<2x8x32xi32>
    %324 = arith.andi %321, %323 : vector<2x8x32xi1>
    %cst_122 = arith.constant 0.000000e+00 : f32
    %325 = vector.broadcast %cst_122 : f32 to vector<2x8x32xf32>
    %326 = arith.select %324, %319, %325 : vector<2x8x32xi1>, vector<2x8x32xf32>
    %327 = vector.extract_strided_slice %299 {offsets = [1, 0], sizes = [1, 32], strides = [1, 1]} : vector<7x32xf32> to vector<1x32xf32>
    %328 = vector.shape_cast %327 : vector<1x32xf32> to vector<32xf32>
    %329 = vector.shape_cast %328 : vector<32xf32> to vector<1x1x32xf32>
    %330 = vector.broadcast %329 : vector<1x1x32xf32> to vector<2x8x32xf32>
    %331 = arith.mulf %326, %330 : vector<2x8x32xf32>
    %332 = arith.addf %318, %331 : vector<2x8x32xf32>
    %c1_i32 = arith.constant 1 : i32
    %333 = tpu.dynamic_rotate %297 by %c1_i32 dim 1 : vector<2x8x32xf32>, i32 -> vector<2x8x32xf32>
    %c1_i32_123 = arith.constant 1 : i32
    %334 = vector.broadcast %c1_i32_123 : i32 to vector<2x8x32xi32>
    %335 = arith.cmpi sge, %300, %334 : vector<2x8x32xi32>
    %c8_i32_124 = arith.constant 8 : i32
    %336 = vector.broadcast %c8_i32_124 : i32 to vector<2x8x32xi32>
    %337 = arith.cmpi slt, %300, %336 : vector<2x8x32xi32>
    %338 = arith.andi %335, %337 : vector<2x8x32xi1>
    %cst_125 = arith.constant 0.000000e+00 : f32
    %339 = vector.broadcast %cst_125 : f32 to vector<2x8x32xf32>
    %340 = arith.select %338, %333, %339 : vector<2x8x32xi1>, vector<2x8x32xf32>
    %341 = vector.extract_strided_slice %299 {offsets = [2, 0], sizes = [1, 32], strides = [1, 1]} : vector<7x32xf32> to vector<1x32xf32>
    %342 = vector.shape_cast %341 : vector<1x32xf32> to vector<32xf32>
    %343 = vector.shape_cast %342 : vector<32xf32> to vector<1x1x32xf32>
    %344 = vector.broadcast %343 : vector<1x1x32xf32> to vector<2x8x32xf32>
    %345 = arith.mulf %340, %344 : vector<2x8x32xf32>
    %346 = arith.addf %332, %345 : vector<2x8x32xf32>
    %c0_i32_126 = arith.constant 0 : i32
    %347 = vector.broadcast %c0_i32_126 : i32 to vector<2x8x32xi32>
    %348 = arith.cmpi sge, %300, %347 : vector<2x8x32xi32>
    %c8_i32_127 = arith.constant 8 : i32
    %349 = vector.broadcast %c8_i32_127 : i32 to vector<2x8x32xi32>
    %350 = arith.cmpi slt, %300, %349 : vector<2x8x32xi32>
    %351 = arith.andi %348, %350 : vector<2x8x32xi1>
    %cst_128 = arith.constant 0.000000e+00 : f32
    %352 = vector.broadcast %cst_128 : f32 to vector<2x8x32xf32>
    %353 = arith.select %351, %297, %352 : vector<2x8x32xi1>, vector<2x8x32xf32>
    %354 = vector.extract_strided_slice %299 {offsets = [3, 0], sizes = [1, 32], strides = [1, 1]} : vector<7x32xf32> to vector<1x32xf32>
    %355 = vector.shape_cast %354 : vector<1x32xf32> to vector<32xf32>
    %356 = vector.shape_cast %355 : vector<32xf32> to vector<1x1x32xf32>
    %357 = vector.broadcast %356 : vector<1x1x32xf32> to vector<2x8x32xf32>
    %358 = arith.mulf %353, %357 : vector<2x8x32xf32>
    %359 = arith.addf %346, %358 : vector<2x8x32xf32>
    %c7_i32 = arith.constant 7 : i32
    %360 = tpu.dynamic_rotate %297 by %c7_i32 dim 1 : vector<2x8x32xf32>, i32 -> vector<2x8x32xf32>
    %c0_i32_129 = arith.constant 0 : i32
    %361 = vector.broadcast %c0_i32_129 : i32 to vector<2x8x32xi32>
    %362 = arith.cmpi sge, %300, %361 : vector<2x8x32xi32>
    %c7_i32_130 = arith.constant 7 : i32
    %363 = vector.broadcast %c7_i32_130 : i32 to vector<2x8x32xi32>
    %364 = arith.cmpi slt, %300, %363 : vector<2x8x32xi32>
    %365 = arith.andi %362, %364 : vector<2x8x32xi1>
    %cst_131 = arith.constant 0.000000e+00 : f32
    %366 = vector.broadcast %cst_131 : f32 to vector<2x8x32xf32>
    %367 = arith.select %365, %360, %366 : vector<2x8x32xi1>, vector<2x8x32xf32>
    %368 = vector.extract_strided_slice %299 {offsets = [4, 0], sizes = [1, 32], strides = [1, 1]} : vector<7x32xf32> to vector<1x32xf32>
    %369 = vector.shape_cast %368 : vector<1x32xf32> to vector<32xf32>
    %370 = vector.shape_cast %369 : vector<32xf32> to vector<1x1x32xf32>
    %371 = vector.broadcast %370 : vector<1x1x32xf32> to vector<2x8x32xf32>
    %372 = arith.mulf %367, %371 : vector<2x8x32xf32>
    %373 = arith.addf %359, %372 : vector<2x8x32xf32>
    %c6_i32 = arith.constant 6 : i32
    %374 = tpu.dynamic_rotate %297 by %c6_i32 dim 1 : vector<2x8x32xf32>, i32 -> vector<2x8x32xf32>
    %c0_i32_132 = arith.constant 0 : i32
    %375 = vector.broadcast %c0_i32_132 : i32 to vector<2x8x32xi32>
    %376 = arith.cmpi sge, %300, %375 : vector<2x8x32xi32>
    %c6_i32_133 = arith.constant 6 : i32
    %377 = vector.broadcast %c6_i32_133 : i32 to vector<2x8x32xi32>
    %378 = arith.cmpi slt, %300, %377 : vector<2x8x32xi32>
    %379 = arith.andi %376, %378 : vector<2x8x32xi1>
    %cst_134 = arith.constant 0.000000e+00 : f32
    %380 = vector.broadcast %cst_134 : f32 to vector<2x8x32xf32>
    %381 = arith.select %379, %374, %380 : vector<2x8x32xi1>, vector<2x8x32xf32>
    %382 = vector.extract_strided_slice %299 {offsets = [5, 0], sizes = [1, 32], strides = [1, 1]} : vector<7x32xf32> to vector<1x32xf32>
    %383 = vector.shape_cast %382 : vector<1x32xf32> to vector<32xf32>
    %384 = vector.shape_cast %383 : vector<32xf32> to vector<1x1x32xf32>
    %385 = vector.broadcast %384 : vector<1x1x32xf32> to vector<2x8x32xf32>
    %386 = arith.mulf %381, %385 : vector<2x8x32xf32>
    %387 = arith.addf %373, %386 : vector<2x8x32xf32>
    %c5_i32 = arith.constant 5 : i32
    %388 = tpu.dynamic_rotate %297 by %c5_i32 dim 1 : vector<2x8x32xf32>, i32 -> vector<2x8x32xf32>
    %c0_i32_135 = arith.constant 0 : i32
    %389 = vector.broadcast %c0_i32_135 : i32 to vector<2x8x32xi32>
    %390 = arith.cmpi sge, %300, %389 : vector<2x8x32xi32>
    %c5_i32_136 = arith.constant 5 : i32
    %391 = vector.broadcast %c5_i32_136 : i32 to vector<2x8x32xi32>
    %392 = arith.cmpi slt, %300, %391 : vector<2x8x32xi32>
    %393 = arith.andi %390, %392 : vector<2x8x32xi1>
    %cst_137 = arith.constant 0.000000e+00 : f32
    %394 = vector.broadcast %cst_137 : f32 to vector<2x8x32xf32>
    %395 = arith.select %393, %388, %394 : vector<2x8x32xi1>, vector<2x8x32xf32>
    %396 = vector.extract_strided_slice %299 {offsets = [6, 0], sizes = [1, 32], strides = [1, 1]} : vector<7x32xf32> to vector<1x32xf32>
    %397 = vector.shape_cast %396 : vector<1x32xf32> to vector<32xf32>
    %398 = vector.shape_cast %397 : vector<32xf32> to vector<1x1x32xf32>
    %399 = vector.broadcast %398 : vector<1x1x32xf32> to vector<2x8x32xf32>
    %400 = arith.mulf %395, %399 : vector<2x8x32xf32>
    %401 = arith.addf %387, %400 : vector<2x8x32xf32>
    %cst_138 = arith.constant dense<0.000000e+00> : vector<32xf32>
    %402 = vector.multi_reduction <add>, %401, %cst_138 [0, 1] : vector<2x8x32xf32> to vector<32xf32>
    %403 = vector.shape_cast %402 : vector<32xf32> to vector<1x1x32xf32>
    %cst_139 = arith.constant 1.600000e+01 : f32
    %404 = vector.broadcast %cst_139 : f32 to vector<1x1x32xf32>
    %405 = arith.divf %403, %404 : vector<1x1x32xf32>
    %406 = vector.broadcast %405 : vector<1x1x32xf32> to vector<2x8x32xf32>
    %407 = arith.subf %401, %406 : vector<2x8x32xf32>
    %408 = arith.mulf %407, %407 : vector<2x8x32xf32>
    %cst_140 = arith.constant dense<0.000000e+00> : vector<32xf32>
    %409 = vector.multi_reduction <add>, %408, %cst_140 [0, 1] : vector<2x8x32xf32> to vector<32xf32>
    %410 = vector.shape_cast %409 : vector<32xf32> to vector<1x1x32xf32>
    %cst_141 = arith.constant 1.600000e+01 : f32
    %411 = vector.broadcast %cst_141 : f32 to vector<1x1x32xf32>
    %412 = arith.divf %410, %411 : vector<1x1x32xf32>
    %c0_142 = arith.constant 0 : index
    %c0_143 = arith.constant 0 : index
    %c0_144 = arith.constant 0 : index
    %413 = vector.load %arg25[%c0_142, %c0_143, %c0_144] : memref<1x1x32xf32, #tpu.memory_space<vmem>>, vector<1x1x32xf32>
    %414 = vector.shape_cast %413 : vector<1x1x32xf32> to vector<1x32xf32>
    %cst_145 = arith.constant 9.99999974E-6 : f32
    %415 = vector.broadcast %cst_145 : f32 to vector<1x1x32xf32>
    %416 = arith.addf %412, %415 : vector<1x1x32xf32>
    %417 = math.rsqrt %416 : vector<1x1x32xf32>
    %418 = vector.shape_cast %414 : vector<1x32xf32> to vector<1x1x32xf32>
    %419 = arith.mulf %418, %417 : vector<1x1x32xf32>
    %c0_146 = arith.constant 0 : index
    %c0_147 = arith.constant 0 : index
    %c0_148 = arith.constant 0 : index
    %420 = vector.load %arg26[%c0_146, %c0_147, %c0_148] : memref<1x1x32xf32, #tpu.memory_space<vmem>>, vector<1x1x32xf32>
    %421 = vector.shape_cast %420 : vector<1x1x32xf32> to vector<1x32xf32>
    %422 = arith.mulf %405, %419 : vector<1x1x32xf32>
    %423 = vector.shape_cast %421 : vector<1x32xf32> to vector<1x1x32xf32>
    %424 = arith.subf %423, %422 : vector<1x1x32xf32>
    %425 = vector.broadcast %419 : vector<1x1x32xf32> to vector<2x8x32xf32>
    %426 = arith.mulf %401, %425 : vector<2x8x32xf32>
    %427 = vector.broadcast %424 : vector<1x1x32xf32> to vector<2x8x32xf32>
    %428 = arith.addf %426, %427 : vector<2x8x32xf32>
    %429 = arith.negf %428 : vector<2x8x32xf32>
    %430 = math.exp %429 : vector<2x8x32xf32>
    %cst_149 = arith.constant 1.000000e+00 : f32
    %431 = vector.broadcast %cst_149 : f32 to vector<2x8x32xf32>
    %432 = arith.addf %431, %430 : vector<2x8x32xf32>
    %433 = arith.divf %431, %432 : vector<2x8x32xf32>
    %434 = arith.mulf %428, %433 : vector<2x8x32xf32>
    %c0_150 = arith.constant 0 : index
    %c0_151 = arith.constant 0 : index
    %c0_152 = arith.constant 0 : index
    %435 = vector.load %arg27[%c0_150, %c0_151, %c0_152] : memref<1x32x32xbf16, #tpu.memory_space<vmem>>, vector<1x32x32xbf16>
    %436 = vector.shape_cast %435 : vector<1x32x32xbf16> to vector<32x32xbf16>
    %437 = vector.shape_cast %434 : vector<2x8x32xf32> to vector<16x32xf32>
    %438 = arith.truncf %437 : vector<16x32xf32> to vector<16x32xbf16>
    %cst_153 = arith.constant dense<0.000000e+00> : vector<16x32xf32>
    %439 = tpu.matmul %438, %436, %cst_153 {dimension_numbers = #tpu.dot_dimension_numbers<[1], [1], [0], [0], [0, 0, 1, 0], [], []>} : vector<16x32xbf16>, vector<32x32xbf16>, vector<16x32xf32> -> vector<16x32xf32>
    %440 = vector.shape_cast %439 : vector<16x32xf32> to vector<2x8x32xf32>
    %c0_154 = arith.constant 0 : index
    %c0_155 = arith.constant 0 : index
    %c0_156 = arith.constant 0 : index
    %441 = vector.load %arg28[%c0_154, %c0_155, %c0_156] : memref<1x1x32xf32, #tpu.memory_space<vmem>>, vector<1x1x32xf32>
    %442 = vector.shape_cast %441 : vector<1x1x32xf32> to vector<1x32xf32>
    %443 = vector.shape_cast %442 : vector<1x32xf32> to vector<1x1x32xf32>
    %444 = vector.broadcast %443 : vector<1x1x32xf32> to vector<2x8x32xf32>
    %445 = arith.addf %440, %444 : vector<2x8x32xf32>
    %446 = arith.addf %250, %445 : vector<2x8x32xf32>
    %cst_157 = arith.constant dense<0.000000e+00> : vector<2x8xf32>
    %447 = vector.multi_reduction <add>, %446, %cst_157 [2] : vector<2x8x32xf32> to vector<2x8xf32>
    %448 = vector.shape_cast %447 : vector<2x8xf32> to vector<2x8x1xf32>
    %cst_158 = arith.constant 3.200000e+01 : f32
    %449 = vector.broadcast %cst_158 : f32 to vector<2x8x1xf32>
    %450 = arith.divf %448, %449 : vector<2x8x1xf32>
    %451 = vector.broadcast %450 : vector<2x8x1xf32> to vector<2x8x32xf32>
    %452 = arith.subf %446, %451 : vector<2x8x32xf32>
    %453 = arith.mulf %452, %452 : vector<2x8x32xf32>
    %cst_159 = arith.constant dense<0.000000e+00> : vector<2x8xf32>
    %454 = vector.multi_reduction <add>, %453, %cst_159 [2] : vector<2x8x32xf32> to vector<2x8xf32>
    %455 = vector.shape_cast %454 : vector<2x8xf32> to vector<2x8x1xf32>
    %cst_160 = arith.constant 3.200000e+01 : f32
    %456 = vector.broadcast %cst_160 : f32 to vector<2x8x1xf32>
    %457 = arith.divf %455, %456 : vector<2x8x1xf32>
    %458 = vector.broadcast %450 : vector<2x8x1xf32> to vector<2x8x32xf32>
    %459 = arith.subf %446, %458 : vector<2x8x32xf32>
    %cst_161 = arith.constant 9.99999974E-6 : f32
    %460 = vector.broadcast %cst_161 : f32 to vector<2x8x1xf32>
    %461 = arith.addf %457, %460 : vector<2x8x1xf32>
    %462 = math.rsqrt %461 : vector<2x8x1xf32>
    %463 = vector.broadcast %462 : vector<2x8x1xf32> to vector<2x8x32xf32>
    %464 = arith.mulf %459, %463 : vector<2x8x32xf32>
    %c0_162 = arith.constant 0 : index
    %c0_163 = arith.constant 0 : index
    %c0_164 = arith.constant 0 : index
    %465 = vector.load %arg29[%c0_162, %c0_163, %c0_164] : memref<1x1x32xf32, #tpu.memory_space<vmem>>, vector<1x1x32xf32>
    %466 = vector.shape_cast %465 : vector<1x1x32xf32> to vector<1x32xf32>
    %467 = vector.shape_cast %466 : vector<1x32xf32> to vector<1x1x32xf32>
    %468 = vector.broadcast %467 : vector<1x1x32xf32> to vector<2x8x32xf32>
    %469 = arith.mulf %464, %468 : vector<2x8x32xf32>
    %c0_165 = arith.constant 0 : index
    %c0_166 = arith.constant 0 : index
    %c0_167 = arith.constant 0 : index
    %470 = vector.load %arg30[%c0_165, %c0_166, %c0_167] : memref<1x1x32xf32, #tpu.memory_space<vmem>>, vector<1x1x32xf32>
    %471 = vector.shape_cast %470 : vector<1x1x32xf32> to vector<1x32xf32>
    %472 = vector.shape_cast %471 : vector<1x32xf32> to vector<1x1x32xf32>
    %473 = vector.broadcast %472 : vector<1x1x32xf32> to vector<2x8x32xf32>
    %474 = arith.addf %469, %473 : vector<2x8x32xf32>
    %c0_168 = arith.constant 0 : index
    %c0_169 = arith.constant 0 : index
    %c0_170 = arith.constant 0 : index
    %475 = vector.load %arg31[%c0_168, %c0_169, %c0_170] : memref<1x64x32xbf16, #tpu.memory_space<vmem>>, vector<1x64x32xbf16>
    %476 = vector.shape_cast %475 : vector<1x64x32xbf16> to vector<64x32xbf16>
    %477 = vector.shape_cast %474 : vector<2x8x32xf32> to vector<16x32xf32>
    %478 = arith.truncf %477 : vector<16x32xf32> to vector<16x32xbf16>
    %cst_171 = arith.constant dense<0.000000e+00> : vector<16x64xf32>
    %479 = tpu.matmul %478, %476, %cst_171 {dimension_numbers = #tpu.dot_dimension_numbers<[1], [1], [0], [0], [0, 0, 1, 0], [], []>} : vector<16x32xbf16>, vector<64x32xbf16>, vector<16x64xf32> -> vector<16x64xf32>
    %480 = vector.shape_cast %479 : vector<16x64xf32> to vector<2x8x64xf32>
    %c0_172 = arith.constant 0 : index
    %c0_173 = arith.constant 0 : index
    %c0_174 = arith.constant 0 : index
    %481 = vector.load %arg32[%c0_172, %c0_173, %c0_174] : memref<1x1x64xf32, #tpu.memory_space<vmem>>, vector<1x1x64xf32>
    %482 = vector.shape_cast %481 : vector<1x1x64xf32> to vector<1x64xf32>
    %483 = vector.shape_cast %482 : vector<1x64xf32> to vector<1x1x64xf32>
    %484 = vector.broadcast %483 : vector<1x1x64xf32> to vector<2x8x64xf32>
    %485 = arith.addf %480, %484 : vector<2x8x64xf32>
    %486 = arith.negf %485 : vector<2x8x64xf32>
    %487 = math.exp %486 : vector<2x8x64xf32>
    %cst_175 = arith.constant 1.000000e+00 : f32
    %488 = vector.broadcast %cst_175 : f32 to vector<2x8x64xf32>
    %489 = arith.addf %488, %487 : vector<2x8x64xf32>
    %490 = arith.divf %488, %489 : vector<2x8x64xf32>
    %491 = arith.mulf %485, %490 : vector<2x8x64xf32>
    %c0_176 = arith.constant 0 : index
    %c0_177 = arith.constant 0 : index
    %c0_178 = arith.constant 0 : index
    %492 = vector.load %arg33[%c0_176, %c0_177, %c0_178] : memref<1x32x64xbf16, #tpu.memory_space<vmem>>, vector<1x32x64xbf16>
    %493 = vector.shape_cast %492 : vector<1x32x64xbf16> to vector<32x64xbf16>
    %494 = vector.shape_cast %491 : vector<2x8x64xf32> to vector<16x64xf32>
    %495 = arith.truncf %494 : vector<16x64xf32> to vector<16x64xbf16>
    %cst_179 = arith.constant dense<0.000000e+00> : vector<16x32xf32>
    %496 = tpu.matmul %495, %493, %cst_179 {dimension_numbers = #tpu.dot_dimension_numbers<[1], [1], [0], [0], [0, 0, 1, 0], [], []>} : vector<16x64xbf16>, vector<32x64xbf16>, vector<16x32xf32> -> vector<16x32xf32>
    %497 = vector.shape_cast %496 : vector<16x32xf32> to vector<2x8x32xf32>
    %c0_180 = arith.constant 0 : index
    %c0_181 = arith.constant 0 : index
    %c0_182 = arith.constant 0 : index
    %498 = vector.load %arg34[%c0_180, %c0_181, %c0_182] : memref<1x1x32xf32, #tpu.memory_space<vmem>>, vector<1x1x32xf32>
    %499 = vector.shape_cast %498 : vector<1x1x32xf32> to vector<1x32xf32>
    %500 = vector.shape_cast %499 : vector<1x32xf32> to vector<1x1x32xf32>
    %501 = vector.broadcast %500 : vector<1x1x32xf32> to vector<2x8x32xf32>
    %502 = arith.addf %497, %501 : vector<2x8x32xf32>
    %cst_183 = arith.constant 5.000000e-01 : f32
    %503 = vector.broadcast %cst_183 : f32 to vector<2x8x32xf32>
    %504 = arith.mulf %503, %502 : vector<2x8x32xf32>
    %505 = arith.addf %504, %446 : vector<2x8x32xf32>
    %cst_184 = arith.constant dense<0.000000e+00> : vector<2x8xf32>
    %506 = vector.multi_reduction <add>, %505, %cst_184 [2] : vector<2x8x32xf32> to vector<2x8xf32>
    %507 = vector.shape_cast %506 : vector<2x8xf32> to vector<2x8x1xf32>
    %cst_185 = arith.constant 3.200000e+01 : f32
    %508 = vector.broadcast %cst_185 : f32 to vector<2x8x1xf32>
    %509 = arith.divf %507, %508 : vector<2x8x1xf32>
    %510 = vector.broadcast %509 : vector<2x8x1xf32> to vector<2x8x32xf32>
    %511 = arith.subf %505, %510 : vector<2x8x32xf32>
    %512 = arith.mulf %511, %511 : vector<2x8x32xf32>
    %cst_186 = arith.constant dense<0.000000e+00> : vector<2x8xf32>
    %513 = vector.multi_reduction <add>, %512, %cst_186 [2] : vector<2x8x32xf32> to vector<2x8xf32>
    %514 = vector.shape_cast %513 : vector<2x8xf32> to vector<2x8x1xf32>
    %cst_187 = arith.constant 3.200000e+01 : f32
    %515 = vector.broadcast %cst_187 : f32 to vector<2x8x1xf32>
    %516 = arith.divf %514, %515 : vector<2x8x1xf32>
    %517 = vector.broadcast %509 : vector<2x8x1xf32> to vector<2x8x32xf32>
    %518 = arith.subf %505, %517 : vector<2x8x32xf32>
    %cst_188 = arith.constant 9.99999974E-6 : f32
    %519 = vector.broadcast %cst_188 : f32 to vector<2x8x1xf32>
    %520 = arith.addf %516, %519 : vector<2x8x1xf32>
    %521 = math.rsqrt %520 : vector<2x8x1xf32>
    %522 = vector.broadcast %521 : vector<2x8x1xf32> to vector<2x8x32xf32>
    %523 = arith.mulf %518, %522 : vector<2x8x32xf32>
    %c0_189 = arith.constant 0 : index
    %c0_190 = arith.constant 0 : index
    %c0_191 = arith.constant 0 : index
    %524 = vector.load %arg35[%c0_189, %c0_190, %c0_191] : memref<1x1x32xf32, #tpu.memory_space<vmem>>, vector<1x1x32xf32>
    %525 = vector.shape_cast %524 : vector<1x1x32xf32> to vector<1x32xf32>
    %526 = vector.shape_cast %525 : vector<1x32xf32> to vector<1x1x32xf32>
    %527 = vector.broadcast %526 : vector<1x1x32xf32> to vector<2x8x32xf32>
    %528 = arith.mulf %523, %527 : vector<2x8x32xf32>
    %c0_192 = arith.constant 0 : index
    %c0_193 = arith.constant 0 : index
    %c0_194 = arith.constant 0 : index
    %529 = vector.load %arg36[%c0_192, %c0_193, %c0_194] : memref<1x1x32xf32, #tpu.memory_space<vmem>>, vector<1x1x32xf32>
    %530 = vector.shape_cast %529 : vector<1x1x32xf32> to vector<1x32xf32>
    %531 = vector.shape_cast %530 : vector<1x32xf32> to vector<1x1x32xf32>
    %532 = vector.broadcast %531 : vector<1x1x32xf32> to vector<2x8x32xf32>
    %533 = arith.addf %528, %532 : vector<2x8x32xf32>
    %c0_195 = arith.constant 0 : index
    %c0_196 = arith.constant 0 : index
    %c0_197 = arith.constant 0 : index
    %534 = vector.load %arg38[%c0_195, %c0_196, %c0_197] : memref<2x8x32xf32, #tpu.memory_space<vmem>>, vector<2x8x32xf32>
    tpu.vector_store %arg38[%c0_195, %c0_196, %c0_197], %533 {strides = array<i32>} : memref<2x8x32xf32, #tpu.memory_space<vmem>>, vector<2x8x32xf32>,
    %c1_i32_198 = arith.constant 1 : i32
    %535 = arith.cmpi eq, %arg0, %c1_i32_198 : i32
    %536 = arith.extui %535 : i1 to i32
    %c0_i32_199 = arith.constant 0 : i32
    %537 = arith.cmpi ne, %536, %c0_i32_199 : i32
    scf.if %537 {
      %c0_200 = arith.constant 0 : index
      %c0_201 = arith.constant 0 : index
      %c0_202 = arith.constant 0 : index
      %538 = vector.load %arg37[%c0_200, %c0_201, %c0_202] : memref<2x8x32xf32, #tpu.memory_space<vmem>>, vector<2x8x32xf32>
      tpu.vector_store %arg37[%c0_200, %c0_201, %c0_202], %533 {strides = array<i32>} : memref<2x8x32xf32, #tpu.memory_space<vmem>>, vector<2x8x32xf32>,
    } else {
    }
    return
  }
  func.func @transform_0(%arg0: i32) -> (i32, i32, i32) {
    %c0_i32 = arith.constant 0 : i32
    %c0_i32_0 = arith.constant 0 : i32
    %c0_i32_1 = arith.constant 0 : i32
    %c0_i32_2 = arith.constant 0 : i32
    return %c0_i32, %c0_i32_0, %c0_i32_1 : i32, i32, i32
  }
  func.func @transform_1(%arg0: i32) -> (i32, i32) {
    %c0_i32 = arith.constant 0 : i32
    %c0_i32_0 = arith.constant 0 : i32
    %c0_i32_1 = arith.constant 0 : i32
    return %c0_i32, %c0_i32_0 : i32, i32
  }
  func.func @transform_2(%arg0: i32) -> (i32, i32, i32) {
    %c0_i32 = arith.constant 0 : i32
    %c0_i32_0 = arith.constant 0 : i32
    %c0_i32_1 = arith.constant 0 : i32
    return %arg0, %c0_i32, %c0_i32_0 : i32, i32, i32
  }
  func.func @transform_3(%arg0: i32) -> (i32, i32, i32) {
    %c0_i32 = arith.constant 0 : i32
    %c0_i32_0 = arith.constant 0 : i32
    %c0_i32_1 = arith.constant 0 : i32
    return %arg0, %c0_i32, %c0_i32_0 : i32, i32, i32
  }
  func.func @transform_4(%arg0: i32) -> (i32, i32, i32) {
    %c0_i32 = arith.constant 0 : i32
    %c0_i32_0 = arith.constant 0 : i32
    %c0_i32_1 = arith.constant 0 : i32
    return %arg0, %c0_i32, %c0_i32_0 : i32, i32, i32
  }
  func.func @transform_5(%arg0: i32) -> (i32, i32, i32) {
    %c0_i32 = arith.constant 0 : i32
    %c0_i32_0 = arith.constant 0 : i32
    %c0_i32_1 = arith.constant 0 : i32
    return %arg0, %c0_i32, %c0_i32_0 : i32, i32, i32
  }
  func.func @transform_6(%arg0: i32) -> (i32, i32, i32) {
    %c0_i32 = arith.constant 0 : i32
    %c0_i32_0 = arith.constant 0 : i32
    %c0_i32_1 = arith.constant 0 : i32
    return %arg0, %c0_i32, %c0_i32_0 : i32, i32, i32
  }
  func.func @transform_7(%arg0: i32) -> (i32, i32, i32) {
    %c0_i32 = arith.constant 0 : i32
    %c0_i32_0 = arith.constant 0 : i32
    %c0_i32_1 = arith.constant 0 : i32
    return %arg0, %c0_i32, %c0_i32_0 : i32, i32, i32
  }
  func.func @transform_8(%arg0: i32) -> (i32, i32, i32) {
    %c0_i32 = arith.constant 0 : i32
    %c0_i32_0 = arith.constant 0 : i32
    %c0_i32_1 = arith.constant 0 : i32
    return %arg0, %c0_i32, %c0_i32_0 : i32, i32, i32
  }
  func.func @transform_9(%arg0: i32) -> (i32, i32, i32) {
    %c0_i32 = arith.constant 0 : i32
    %c0_i32_0 = arith.constant 0 : i32
    %c0_i32_1 = arith.constant 0 : i32
    return %arg0, %c0_i32, %c0_i32_0 : i32, i32, i32
  }
  func.func @transform_10(%arg0: i32) -> (i32, i32, i32) {
    %c0_i32 = arith.constant 0 : i32
    %c0_i32_0 = arith.constant 0 : i32
    %c0_i32_1 = arith.constant 0 : i32
    return %arg0, %c0_i32, %c0_i32_0 : i32, i32, i32
  }
  func.func @transform_11(%arg0: i32) -> (i32, i32, i32) {
    %c0_i32 = arith.constant 0 : i32
    %c0_i32_0 = arith.constant 0 : i32
    %c0_i32_1 = arith.constant 0 : i32
    return %arg0, %c0_i32, %c0_i32_0 : i32, i32, i32
  }
  func.func @transform_12(%arg0: i32) -> (i32, i32, i32) {
    %c0_i32 = arith.constant 0 : i32
    %c0_i32_0 = arith.constant 0 : i32
    %c0_i32_1 = arith.constant 0 : i32
    return %arg0, %c0_i32, %c0_i32_0 : i32, i32, i32
  }
  func.func @transform_13(%arg0: i32) -> (i32, i32, i32) {
    %c0_i32 = arith.constant 0 : i32
    %c0_i32_0 = arith.constant 0 : i32
    %c0_i32_1 = arith.constant 0 : i32
    return %arg0, %c0_i32, %c0_i32_0 : i32, i32, i32
  }
  func.func @transform_14(%arg0: i32) -> (i32, i32, i32) {
    %c0_i32 = arith.constant 0 : i32
    %c0_i32_0 = arith.constant 0 : i32
    %c0_i32_1 = arith.constant 0 : i32
    return %arg0, %c0_i32, %c0_i32_0 : i32, i32, i32
  }
  func.func @transform_15(%arg0: i32) -> (i32, i32, i32) {
    %c0_i32 = arith.constant 0 : i32
    %c0_i32_0 = arith.constant 0 : i32
    %c0_i32_1 = arith.constant 0 : i32
    return %arg0, %c0_i32, %c0_i32_0 : i32, i32, i32
  }
  func.func @transform_16(%arg0: i32) -> (i32, i32, i32, i32) {
    %c0_i32 = arith.constant 0 : i32
    %c0_i32_0 = arith.constant 0 : i32
    %c0_i32_1 = arith.constant 0 : i32
    %c0_i32_2 = arith.constant 0 : i32
    return %arg0, %c0_i32, %c0_i32_0, %c0_i32_1 : i32, i32, i32, i32
  }
  func.func @transform_17(%arg0: i32) -> (i32, i32, i32) {
    %c0_i32 = arith.constant 0 : i32
    %c0_i32_0 = arith.constant 0 : i32
    %c0_i32_1 = arith.constant 0 : i32
    return %arg0, %c0_i32, %c0_i32_0 : i32, i32, i32
  }
  func.func @transform_18(%arg0: i32) -> (i32, i32, i32) {
    %c0_i32 = arith.constant 0 : i32
    %c0_i32_0 = arith.constant 0 : i32
    %c0_i32_1 = arith.constant 0 : i32
    return %arg0, %c0_i32, %c0_i32_0 : i32, i32, i32
  }
  func.func @transform_19(%arg0: i32) -> (i32, i32, i32) {
    %c0_i32 = arith.constant 0 : i32
    %c0_i32_0 = arith.constant 0 : i32
    %c0_i32_1 = arith.constant 0 : i32
    return %arg0, %c0_i32, %c0_i32_0 : i32, i32, i32
  }
  func.func @transform_20(%arg0: i32) -> (i32, i32, i32) {
    %c0_i32 = arith.constant 0 : i32
    %c0_i32_0 = arith.constant 0 : i32
    %c0_i32_1 = arith.constant 0 : i32
    return %arg0, %c0_i32, %c0_i32_0 : i32, i32, i32
  }
  func.func @transform_21(%arg0: i32) -> (i32, i32, i32) {
    %c0_i32 = arith.constant 0 : i32
    %c0_i32_0 = arith.constant 0 : i32
    %c0_i32_1 = arith.constant 0 : i32
    return %arg0, %c0_i32, %c0_i32_0 : i32, i32, i32
  }
  func.func @transform_22(%arg0: i32) -> (i32, i32, i32) {
    %c0_i32 = arith.constant 0 : i32
    %c0_i32_0 = arith.constant 0 : i32
    %c0_i32_1 = arith.constant 0 : i32
    return %arg0, %c0_i32, %c0_i32_0 : i32, i32, i32
  }
  func.func @transform_23(%arg0: i32) -> (i32, i32, i32) {
    %c0_i32 = arith.constant 0 : i32
    %c0_i32_0 = arith.constant 0 : i32
    %c0_i32_1 = arith.constant 0 : i32
    return %arg0, %c0_i32, %c0_i32_0 : i32, i32, i32
  }
  func.func @transform_24(%arg0: i32) -> (i32, i32, i32) {
    %c0_i32 = arith.constant 0 : i32
    %c0_i32_0 = arith.constant 0 : i32
    %c0_i32_1 = arith.constant 0 : i32
    return %arg0, %c0_i32, %c0_i32_0 : i32, i32, i32
  }
  func.func @transform_25(%arg0: i32) -> (i32, i32, i32) {
    %c0_i32 = arith.constant 0 : i32
    %c0_i32_0 = arith.constant 0 : i32
    %c0_i32_1 = arith.constant 0 : i32
    return %arg0, %c0_i32, %c0_i32_0 : i32, i32, i32
  }
  func.func @transform_26(%arg0: i32) -> (i32, i32, i32) {
    %c0_i32 = arith.constant 0 : i32
    %c0_i32_0 = arith.constant 0 : i32
    %c0_i32_1 = arith.constant 0 : i32
    return %arg0, %c0_i32, %c0_i32_0 : i32, i32, i32
  }
  func.func @transform_27(%arg0: i32) -> (i32, i32, i32) {
    %c0_i32 = arith.constant 0 : i32
    %c0_i32_0 = arith.constant 0 : i32
    %c0_i32_1 = arith.constant 0 : i32
    return %arg0, %c0_i32, %c0_i32_0 : i32, i32, i32
  }
  func.func @transform_28(%arg0: i32) -> (i32, i32, i32) {
    %c0_i32 = arith.constant 0 : i32
    %c0_i32_0 = arith.constant 0 : i32
    %c0_i32_1 = arith.constant 0 : i32
    return %arg0, %c0_i32, %c0_i32_0 : i32, i32, i32
  }
  func.func @transform_29(%arg0: i32) -> (i32, i32, i32) {
    %c0_i32 = arith.constant 0 : i32
    %c0_i32_0 = arith.constant 0 : i32
    %c0_i32_1 = arith.constant 0 : i32
    return %arg0, %c0_i32, %c0_i32_0 : i32, i32, i32
  }
  func.func @transform_30(%arg0: i32) -> (i32, i32, i32) {
    %c0_i32 = arith.constant 0 : i32
    %c0_i32_0 = arith.constant 0 : i32
    %c0_i32_1 = arith.constant 0 : i32
    return %arg0, %c0_i32, %c0_i32_0 : i32, i32, i32
  }
  func.func @transform_31(%arg0: i32) -> (i32, i32, i32) {
    %c0_i32 = arith.constant 0 : i32
    %c0_i32_0 = arith.constant 0 : i32
    %c0_i32_1 = arith.constant 0 : i32
    return %arg0, %c0_i32, %c0_i32_0 : i32, i32, i32
  }
  func.func @transform_32(%arg0: i32) -> (i32, i32, i32) {
    %c0_i32 = arith.constant 0 : i32
    %c0_i32_0 = arith.constant 0 : i32
    %c0_i32_1 = arith.constant 0 : i32
    return %arg0, %c0_i32, %c0_i32_0 : i32, i32, i32
  }
  func.func @transform_33(%arg0: i32) -> (i32, i32, i32) {
    %c0_i32 = arith.constant 0 : i32
    %c0_i32_0 = arith.constant 0 : i32
    %c0_i32_1 = arith.constant 0 : i32
    return %arg0, %c0_i32, %c0_i32_0 : i32, i32, i32
  }
  func.func @transform_34(%arg0: i32) -> (i32, i32, i32) {
    %c0_i32 = arith.constant 0 : i32
    %c0_i32_0 = arith.constant 0 : i32
    %c0_i32_1 = arith.constant 0 : i32
    return %arg0, %c0_i32, %c0_i32_0 : i32, i32, i32
  }
  func.func @transform_35(%arg0: i32) -> (i32, i32, i32) {
    %c0_i32 = arith.constant 0 : i32
    %c0_i32_0 = arith.constant 0 : i32
    %c0_i32_1 = arith.constant 0 : i32
    return %arg0, %c0_i32, %c0_i32_0 : i32, i32, i32
  }
  func.func @transform_36(%arg0: i32) -> (i32, i32, i32) {
    %c0_i32 = arith.constant 0 : i32
    %c0_i32_0 = arith.constant 0 : i32
    %c0_i32_1 = arith.constant 0 : i32
    %c0_i32_2 = arith.constant 0 : i32
    return %c0_i32, %c0_i32_0, %c0_i32_1 : i32, i32, i32
  }
}

</mosaic_0001>

<bundles_post_ra>
// kernel: tpu_custom_call.1
= control target key start
LH: loop header
LB: loop body
LE: loop exit
PB: predicated region body
PF: predicated region fallthrough
CT: control target
= control target key end

     0   :  { %s4192_s6 = smov 1   ;;  %s4193_s10 = smov 2   ;;  %s4961_s0 = inlined_call_operand.smem [shape: u32[37], index: -1, kind: input, shape index: {}] }
   0x1   :  { %s4245_s5 = sld [smem:[%s4961_s0]]   ;;  %s4194_s14 = smov 3  }
   0x2   :  { %s4250_s9 = sld [smem:[%s4961_s0 + %s4192_s6]]   ;;  %s4195_s18 = smov 4  }
   0x3   :  { %s4255_s13 = sld [smem:[%s4961_s0 + %s4193_s10]]   ;;  %s4196_s22 = smov 5  }
   0x4   :  { %s4260_s17 = sld [smem:[%s4961_s0 + %s4194_s14]]   ;;  %s4197_s26 = smov 6  }
   0x5   :  { %s4265_s21 = sld [smem:[%s4961_s0 + %s4195_s18]]   ;;  %s4198_s30 = smov 7  }
   0x6   :  { %s4270_s25 = sld [smem:[%s4961_s0 + %s4196_s22]]   ;;  %s4199_s4 = smov 8  }
   0x7   :  { %4974 = sst [smem:[#allocation6_spill]] %s4245_s5  ;;  %s4200_s10 = smov 9  }
   0x8   :  { %4975 = sst [smem:[#allocation7_spill]] %s4250_s9  ;;  %s4201_s15 = smov 10  }
   0x9   :  { %4976 = sst [smem:[#allocation8_spill]] %s4255_s13  ;;  %s4202_s20 = smov 11  }
   0xa   :  { %4977 = sst [smem:[#allocation9_spill]] %s4260_s17  ;;  %s4204_s1 = smov 13  }
   0xb   :  { %4978 = sst [smem:[#allocation10_spill]] %s4265_s21  ;;  %s4205_s7 = smov 14  }
   0xc   :  { %4979 = sst [smem:[#allocation11_spill]] %s4270_s25  ;;  %s4207_s22 = smov 16  }
   0xd   :  { %s4275_s29 = sld [smem:[%s4961_s0 + %s4197_s26]]   ;;  %s4203_s26 = smov 12  }
   0xe   :  { %s4280_s3 = sld [smem:[%s4961_s0 + %s4198_s30]]   ;;  %s4208_s28 = smov 17  }
   0xf   :  { %s4285_s8 = sld [smem:[%s4961_s0 + %s4199_s4]]  }
  0x10   :  { %s4290_s14 = sld [smem:[%s4961_s0 + %s4200_s10]]  }
  0x11   :  { %s4295_s19 = sld [smem:[%s4961_s0 + %s4201_s15]]   ;;  %s4206_s15 = smov 15  }
  0x12   :  { %s4300_s24 = sld [smem:[%s4961_s0 + %s4202_s20]]  }
  0x13   :  { %4980 = sst [smem:[#allocation12_spill]] %s4275_s29 }
  0x14   :  { %4981 = sst [smem:[#allocation13_spill]] %s4280_s3 }
  0x15   :  { %4982 = sst [smem:[#allocation14_spill]] %s4285_s8 }
  0x16   :  { %4983 = sst [smem:[#allocation15_spill]] %s4290_s14 }
  0x17   :  { %4984 = sst [smem:[#allocation16_spill]] %s4295_s19 }
  0x18   :  { %4985 = sst [smem:[#allocation17_spill]] %s4300_s24 }
  0x19   :  { %s4305_s30 = sld [smem:[%s4961_s0 + %s4203_s26]]  }
  0x1a   :  { %s4310_s6 = sld [smem:[%s4961_s0 + %s4204_s1]]  }
  0x1b   :  { %s4315_s12 = sld [smem:[%s4961_s0 + %s4205_s7]]   ;;  %s4209_s7 = smov 18  }
  0x1c   :  { %s4320_s20 = sld [smem:[%s4961_s0 + %s4206_s15]]   ;;  %s4210_s15 = smov 19  }
  0x1d   :  { %s4325_s27 = sld [smem:[%s4961_s0 + %s4207_s22]]   ;;  %s4211_s22 = smov 20  }
  0x1e   :  { %s4330_s4 = sld [smem:[%s4961_s0 + %s4208_s28]]   ;;  %s4212_s28 = smov 21  }
  0x1f   :  { %4986 = sst [smem:[#allocation18_spill]] %s4305_s30 }
  0x20   :  { %4987 = sst [smem:[#allocation19_spill]] %s4310_s6 }
  0x21   :  { %4988 = sst [smem:[#allocation20_spill]] %s4315_s12 }
  0x22   :  { %4989 = sst [smem:[#allocation21_spill]] %s4320_s20 }
  0x23   :  { %4990 = sst [smem:[#allocation22_spill]] %s4325_s27 }
  0x24   :  { %4991 = sst [smem:[#allocation23_spill]] %s4330_s4 }
  0x25   :  { %s4335_s9 = sld [smem:[%s4961_s0 + %s4209_s7]]   ;;  %s4213_s7 = smov 22  }
  0x26   :  { %s4340_s5 = sld [smem:[%s4961_s0 + %s4210_s15]]   ;;  %s4214_s15 = smov 23  }
  0x27   :  { %s4345_s27 = sld [smem:[%s4961_s0 + %s4211_s22]]   ;;  %s4215_s22 = smov 24  }
  0x28   :  { %s4350_s4 = sld [smem:[%s4961_s0 + %s4212_s28]]   ;;  %s4216_s28 = smov 25  }
  0x2b   :  { %4992 = sst [smem:[#allocation24_spill]] %s4335_s9 }
  0x2c   :  { %4993 = sst [smem:[#allocation25_spill]] %s4340_s5 }
  0x2d   :  { %4994 = sst [smem:[#allocation26_spill]] %s4345_s27 }
  0x2e   :  { %4995 = sst [smem:[#allocation27_spill]] %s4350_s4 }
  0x2f   :  { %s4355_s9 = sld [smem:[%s4961_s0 + %s4213_s7]]   ;;  %s4217_s7 = smov 26  }
  0x30   :  { %s4360_s5 = sld [smem:[%s4961_s0 + %s4214_s15]]   ;;  %s4218_s15 = smov 27  }
  0x31   :  { %s4365_s27 = sld [smem:[%s4961_s0 + %s4215_s22]]   ;;  %s4219_s22 = smov 28  }
  0x32   :  { %s4370_s4 = sld [smem:[%s4961_s0 + %s4216_s28]]   ;;  %s4220_s28 = smov 29  }
  0x35   :  { %4996 = sst [smem:[#allocation28_spill]] %s4355_s9 }
  0x36   :  { %4997 = sst [smem:[#allocation29_spill]] %s4360_s5 }
  0x37   :  { %4998 = sst [smem:[#allocation30_spill]] %s4365_s27 }
  0x38   :  { %4999 = sst [smem:[#allocation31_spill]] %s4370_s4 }
  0x39   :  { %s4375_s9 = sld [smem:[%s4961_s0 + %s4217_s7]]   ;;  %s4221_s7 = smov 30  }
  0x3a   :  { %s4380_s5 = sld [smem:[%s4961_s0 + %s4218_s15]]   ;;  %s4222_s15 = smov 31  }
  0x3b   :  { %s4385_s27 = sld [smem:[%s4961_s0 + %s4219_s22]]   ;;  %s4223_s22 = smov 32  }
  0x3c   :  { %s4390_s4 = sld [smem:[%s4961_s0 + %s4220_s28]]   ;;  %s4224_s28 = smov 33  }
  0x3f   :  { %5000 = sst [smem:[#allocation32_spill]] %s4375_s9 }
  0x40   :  { %5001 = sst [smem:[#allocation33_spill]] %s4380_s5 }
  0x41   :  { %5002 = sst [smem:[#allocation34_spill]] %s4385_s27 }
  0x42   :  { %5003 = sst [smem:[#allocation35_spill]] %s4390_s4 }
  0x43   :  { %s4395_s9 = sld [smem:[%s4961_s0 + %s4221_s7]]   ;;  %s4225_s7 = smov 34  }
  0x44   :  { %s4400_s5 = sld [smem:[%s4961_s0 + %s4222_s15]]   ;;  %s4226_s15 = smov 35  }
  0x45   :  { %s4405_s27 = sld [smem:[%s4961_s0 + %s4223_s22]]   ;;  %s4227_s22 = smov 36  }
  0x46   :  { %s4410_s4 = sld [smem:[%s4961_s0 + %s4224_s28]]  }
  0x49   :  { %5004 = sst [smem:[#allocation36_spill]] %s4395_s9 }
  0x4a   :  { %5005 = sst [smem:[#allocation37_spill]] %s4400_s5 }
  0x4b   :  { %5006 = sst [smem:[#allocation38_spill]] %s4405_s27 }
  0x4c   :  { %s4415_s9 = sld [smem:[%s4961_s0 + %s4225_s7]]  }
  0x4d   :  { %s4420_s5 = sld [smem:[%s4961_s0 + %s4226_s15]]  }
  0x4e   :  { %s4425_s27 = sld [smem:[%s4961_s0 + %s4227_s22]]  }
  0x52   :  { %5007 = sst [smem:[#allocation39_spill]] %s4415_s9 }
  0x53   :  { %5008 = sst [smem:[#allocation40_spill]] %s4420_s5 }
  0x54   :  { %5009 = sst [smem:[#allocation41_spill]] %s4425_s27 }
  0x55   :  { %78 = vsyncpa [#allocation4], 0  ;;  %s4427_s28 = smov 0  }
  0x56 LB: > { %5010 = sst [smem:[#allocation42_spill]] %s4190_s28  ;;  %s4433_s1 = sadd.s32 4294967295, %s4190_s28   ;;  %s4190_s28 = sphi %s4427_s28, %s84_s28  }
  0x57   : > { %5011 = sst [smem:[#allocation43_spill]] %s4433_s1  ;;  %p3747_p0 = scmp.ge.s32.totalorder %s4190_s28, 1 }
  0x58   : > { %p1278_p1 = scmp.lt.s32.totalorder %s4190_s28, 3 }
  0x5a   : > { %p1279_p2 = pnand %p3747_p0, %p1278_p1 }
  0x5c   : > { %1282 = sbr.rel (%p1279_p2) target bundleno = 4525 (0x11ad), region = 164 }
  0x61   : > { %s5015_s21 = sld [smem:[#allocation10_spill]]  ;;  %p1481_p3 = scmp.lt.s32.totalorder %s4433_s1, 1 }
  0x62   : > { %s5016_s29 = sld [smem:[#allocation12_spill]] }
  0x63   : > { %s5020_s19 = sld [smem:[#allocation16_spill]] }
  0x64   : > { %s5022_s30 = sld [smem:[#allocation18_spill]] }
  0x65   : > { %s5024_s12 = sld [smem:[#allocation20_spill]] }
  0x66   : > { %s4439_s0 = scalar_select %p1481_p3, %s4433_s1, 1 }
  0x67   : > { %s5027_s15 = sld [smem:[#allocation22_spill]] }
  0x68   : > { %s4446_s11 = sshll.u32 %s4439_s0, 5  ;;  %s4455_s26 = sshll.u32 %s4439_s0, 4 }
  0x69   : > { %s4452_s22 = scalar_lea.vmem %s5015_s21, %s4446_s11  ;;  %s4459_s7 = scalar_lea.vmem %s5016_s29, %s4455_s26 }
  0x6a   : > { %5029 = sst [smem:[#allocation44_spill]] %s4452_s22  ;;  %s4469_s13 = scalar_lea.vmem %s5020_s19, %s4455_s26 }
  0x6b   : > { %5031 = sst [smem:[#allocation45_spill]] %s4459_s7  ;;  %s4475_s9 = scalar_lea.vmem %s5022_s30, %s4455_s26 }
  0x6c   : > { %s5032_s2 = sld [smem:[#allocation26_spill]]  ;;  %s4481_s7 = scalar_lea.vmem %s5024_s12, %s4455_s26 }
  0x6d   : > { %s5034_s25 = sld [smem:[#allocation28_spill]]  ;;  %s3945_s14 = sshll.u32 %s4439_s0, 6 }
  0x6e   : > { %s5035_s17 = sld [smem:[#allocation29_spill]]  ;;  %s4489_s24 = scalar_lea.vmem %s5027_s15, %s3945_s14 }
  0x6f   : > { %5036 = sst [smem:[#allocation46_spill]] %s4469_s13  ;;  %s3762_s13 = sshll.u32 %s4439_s0, 3 }
  0x70   : > { %s5037_s22 = sld [smem:[#allocation30_spill]]  ;;  %s1597_s20 = scalar_lea.vmem %s4410_s4, %s4439_s0 }
  0x71   : > { %s5038_s5 = sld [smem:[#allocation31_spill]] }
  0x72   : > { %5039 = sst [smem:[#allocation47_spill]] %s4475_s9  ;;  %s4497_s12 = scalar_lea.vmem %s5032_s2, %s4446_s11 }
  0x73   : > { %s5040_s29 = sld [smem:[#allocation32_spill]]  ;;  %s4503_s1 = scalar_lea.vmem %s5034_s25, %s3762_s13 }
  0x74   : > { %s5041_s3 = sld [smem:[#allocation33_spill]]  ;;  %s1561_s10 = scalar_lea.vmem %s5035_s17, %s4439_s0 }
  0x75   : > { %5042 = sst [smem:[#allocation48_spill]] %s4481_s7 }
  0x76   : > { %s5043_s21 = sld [smem:[#allocation34_spill]]  ;;  %s1564_s14 = scalar_lea.vmem %s5037_s22, %s4439_s0 }
  0x77   : > { %s5044_s19 = sld [smem:[#allocation35_spill]]  ;;  %s1567_s15 = scalar_lea.vmem %s5038_s5, %s4439_s0 }
  0x78   : > { %s5045_s8 = sld [smem:[#allocation36_spill]] }
  0x79   : > { %5046 = sst [smem:[#allocation49_spill]] %s4489_s24  ;;  %s4513_s24 = scalar_lea.vmem %s5040_s29, %s4455_s26 }
  0x7a   : > { %s5047_s30 = sld [smem:[#allocation37_spill]]  ;;  %s1575_s18 = scalar_lea.vmem %s5041_s3, %s4439_s0 }
  0x7b   : > { %s5048_s28 = sld [smem:[#allocation38_spill]] }
  0x7c   : > { %5049 = sst [smem:[#allocation50_spill]] %s4497_s12  ;;  %s1578_s9 = scalar_lea.vmem %s5043_s21, %s4439_s0 }
  0x7d   : > { %s5050_s16 = sld [smem:[#allocation39_spill]]  ;;  %s1581_s6 = scalar_lea.vmem %s5044_s19, %s4439_s0 }
  0x7e   : > { %s5051_s7 = sld [smem:[#allocation40_spill]]  ;;  %s4523_s23 = scalar_lea.vmem %s5045_s8, %s4446_s11 }
  0x7f   : > { %5052 = sst [smem:[#allocation51_spill]] %s4503_s1 }
  0x80   : > { %s1589_s2 = scalar_lea.vmem %s5047_s30, %s4439_s0  ;;  %s5053_s25 = sld [smem:[#allocation43_spill]] }
  0x81   : > { %s4529_s12 = scalar_lea.vmem %s5048_s28, %s4455_s26 }
  0x83   : > { %s1600_s27 = scalar_lea.vmem %s5050_s16, %s4439_s0 }
  0x84   : > { %s1603_s13 = scalar_lea.vmem %s5051_s7, %s4439_s0 }
  0x86   : > { %p3769_p4 = scmp.ne.s32.totalorder %s5053_s25, 0 }
  0x87   : > { %s5054_s1 = sld [smem:[#allocation6_spill]] (!%p3769_p4) }
  0x88   : > { %1608 = sbr.rel (%p3769_p4) target bundleno = 144 (0x90), region = 168 }
  0x8d   : > { %v1609_v0 = vld [vmem:[%s5054_s1] sm:$0xff]  ;;  %vm1611_vm0 = vcmask 261120   ;;  %v1610_v1 = vld [vmem:[%s5054_s1 + $0x8] sm:$0xff] }
  0x8e   : > { %1612 = vst.msk [vmem:[#allocation2] sm:$0xff] %vm1611_vm0, %v1609_v0 }
  0x8f   : > { %1613 = vst.msk [vmem:[#allocation2 + $0x8] sm:$0xff] %vm1611_vm0, %v1610_v1 }
  0x90 PF: > { %vm1617_vm1 = vcmask 261120   ;;  %v4228_v6 = vmov 32.0   ;;  %s5055_s5 = sld [smem:[#allocation44_spill]]  ;;  %vm1800_vm9 = vcmask 523264  }
  0x91   : > { %4062 = vrcp.f32 %v4228_v6  ;;  %s5056_s17 = sld [smem:[#allocation8_spill]] }
  0x92   : > { %s5057_s21 = sld [smem:[#allocation9_spill]] }
  0x93   : > { %s5058_s29 = sld [smem:[#allocation45_spill]] }
  0x94   : > { %s5060_s8 = sld [smem:[#allocation11_spill]] }
  0x95   : > { %v4540_v2 = vld [vmem:[#allocation2] sm:$0xff]  ;;  %s5063_s28 = sld [smem:[#allocation13_spill]] }
  0x96   : > { %v4542_v3 = vld [vmem:[#allocation2 + $0x8] sm:$0xff]  ;;  %v1618_v4 = vsel %vm1617_vm1, %v4540_v2, 0.0  ;;  %v3953_v23 = vld [vmem:[%s5055_s5 + $0x18] sm:$0xff]  ;;  %v3952_v25 = vld [vmem:[%s5055_s5 + $0x10] sm:$0xff]  ;;  %s5065_s11 = sld [smem:[#allocation46_spill]] }
  0x97   : > { %v1621_v5 = vsel %vm1617_vm1, %v4542_v3, 0.0  ;;  %1619 = vadd.xlane.f32.xlu0 %v1618_v4  ;;  %v4063_v7 = vpop.eup %4062  ;;  %v1723_v24 = vsel %vm1617_vm1, %v3953_v23, 0  ;;  %v1720_v26 = vsel %vm1617_vm1, %v3952_v25, 0  ;;  %v3951_v27 = vld [vmem:[%s5055_s5 + $0x8] sm:$0xff]  ;;  %v3950_v29 = vld [vmem:[%s5055_s5] sm:$0xff]  ;;  %s5059_s3 = scalar_lea.vmem %s5056_s17, %s4439_s0  ;;  %s5066_s16 = sld [smem:[#allocation47_spill]] }
  0x98   : > { %v1625_v8 = vmul.f32 32.0, %v4063_v7  ;;  %vm1629_vm2 = vweird.f32 %v4063_v7  ;;  %1729 = vmatpush.bf16.xpose.msra.mxu0 %v1723_v24  ;;  %v1717_v28 = vsel %vm1617_vm1, %v3951_v27, 0  ;;  %v1714_v30 = vsel %vm1617_vm1, %v3950_v29, 0  ;;  %v4041_v50 = vld [vmem:[%s5059_s3] ss:$0 sm:$0xff]  ;;  %s5061_s19 = scalar_lea.vmem %s5057_s21, %s4439_s0  ;;  %s5067_s22 = sld [smem:[#allocation48_spill]] }
  0x99   : > { %v4042_v55 = vld [vmem:[%s5061_s19] ss:$0 sm:$0xff]  ;;  %v3955_v60 = vld [vmem:[%s5058_s29 + $0x8] sm:$0xff]  ;;  %s5068_s26 = sld [smem:[#allocation14_spill]] }
  0x9a   : > { %v1626_v9 = vsub.f32 1.0, %v1625_v8  ;;  %v1808_v61 = vsel %vm1800_vm9, %v3955_v60, 0  ;;  %s5062_s30 = scalar_lea.vmem %s5060_s8, %s4439_s0  ;;  %v3954_v1 = vld [vmem:[%s5058_s29] sm:$0xff]  ;;  %s5069_s25 = sld [smem:[#allocation15_spill]] }
  0x9b   : > { %1816 = vmatpush.bf16.xpose.msra.mxu1 %v1808_v61  ;;  %v4043_v62 = vld [vmem:[%s5062_s30] ss:$0 sm:$0xff]  ;;  %s5064_s7 = scalar_lea.vmem %s5063_s28, %s4439_s0  ;;  %s5071_s17 = sld [smem:[#allocation19_spill]] }
  0x9c   : > { %v1627_v10 = vmul.f32 %v4063_v7, %v1626_v9  ;;  %s5072_s21 = sld [smem:[#allocation17_spill]]  ;;  %s4229_s28 = smov 120  }
  0x9d   : > { %s5073_s29 = sld [smem:[#allocation21_spill]] }
  0x9e   : > { %v1628_v11 = vadd.f32 %v4063_v7, %v1627_v10 }
  0x9f   : > { %1622 = vadd.xlane.f32.xlu0 %v1621_v5  ;;  %v1805_v5 = vsel %vm1800_vm9, %v3954_v1, 0  ;;  %s5070_s5 = scalar_lea.vmem %s5068_s26, %s4439_s0  ;;  %s5080_s26 = sld [smem:[#allocation23_spill]] }
  0xa0   : > { %v4548_v12 = vsel %vm1629_vm2, %v4063_v7, %v1628_v11  ;;  %1730 = vmatpush.bf16.xpose.msra.mxu0 %v1720_v26  ;;  %s5074_s3 = scalar_lea.vmem %s5069_s25, %s4439_s0 }
  0xa1   : > { %s5075_s8 = scalar_lea.vmem %s5071_s17, %s4439_s0  ;;  %s5083_s17 = sld [smem:[#allocation24_spill]] }
  0xa2   : > { %s5076_s19 = scalar_lea.vmem %s5072_s21, %s4439_s0  ;;  %s5084_s21 = sld [smem:[#allocation25_spill]] }
  0xa3   : > { %1817 = vmatpush.bf16.xpose.msra.mxu1 %v1805_v5  ;;  %s5077_s30 = scalar_lea.vmem %s5073_s29, %s4439_s0  ;;  %s5085_s29 = sld [smem:[#allocation27_spill]] }
  0xa5   : > { %s5081_s25 = scalar_lea.vmem %s5080_s26, %s4439_s0 }
  0xa8   : > { %1731 = vmatpush.bf16.xpose.msra.mxu0 %v1717_v28 }
  0xb0   : > { %1732 = vmatpush.bf16.xpose.msra.mxu0 %v1714_v30 }
 0x10a   : > { %v1620_v13 = vpop.xlane.xlu0 %1619 }
 0x10b   : > { %v1631_v14 = vmul.f32 %v4548_v12, %v1620_v13 }
 0x10d   : > { %v1633_v15 = vsub.f32 %v4540_v2, %v1631_v14 }
 0x10f   : > { %v1635_v16 = vmul.f32 %v1633_v15, %v1633_v15 }
 0x111   : > { %v1637_v17 = vsel %vm1617_vm1, %v1635_v16, 0.0 }
 0x112   : > { %1638 = vadd.xlane.f32.xlu1 %v1637_v17  ;;  %v1623_v18 = vpop.xlane.xlu0 %1622 }
 0x113   : > { %v1632_v19 = vmul.f32 %v4548_v12, %v1623_v18 }
 0x115   : > { %v1634_v20 = vsub.f32 %v4542_v3, %v1632_v19 }
 0x117   : > { %v1636_v21 = vmul.f32 %v1634_v20, %v1634_v20 }
 0x119   : > { %v1640_v22 = vsel %vm1617_vm1, %v1636_v21, 0.0 }
 0x11a   : > { %1641 = vadd.xlane.f32.xlu1 %v1640_v22 }
 0x185   : > { %v1639_v31 = vpop.xlane.xlu1 %1638 }
 0x186   : > { %v1643_v32 = vmul.f32 %v1639_v31, %v4548_v12 }
 0x188   : > { %v1645_v33 = vadd.f32 1e-05, %v1643_v32 }
 0x18a   : > { %4064 = vrsqrt.f32 %v1645_v33  ;;  %vm1653_vm4 = vweird.f32 %v1645_v33 }
 0x18d   : > { %v1642_v34 = vpop.xlane.xlu1 %1641 }
 0x18e   : > { %v1644_v35 = vmul.f32 %v1642_v34, %v4548_v12 }
 0x190   : > { %v4065_v36 = vpop.eup %4064  ;;  %v1646_v37 = vadd.f32 1e-05, %v1644_v35 }
 0x191   : > { %v1648_v38 = vmul.f32 %v4065_v36, %v1645_v33  ;;  %vm1654_vm3 = vweird.f32 %v4065_v36 }
 0x192   : > { %4066 = vrsqrt.f32 %v1646_v37  ;;  %vm1655_vm5 = vmor %vm1653_vm4, %vm1654_vm3  ;;  %vm1663_vm7 = vweird.f32 %v1646_v37 }
 0x193   : > { %v1649_v39 = vmul.f32 %v4065_v36, %v1648_v38 }
 0x195   : > { %v1650_v40 = vmul.f32 0.5, %v1649_v39 }
 0x197   : > { %v1651_v41 = vsub.f32 1.5, %v1650_v40 }
 0x198   : > { %v4067_v42 = vpop.eup %4066 }
 0x199   : > { %v1652_v43 = vmul.f32 %v4065_v36, %v1651_v41  ;;  %v1658_v44 = vmul.f32 %v4067_v42, %v1646_v37  ;;  %vm1664_vm6 = vweird.f32 %v4067_v42  ;;  %v4044_v37 = vld [vmem:[%s5064_s7] ss:$0 sm:$0xff]  ;;  %s5078_s7 = sld [smem:[#allocation7_spill]] }
 0x19a   : > { %vm1665_vm8 = vmor %vm1663_vm7, %vm1664_vm6 }
 0x19b   : > { %v1659_v45 = vmul.f32 %v4067_v42, %v1658_v44  ;;  %v1656_v46 = vsel %vm1655_vm5, %v4065_v36, %v1652_v43 }
 0x19c   : > { %v1667_v49 = vmul.f32 %v1656_v46, %v1633_v15 }
 0x19d   : > { %v1660_v47 = vmul.f32 0.5, %v1659_v45 }
 0x19e   : > { %v1673_v54 = vmul.f32 %v4041_v50, %v1667_v49 }
 0x19f   : > { %v1661_v48 = vsub.f32 1.5, %v1660_v47 }
 0x1a0   : > { %v1679_v57 = vadd.f32 %v4042_v55, %v1673_v54 }
 0x1a1   : > { %v1662_v51 = vmul.f32 %v4067_v42, %v1661_v48 }
 0x1a3   : > { %v1666_v52 = vsel %vm1665_vm8, %v4067_v42, %v1662_v51 }
 0x1a4   : > { %v1668_v53 = vmul.f32 %v1666_v52, %v1634_v20 }
 0x1a6   : > { %v1674_v56 = vmul.f32 %v4041_v50, %v1668_v53 }
 0x1a8   : > { %v1680_v58 = vadd.f32 %v4042_v55, %v1674_v56  ;;  %v3957_v56 = vld [vmem:[%s5065_s11 + $0x8] sm:$0xff] }
 0x1aa   : > { %v1689_v59 = vpack.c.bf16 %v1680_v58, %v1679_v57  ;;  %v3959_v57 = vld [vmem:[%s5066_s16 + $0x8] sm:$0xff] }
 0x1ab   : > { %v3961_v58 = vld [vmem:[%s5067_s22 + $0x8] sm:$0xff]  ;;  %v1954_v60 = vsel %vm1617_vm1, %v3959_v57, 0 }
 0x1ac   : > { %3786 = vmatmul.msk.bf16.vlgmr.msra.gmra.mxu0 %vm1617_vm1, %v1689_v59  ;;  %v1912_v59 = vsel %vm1617_vm1, %v3957_v56, 0  ;;  %v1994_v61 = vsel %vm1617_vm1, %v3961_v58, 0  ;;  %1962 = vmatpush.bf16.xpose.msra.mxu3 %v1954_v60 }
 0x1ad   : > { %1920 = vmatpush.bf16.xpose.msra.mxu2 %v1912_v59  ;;  %2002 = vmatpush.bf16.xpose.msrb.mxu1 %v1994_v61 }
 0x229   : > { %v1734_v63 = vpop.f32.mrf.mxu0 }
 0x22a   : > { %v1743_v0 = vadd.f32 %v4043_v62, %v1734_v63  ;;  %v3958_v63 = vld [vmem:[%s5066_s16] sm:$0xff]  ;;  %s5079_s16 = sld [smem:[#allocation49_spill]] }
 0x22c   : > { %v3787_v4 = vmul.f32 -1.442695, %v1743_v0 }
 0x22e   : > { %4068 = vpow2.f32 %v3787_v4  ;;  %v1951_v4 = vsel %vm1617_vm1, %v3958_v63, 0 }
 0x22f   : > { %1963 = vmatpush.bf16.xpose.msra.mxu3 %v1951_v4 }
 0x231   : > { %v1736_v6 = vpop.f32.mrf.mxu0 }
 0x232   : > { %v1744_v7 = vadd.f32 %v4043_v62, %v1736_v6  ;;  %v3956_v62 = vld [vmem:[%s5065_s11] sm:$0xff]  ;;  %s4230_s11 = smov 112  }
 0x233   : > { %v1909_v1 = vsel %vm1617_vm1, %v3956_v62, 0 }
 0x234   : > { %v4069_v8 = vpop.eup %4068  ;;  %v3788_v9 = vmul.f32 -1.442695, %v1744_v7  ;;  %1921 = vmatpush.bf16.xpose.msra.mxu2 %v1909_v1 }
 0x235   : > { %v1751_v10 = vadd.f32 1.0, %v4069_v8 }
 0x236   : > { %4070 = vpow2.f32 %v3788_v9 }
 0x237   : > { %4072 = vrcp.f32 %v1751_v10  ;;  %v1764_v21 = vand.u32 2147483648, %v1751_v10  ;;  %vm1758_vm11 = vweird.f32 %v1751_v10  ;;  %v1762_v22 = vand.u32 2147483647, %v1751_v10 }
 0x239   : > { %v1765_v28 = vor.u32 1.1754944e-38, %v1764_v21  ;;  %vm1763_vm14 = vcmp.eq.f32.partialorder %v1762_v22, 8.507059e+37 }
 0x23c   : > { %v4071_v11 = vpop.eup %4070 }
 0x23d   : > { %v4073_v13 = vpop.eup %4072  ;;  %v1752_v14 = vadd.f32 1.0, %v4071_v11 }
 0x23e   : > { %v1754_v15 = vmul.f32 %v4073_v13, %v1751_v10  ;;  %vm1759_vm10 = vweird.f32 %v4073_v13 }
 0x23f   : > { %4074 = vrcp.f32 %v1752_v14  ;;  %vm1760_vm12 = vmor %vm1758_vm11, %vm1759_vm10  ;;  %v1779_v24 = vand.u32 2147483648, %v1752_v14  ;;  %v1777_v27 = vand.u32 2147483647, %v1752_v14  ;;  %vm1773_vm15 = vweird.f32 %v1752_v14 }
 0x240   : > { %v1755_v16 = vsub.f32 1.0, %v1754_v15  ;;  %vm2043_vm10 = vcmask 64512   ;;  %vm2117_vm11 = vcmask 1043456  }
 0x241   : > { %v1780_v31 = vor.u32 1.1754944e-38, %v1779_v24  ;;  %vm1778_vm2 = vcmp.eq.f32.partialorder %v1777_v27, 8.507059e+37 }
 0x242   : > { %v1756_v17 = vmul.f32 %v4073_v13, %v1755_v16 }
 0x244   : > { %v1757_v19 = vadd.f32 %v4073_v13, %v1756_v17 }
 0x245   : > { %v4075_v18 = vpop.eup %4074 }
 0x246   : > { %v1769_v20 = vmul.f32 %v4075_v18, %v1752_v14  ;;  %v1761_v25 = vsel %vm1760_vm12, %v4073_v13, %v1757_v19  ;;  %vm1774_vm13 = vweird.f32 %v4075_v18 }
 0x247   : > { %v1766_v30 = vsel %vm1763_vm14, %v1765_v28, %v1761_v25  ;;  %vm1775_vm0 = vmor %vm1773_vm15, %vm1774_vm13 }
 0x248   : > { %v1770_v23 = vsub.f32 1.0, %v1769_v20  ;;  %v1783_v34 = vmul.f32 %v1766_v30, %v1743_v0  ;;  %v3960_v0 = vld [vmem:[%s5067_s22] sm:$0xff]  ;;  %s4231_s22 = smov 104  }
 0x249   : > { %v1991_v5 = vsel %vm1617_vm1, %v3960_v0, 0 }
 0x24a   : > { %v1771_v26 = vmul.f32 %v4075_v18, %v1770_v23  ;;  %2003 = vmatpush.bf16.xpose.msrb.mxu1 %v1991_v5  ;;  %v1616_v5 = vld [vmem:[%s5078_s7] sm:$0x3] }
 0x24c   : > { %v1772_v29 = vadd.f32 %v4075_v18, %v1771_v26  ;;  %v4045_v26 = vld [vmem:[%s5070_s5] ss:$0 sm:$0xff]  ;;  %s5082_s5 = sld [smem:[#allocation50_spill]] }
 0x24e   : > { %v1776_v32 = vsel %vm1775_vm0, %v4075_v18, %v1772_v29 }
 0x24f   : > { %v1781_v33 = vsel %vm1778_vm2, %v1780_v31, %v1776_v32  ;;  %v4046_v31 = vld [vmem:[%s5074_s3] ss:$0 sm:$0xff]  ;;  %s5086_s3 = scalar_lea.vmem %s5083_s17, %s4439_s0 }
 0x250   : > { %v1784_v35 = vmul.f32 %v1781_v33, %v1744_v7 }
 0x252   : > { %v1789_v36 = vpack.c.bf16 %v1784_v35, %v1783_v34 }
 0x254   : > { %3797 = vmatmul.msk.bf16.vlgmr.msra.gmra.mxu1 %vm1800_vm9, %v1789_v36 }
 0x2d1   : > { %v1819_v38 = vpop.f32.mrf.mxu1 }
 0x2d2   : > { %v1828_v39 = vadd.f32 %v4044_v37, %v1819_v38  ;;  %v4048_v38 = vld [vmem:[%s5076_s19] ss:$0 sm:$0xff]  ;;  %s5088_s19 = scalar_lea.vmem %s5085_s29, %s4439_s0 }
 0x2d4   : > { %v1830_v40 = vmul.f32 0.5, %v1828_v39 }
 0x2d6   : > { %v4585_v41 = vadd.f32 %v1830_v40, %v4540_v2 }
 0x2d8   : > { %v1834_v42 = vsel %vm1617_vm1, %v4585_v41, 0.0 }
 0x2d9   : > { %1835 = vadd.xlane.f32.xlu2 %v1834_v42  ;;  %v1821_v43 = vpop.f32.mrf.mxu1 }
 0x2da   : > { %v1829_v44 = vadd.f32 %v4044_v37, %v1821_v43  ;;  %v4049_v37 = vld [vmem:[%s5075_s8] ss:$0 sm:$0xff]  ;;  %s5087_s8 = scalar_lea.vmem %s5084_s21, %s4439_s0 }
 0x2db   : > { %v4047_v43 = vld [vmem:[%s5077_s30] ss:$0 sm:$0xff]  ;;  %s4232_s30 = smov 96  }
 0x2dc   : > { %v1831_v45 = vmul.f32 0.5, %v1829_v44 }
 0x2de   : > { %v4590_v46 = vadd.f32 %v1831_v45, %v4542_v3 }
 0x2e0   : > { %v1837_v47 = vsel %vm1617_vm1, %v4590_v46, 0.0 }
 0x2e1   : > { %1838 = vadd.xlane.f32.xlu2 %v1837_v47 }
 0x34c   : > { %v1836_v48 = vpop.xlane.xlu2 %1835 }
 0x34d   : > { %v1840_v2 = vmul.f32 %v1836_v48, %v4548_v12 }
 0x34f   : > { %v1842_v49 = vsub.f32 %v4585_v41, %v1840_v2 }
 0x351   : > { %v1844_v50 = vmul.f32 %v1842_v49, %v1842_v49 }
 0x353   : > { %v1846_v51 = vsel %vm1617_vm1, %v1844_v50, 0.0 }
 0x354   : > { %1847 = vadd.xlane.f32.xlu0 %v1846_v51  ;;  %v1839_v52 = vpop.xlane.xlu2 %1838 }
 0x355   : > { %v1841_v3 = vmul.f32 %v1839_v52, %v4548_v12 }
 0x357   : > { %v1843_v53 = vsub.f32 %v4590_v46, %v1841_v3 }
 0x359   : > { %v1845_v54 = vmul.f32 %v1843_v53, %v1843_v53 }
 0x35b   : > { %v1849_v55 = vsel %vm1617_vm1, %v1845_v54, 0.0 }
 0x35c   : > { %1850 = vadd.xlane.f32.xlu1 %v1849_v55 }
 0x3c7   : > { %v1848_v6 = vpop.xlane.xlu0 %1847 }
 0x3c8   : > { %v1852_v7 = vmul.f32 %v1848_v6, %v4548_v12  ;;  %v2019_v6 = vmul.f32 1e+30, %v1616_v5 }
 0x3ca   : > { %v1854_v8 = vadd.f32 1e-05, %v1852_v7  ;;  %v4650_v7 = vperm.slane %v2019_v6, 0 }
 0x3cc   : > { %4076 = vrsqrt.f32 %v1854_v8  ;;  %vm1862_vm4 = vweird.f32 %v1854_v8 }
 0x3cf   : > { %v1851_v9 = vpop.xlane.xlu1 %1850 }
 0x3d0   : > { %v1853_v10 = vmul.f32 %v1851_v9, %v4548_v12 }
 0x3d2   : > { %v4077_v11 = vpop.eup %4076  ;;  %v1855_v13 = vadd.f32 1e-05, %v1853_v10 }
 0x3d3   : > { %v1857_v14 = vmul.f32 %v4077_v11, %v1854_v8  ;;  %vm1863_vm3 = vweird.f32 %v4077_v11  ;;  %v2017_v8 = vrot.slane %v1616_v5, 1 }
 0x3d4   : > { %4078 = vrsqrt.f32 %v1855_v13  ;;  %vm1864_vm5 = vmor %vm1862_vm4, %vm1863_vm3  ;;  %vm1872_vm7 = vweird.f32 %v1855_v13 }
 0x3d5   : > { %v1858_v15 = vmul.f32 %v4077_v11, %v1857_v14 }
 0x3d7   : > { %v1859_v16 = vmul.f32 0.5, %v1858_v15 }
 0x3d9   : > { %v1860_v17 = vsub.f32 1.5, %v1859_v16 }
 0x3da   : > { %v4079_v18 = vpop.eup %4078 }
 0x3db   : > { %v1861_v19 = vmul.f32 %v4077_v11, %v1860_v17  ;;  %v1867_v20 = vmul.f32 %v4079_v18, %v1855_v13  ;;  %vm1873_vm6 = vweird.f32 %v4079_v18 }
 0x3dc   : > { %vm1874_vm8 = vmor %vm1872_vm7, %vm1873_vm6 }
 0x3dd   : > { %v1868_v21 = vmul.f32 %v4079_v18, %v1867_v20  ;;  %v1865_v22 = vsel %vm1864_vm5, %v4077_v11, %v1861_v19  ;;  %v2020_v11 = vmul.f32 1e+30, %v2017_v8 }
 0x3de   : > { %v1876_v25 = vmul.f32 %v1865_v22, %v1842_v49 }
 0x3df   : > { %v1869_v23 = vmul.f32 0.5, %v1868_v21  ;;  %v4654_v14 = vperm.slane %v2020_v11, 0 }
 0x3e0   : > { %v1882_v30 = vmul.f32 %v4045_v26, %v1876_v25 }
 0x3e1   : > { %v1870_v24 = vsub.f32 1.5, %v1869_v23 }
 0x3e2   : > { %v1888_v33 = vadd.f32 %v4046_v31, %v1882_v30 }
 0x3e3   : > { %v1871_v27 = vmul.f32 %v4079_v18, %v1870_v24 }
 0x3e5   : > { %v1875_v28 = vsel %vm1874_vm8, %v4079_v18, %v1871_v27 }
 0x3e6   : > { %v1877_v29 = vmul.f32 %v1875_v28, %v1843_v53 }
 0x3e8   : > { %v1883_v32 = vmul.f32 %v4045_v26, %v1877_v29 }
 0x3ea   : > { %v1889_v34 = vadd.f32 %v4046_v31, %v1883_v32 }
 0x3ec   : > { %v1894_v35 = vpack.c.bf16 %v1889_v34, %v1888_v33 }
 0x3ee   : > { %3806 = vmatmul.msk.bf16.vlgmr.msra.gmra.mxu2 %vm1617_vm1, %v1894_v35  ;;  %3815 = vmatmul.msk.bf16.vlgmr.msra.gmra.mxu3 %vm1617_vm1, %v1894_v35 }
 0x3ef   : > { %3824 = vmatmul.msk.bf16.vlgmr.msrb.gmra.mxu1 %vm1617_vm1, %v1894_v35 }
 0x46c   : > { %v2005_v36 = vpop.f32.mrf.mxu1 }
 0x46d   : > { %v2014_v50 = vadd.f32 %v4047_v43, %v2005_v36 }
 0x46f   : > { %v4641_v57 = vpack.c.bf16 %v2014_v50, %v2014_v50 }
 0x471   : > { %v1923_v39 = vpop.f32.mrf.mxu2  ;;  %v1965_v40 = vpop.f32.mrf.mxu3  ;;  %v2119_v62 = vsel %vm2117_vm11, %v4641_v57, 0 }
 0x472   : > { %v1974_v42 = vadd.f32 %v4049_v37, %v1965_v40  ;;  %v1932_v44 = vadd.f32 %v4048_v38, %v1923_v39 }
 0x474   : > { %v2039_v45 = vpack.c.bf16 %v1974_v42, %v1974_v42  ;;  %v2007_v47 = vpop.f32.mrf.mxu1  ;;  %v1934_v52 = vmul.f32 0.35355338, %v1932_v44 }
 0x475   : > { %v2015_v48 = vadd.f32 %v4047_v43, %v2007_v47 }
 0x476   : > { %v2195_v2 = vunpack.c.l.b16 %v2039_v45  ;;  %v2048_v49 = vsel %vm2043_vm10, %v2039_v45, 0  ;;  %v2037_v58 = vpack.c.bf16 %v1934_v52, %v1934_v52  ;;  %v3963_v45 = vld [vmem:[%s5079_s16 + $0x8] sm:$0xff] }
 0x477   : > { %v4633_v51 = vpack.c.bf16 %v2015_v48, %v2015_v48  ;;  %2057 = vmatpush.bf16.xpose.msrb.mxu2 %v2048_v49  ;;  %v2171_v47 = vsel %vm2043_vm10, %v3963_v45, 0  ;;  %v3962_v49 = vld [vmem:[%s5079_s16] sm:$0xff] }
 0x478   : > { %v4635_v3 = vpack.c.b16 %v2195_v2, %v2195_v2  ;;  %v2190_v20 = vunpack.c.l.b16 %v2037_v58 }
 0x479   : > { %v2138_v53 = vsel %vm2117_vm11, %v4633_v51, 0  ;;  %v1925_v54 = vpop.f32.mrf.mxu2  ;;  %v1967_v55 = vpop.f32.mrf.mxu3 }
 0x47a   : > { %v1975_v56 = vadd.f32 %v4049_v37, %v1967_v55  ;;  %2147 = vmatpush.bf16.msra.mxu1 %v2138_v53  ;;  %2197 = vrot.lane.b32.xlu1 %v4635_v3, %s4229_s28  ;;  %v1933_v59 = vadd.f32 %v4048_v38, %v1925_v54  ;;  %v4658_v21 = vpack.c.b16 %v2190_v20, %v2190_v20  ;;  %v2168_v54 = vsel %vm2043_vm10, %v3962_v49, 0 }
 0x47c   : > { %v2040_v60 = vpack.c.bf16 %v1975_v56, %v1975_v56  ;;  %v1935_v63 = vmul.f32 0.35355338, %v1933_v59 }
 0x47e   : > { %3825 = vmatmul.msk.bf16.vlgmr.msrb.gmra.mxu2 %vm2043_vm10, %v2037_v58  ;;  %v2067_v61 = vsel %vm2043_vm10, %v2040_v60, 0  ;;  %v2038_v0 = vpack.c.bf16 %v1935_v63, %v1935_v63  ;;  %v2224_v34 = vunpack.c.l.b16 %v2040_v60 }
 0x47f   : > { %2076 = vmatpush.bf16.xpose.msrb.mxu3 %v2067_v61  ;;  %2179 = vmatpush.bf16.xpose.msra.mxu2 %v2171_v47 }
 0x480   : > { %v2219_v22 = vunpack.c.l.b16 %v2038_v0  ;;  %v2225_v35 = vpack.c.b16 %v2224_v34, %v2224_v34 }
 0x482   : > { %v4662_v23 = vpack.c.b16 %v2219_v22, %v2219_v22 }
 0x486   : > { %3826 = vmatmul.msk.bf16.vlgmr.msrb.gmra.mxu3 %vm2043_vm10, %v2038_v0 }
 0x487   : > { %2128 = vmatpush.bf16.msra.mxu3 %v2119_v62  ;;  %2180 = vmatpush.bf16.xpose.msra.mxu2 %v2168_v54 }
 0x4ec   : > { %v2198_v1 = vpop.permute.xlu1 %2197 }
 0x4ed   : > { %v2203_v4 = vsel %vm2043_vm10, %v2198_v1, 0 }
 0x4ee   : > { %2212 = vmatpush.bf16.xpose.msrb.mxu3 %v2203_v4 }
 0x501   : > { %v2059_v9 = vpop.f32.mrf.mxu2 }
 0x502   : > { %v2088_v10 = vsub.f32 %v2059_v9, %v4650_v7 }
 0x504   : > { %v2090_v13 = vsel %vm2043_vm10, %v2088_v10, -inf }
 0x505   : > { %2091 = vmax.xlane.f32.xlu2 %v2090_v13  ;;  %v2298_v13 = vunpack.c.l.b16 %v4633_v51  ;;  %v2274_v51 = vunpack.c.l.b16 %v4641_v57 }
 0x507   : > { %v4702_v22 = vpack.c.b16 %v2274_v51, %v2274_v51 }
 0x509   : > { %v2061_v15 = vpop.f32.mrf.mxu2  ;;  %v2078_v16 = vpop.f32.mrf.mxu3 }
 0x50a   : > { %v2089_v17 = vsub.f32 %v2078_v16, %v4654_v14  ;;  %v4693_v15 = vpack.c.b16 %v2298_v13, %v2298_v13 }
 0x50c   : > { %v2093_v18 = vsel %vm2043_vm10, %v2089_v17, -inf }
 0x50d   : > { %2094 = vmax.xlane.f32.xlu1 %v2093_v18 }
 0x511   : > { %v2080_v19 = vpop.f32.mrf.mxu3 }
 0x51d   : > { %2192 = vrot.lane.b32.xlu2 %v4658_v21, %s4229_s28 }
 0x525   : > { %2221 = vrot.lane.b32.xlu2 %v4662_v23, %s4229_s28 }
 0x52d   : > { %2357 = vrot.lane.b32.xlu2 %v4658_v21, %s4230_s11 }
 0x578   : > { %v2092_v24 = vpop.xlane.xlu2 %2091 }
 0x579   : > { %v2096_v25 = vsub.f32 %v2088_v10, %v2092_v24 }
 0x57b   : > { %v2098_v26 = vmul.f32 1.442695, %v2096_v25 }
 0x57d   : > { %4080 = vpow2.f32 %v2098_v26 }
 0x580   : > { %v2095_v27 = vpop.xlane.xlu1 %2094  ;;  %v2193_v36 = vpop.permute.xlu2 %2192 }
 0x581   : > { %v2097_v28 = vsub.f32 %v2089_v17, %v2095_v27 }
 0x583   : > { %v4081_v29 = vpop.eup %4080  ;;  %v2100_v30 = vmul.f32 1.442695, %v2097_v28 }
 0x584   : > { %v2102_v31 = vsel %vm2043_vm10, %v4081_v29, 0.0 }
 0x585   : > { %4082 = vpow2.f32 %v2100_v30  ;;  %2103 = vadd.xlane.f32.xlu0 %v2102_v31 }
 0x588   : > { %v2222_v37 = vpop.permute.xlu2 %2221 }
 0x58b   : > { %v4083_v32 = vpop.eup %4082 }
 0x58c   : > { %v2105_v33 = vsel %vm2043_vm10, %v4083_v32, 0.0 }
 0x58d   : > { %2106 = vadd.xlane.f32.xlu2 %v2105_v33 }
 0x590   : > { %v2358_v38 = vpop.permute.xlu2 %2357 }
 0x599   : > { %2226 = vrot.lane.b32.xlu0 %v2225_v35, %s4229_s28 }
 0x5a1   : > { %2359 = vrot.lane.b32.xlu0 %v4635_v3, %s4230_s11 }
 0x5a5   : > { %2380 = vrot.lane.b32.xlu2 %v4662_v23, %s4230_s11 }
 0x5f8   : > { %v2104_v39 = vpop.xlane.xlu0 %2103 }
 0x5f9   : > { %4084 = vrcp.f32 %v2104_v39 }
 0x5ff   : > { %v4085_v40 = vpop.eup %4084 }
 0x600   : > { %v2110_v42 = vmul.f32 %v4085_v40, %v4081_v29  ;;  %v2107_v43 = vpop.xlane.xlu2 %2106 }
 0x601   : > { %4086 = vrcp.f32 %v2107_v43 }
 0x602   : > { %v2112_v44 = vpack.c.bf16 %v2110_v42, %v2110_v42  ;;  %v3964_v42 = vld [vmem:[%s5079_s16 + $0x10] sm:$0xff] }
 0x603   : > { %v2336_v43 = vsel %vm2043_vm10, %v3964_v42, 0 }
 0x604   : > { %3827 = vmatmul.msk.bf16.vlgmr.msra.gmra.mxu3 %vm2043_vm10, %v2112_v44 }
 0x607   : > { %v4087_v48 = vpop.eup %4086 }
 0x608   : > { %v2111_v2 = vmul.f32 %v4087_v48, %v4083_v32  ;;  %v2381_v39 = vpop.permute.xlu2 %2380 }
 0x60a   : > { %v2113_v50 = vpack.c.bf16 %v2111_v2, %v2111_v2 }
 0x60b   : > { %v2227_v52 = vpop.permute.xlu0 %2226 }
 0x60c   : > { %3828 = vmatmul.msk.bf16.vlgmr.msra.gmra.mxu1 %vm2043_vm10, %v2113_v50  ;;  %v2232_v53 = vsel %vm2043_vm10, %v2227_v52, 0 }
 0x60d   : > { %2241 = vmatpush.bf16.xpose.msrb.mxu0 %v2232_v53 }
 0x613   : > { %v2360_v55 = vpop.permute.xlu0 %2359 }
 0x614   : > { %v2365_v56 = vsel %vm2043_vm10, %v2360_v55, 0  ;;  %3838 = vmatmul.msk.bf16.vlgmr.msrb.gmra.mxu3 %vm2043_vm10, %v2193_v36  ;;  %3839 = vmatmul.msk.bf16.vlgmr.msrb.gmra.mxu0 %vm2043_vm10, %v2222_v37 }
 0x615   : > { %2374 = vmatpush.bf16.xpose.msra.mxu0 %v2365_v56 }
 0x624   : > { %3851 = vmatmul.msk.bf16.vlgmr.msra.gmra.mxu0 %vm2043_vm10, %v2358_v38 }
 0x687   : > { %v2130_v58 = vpop.f32.mrf.mxu3 }
 0x689   : > { %v2149_v59 = vpop.f32.mrf.mxu1 }
 0x68a   : > { %v2153_v60 = vpack.c.bf16 %v2149_v59, %v2130_v58 }
 0x68c   : > { %3837 = vmatmul.msk.bf16.vlgmr.msra.gmra.mxu2 %vm2043_vm10, %v2153_v60 }
 0x68f   : > { %v2132_v61 = vpop.f32.mrf.mxu3 }
 0x691   : > { %v2151_v62 = vpop.f32.mrf.mxu1  ;;  %v2243_v63 = vpop.f32.mrf.mxu0 }
 0x692   : > { %v2248_v10 = vsub.f32 %v2243_v63, %v4654_v14 }
 0x694   : > { %v2252_v11 = vsel %vm2043_vm10, %v2248_v10, -inf }
 0x697   : > { %v2214_v0 = vpop.f32.mrf.mxu3 }
 0x698   : > { %v2247_v1 = vsub.f32 %v2214_v0, %v4650_v7 }
 0x699   : > { %v2245_v4 = vpop.f32.mrf.mxu0 }
 0x69a   : > { %v2249_v5 = vsel %vm2043_vm10, %v2247_v1, -inf }
 0x69b   : > { %2250 = vmax.xlane.f32.xlu0 %v2249_v5 }
 0x69f   : > { %v2216_v6 = vpop.f32.mrf.mxu3 }
 0x6a1   : > { %v2376_v8 = vpop.f32.mrf.mxu0 }
 0x6a2   : > { %v2403_v29 = vsub.f32 %v2376_v8, %v4650_v7 }
 0x6a4   : > { %v2405_v30 = vsel %vm2043_vm10, %v2403_v29, -inf }
 0x6a9   : > { %v2378_v9 = vpop.f32.mrf.mxu0 }
 0x6af   : > { %2382 = vrot.lane.b32.xlu0 %v2225_v35, %s4230_s11 }
 0x6d9   : > { %2253 = vmax.xlane.f32.xlu0 %v2252_v11 }
 0x6ed   : > { %2300 = vrot.lane.b32.xlu0 %v4693_v15, %s4229_s28 }
 0x6f5   : > { %2532 = vrot.lane.b32.xlu0 %v2225_v35, %s4231_s22 }
 0x6fd   : > { %2507 = vrot.lane.b32.xlu0 %v4658_v21, %s4231_s22 }
 0x70e   : > { %v2251_v16 = vpop.xlane.xlu0 %2250 }
 0x70f   : > { %v2255_v17 = vsub.f32 %v2247_v1, %v2251_v16  ;;  %v4733_v6 = vpop.f32.mrf.mxu2 }
 0x711   : > { %v2257_v18 = vmul.f32 1.442695, %v2255_v17 }
 0x713   : > { %4088 = vpow2.f32 %v2257_v18 }
 0x717   : > { %v4735_v9 = vpop.f32.mrf.mxu2 }
 0x719   : > { %v4089_v19 = vpop.eup %4088 }
 0x71a   : > { %v2261_v20 = vsel %vm2043_vm10, %v4089_v19, 0.0 }
 0x71b   : > { %2262 = vadd.xlane.f32.xlu1 %v2261_v20 }
 0x721   : > { %v2383_v24 = vpop.permute.xlu0 %2382 }
 0x722   : > { %v2388_v37 = vsel %vm2043_vm10, %v2383_v24, 0 }
 0x734   : > { %2276 = vrot.lane.b32.xlu1 %v4702_v22, %s4229_s28  ;;  %s5089_s28 = sld [smem:[#allocation51_spill]] }
 0x74c   : > { %v2254_v25 = vpop.xlane.xlu0 %2253 }
 0x74d   : > { %v2256_v26 = vsub.f32 %v2248_v10, %v2254_v25 }
 0x74f   : > { %v2259_v27 = vmul.f32 1.442695, %v2256_v26 }
 0x751   : > { %4090 = vpow2.f32 %v2259_v27 }
 0x757   : > { %v4091_v21 = vpop.eup %4090 }
 0x758   : > { %v2264_v28 = vsel %vm2043_vm10, %v4091_v21, 0.0 }
 0x759   : > { %2265 = vadd.xlane.f32.xlu2 %v2264_v28 }
 0x75e   : > { %2406 = vmax.xlane.f32.xlu1 %v2405_v30 }
 0x75f   : > { %v2301_v57 = vpop.permute.xlu0 %2300 }
 0x760   : > { %v2306_v31 = vsel %vm2117_vm11, %v2301_v57, 0 }
 0x761   : > { %2315 = vmatpush.bf16.msrb.mxu2 %v2306_v31 }
 0x767   : > { %v2533_v52 = vpop.permute.xlu0 %2532 }
 0x768   : > { %v2538_v55 = vsel %vm2043_vm10, %v2533_v52, 0 }
 0x76f   : > { %v2508_v20 = vpop.permute.xlu0 %2507 }
 0x771   : > { %2429 = vrot.lane.b32.xlu2 %v4702_v22, %s4230_s11 }
 0x779   : > { %2530 = vrot.lane.b32.xlu2 %v4662_v23, %s4231_s22  ;;  %v3965_v23 = vld [vmem:[%s5079_s16 + $0x18] sm:$0xff] }
 0x77a   : > { %v2339_v40 = vsel %vm2043_vm10, %v3965_v23, 0  ;;  %v3966_v23 = vld [vmem:[%s5079_s16 + $0x20] sm:$0xff] }
 0x77b   : > { %2347 = vmatpush.bf16.xpose.msra.mxu3 %v2339_v40  ;;  %v2486_v40 = vsel %vm2043_vm10, %v3966_v23, 0 }
 0x781   : > { %2450 = vrot.lane.b32.xlu2 %v4693_v15, %s4230_s11 }
 0x783   : > { %2348 = vmatpush.bf16.xpose.msra.mxu3 %v2336_v43 }
 0x78e   : > { %v2263_v32 = vpop.xlane.xlu1 %2262 }
 0x78f   : > { %4092 = vrcp.f32 %v2263_v32 }
 0x795   : > { %v4093_v33 = vpop.eup %4092 }
 0x796   : > { %v2269_v34 = vmul.f32 %v4093_v33, %v4089_v19 }
 0x798   : > { %v2271_v38 = vpack.c.bf16 %v2269_v34, %v2269_v34 }
 0x7a6   : > { %v2277_v35 = vpop.permute.xlu1 %2276 }
 0x7a7   : > { %v2282_v36 = vsel %vm2117_vm11, %v2277_v35, 0 }
 0x7a8   : > { %2291 = vmatpush.bf16.msrb.mxu1 %v2282_v36 }
 0x7ab   : > { %3840 = vmatmul.msk.bf16.vlgmr.msrb.gmra.mxu1 %vm2043_vm10, %v2271_v38 }
 0x7ac   : > { %2397 = vmatpush.bf16.xpose.msra.mxu1 %v2388_v37 }
 0x7bb   : > { %3852 = vmatmul.msk.bf16.vlgmr.msra.gmra.mxu1 %vm2043_vm10, %v2381_v39 }
 0x7cc   : > { %v2266_v44 = vpop.xlane.xlu2 %2265 }
 0x7cd   : > { %4094 = vrcp.f32 %v2266_v44 }
 0x7d1   : > { %v2407_v45 = vpop.xlane.xlu1 %2406 }
 0x7d2   : > { %v2411_v47 = vsub.f32 %v2403_v29, %v2407_v45 }
 0x7d3   : > { %v4095_v48 = vpop.eup %4094 }
 0x7d4   : > { %v2270_v2 = vmul.f32 %v4095_v48, %v4091_v21  ;;  %v2413_v49 = vmul.f32 1.442695, %v2411_v47  ;;  %v2430_v50 = vpop.permute.xlu2 %2429 }
 0x7d5   : > { %v2435_v53 = vsel %vm2117_vm11, %v2430_v50, 0 }
 0x7d6   : > { %v2272_v54 = vpack.c.bf16 %v2270_v2, %v2270_v2  ;;  %4096 = vpow2.f32 %v2413_v49  ;;  %2444 = vmatpush.bf16.msra.mxu2 %v2435_v53 }
 0x7d8   : > { %3841 = vmatmul.msk.bf16.vlgmr.msrb.gmra.mxu2 %vm2043_vm10, %v2272_v54 }
 0x7da   : > { %2547 = vmatpush.bf16.xpose.msrb.mxu2 %v2538_v55 }
 0x7dc   : > { %v4097_v56 = vpop.eup %4096  ;;  %v2531_v58 = vpop.permute.xlu2 %2530 }
 0x7dd   : > { %v2417_v59 = vsel %vm2043_vm10, %v4097_v56, 0.0 }
 0x7de   : > { %2418 = vadd.xlane.f32.xlu1 %v2417_v59 }
 0x7e4   : > { %v2451_v60 = vpop.permute.xlu2 %2450 }
 0x7e5   : > { %v2456_v61 = vsel %vm2117_vm11, %v2451_v60, 0 }
 0x7e6   : > { %2465 = vmatpush.bf16.msrb.mxu3 %v2456_v61 }
 0x7f7   : > { %2509 = vrot.lane.b32.xlu1 %v4635_v3, %s4231_s22 }
 0x828   : > { %v2293_v62 = vpop.f32.mrf.mxu1 }
 0x830   : > { %v2295_v63 = vpop.f32.mrf.mxu1 }
 0x838   : > { %v2399_v0 = vpop.f32.mrf.mxu1 }
 0x839   : > { %v2404_v1 = vsub.f32 %v2399_v0, %v4654_v14 }
 0x83b   : > { %v2408_v4 = vsel %vm2043_vm10, %v2404_v1, -inf }
 0x83c   : > { %2409 = vmax.xlane.f32.xlu1 %v2408_v4 }
 0x840   : > { %v2401_v5 = vpop.f32.mrf.mxu1 }
 0x851   : > { %v2419_v8 = vpop.xlane.xlu1 %2418 }
 0x852   : > { %4098 = vrcp.f32 %v2419_v8 }
 0x858   : > { %v4099_v10 = vpop.eup %4098 }
 0x859   : > { %v2425_v11 = vmul.f32 %v4099_v10, %v4097_v56 }
 0x85b   : > { %v2427_v13 = vpack.c.bf16 %v2425_v11, %v2425_v11  ;;  %v2317_v16 = vpop.f32.mrf.mxu2 }
 0x85c   : > { %v2321_v3 = vpack.c.bf16 %v2317_v16, %v2293_v62  ;;  %v3969_v16 = vld [vmem:[%s5079_s16 + $0x38] sm:$0xff] }
 0x85d   : > { %3853 = vmatmul.msk.bf16.vlgmr.msra.gmra.mxu2 %vm2043_vm10, %v2427_v13 }
 0x85e   : > { %3850 = vmatmul.msk.bf16.vlgmr.msra.gmra.mxu3 %vm2043_vm10, %v2321_v3  ;;  %v2639_v3 = vsel %vm2043_vm10, %v3969_v16, 0  ;;  %v4052_v16 = vld [vmem:[%s5087_s8] ss:$0 sm:$0xff] }
 0x863   : > { %v2319_v17 = vpop.f32.mrf.mxu2 }
 0x864   : > { %v3968_v17 = vld [vmem:[%s5079_s16 + $0x30] sm:$0xff] }
 0x869   : > { %v2510_v18 = vpop.permute.xlu1 %2509 }
 0x86a   : > { %v2515_v19 = vsel %vm2043_vm10, %v2510_v18, 0  ;;  %v2636_v18 = vsel %vm2043_vm10, %v3968_v17, 0 }
 0x86b   : > { %2524 = vmatpush.bf16.xpose.msrb.mxu1 %v2515_v19 }
 0x86d   : > { %3865 = vmatmul.msk.bf16.vlgmr.msrb.gmra.mxu2 %vm2043_vm10, %v2531_v58 }
 0x872   : > { %3864 = vmatmul.msk.bf16.vlgmr.msrb.gmra.mxu1 %vm2043_vm10, %v2508_v20 }
 0x873   : > { %2647 = vmatpush.bf16.xpose.msra.mxu1 %v2639_v3 }
 0x87b   : > { %2648 = vmatpush.bf16.xpose.msra.mxu1 %v2636_v18 }
 0x8af   : > { %v2410_v51 = vpop.xlane.xlu1 %2409 }
 0x8b0   : > { %v2412_v24 = vsub.f32 %v2404_v1, %v2410_v51 }
 0x8b2   : > { %v2415_v25 = vmul.f32 1.442695, %v2412_v24 }
 0x8b4   : > { %4100 = vpow2.f32 %v2415_v25 }
 0x8ba   : > { %v4101_v26 = vpop.eup %4100 }
 0x8bb   : > { %v2420_v27 = vsel %vm2043_vm10, %v4101_v26, 0.0 }
 0x8bc   : > { %2421 = vadd.xlane.f32.xlu0 %v2420_v27 }
 0x8e0   : > { %v2446_v21 = vpop.f32.mrf.mxu2 }
 0x8e1   : > { %v2350_v54 = vpop.f32.mrf.mxu3 }
 0x8e2   : > { %v2355_v10 = vadd.f32 %v2350_v54, %v4733_v6 }
 0x8e8   : > { %v2448_v28 = vpop.f32.mrf.mxu2 }
 0x8e9   : > { %v2352_v55 = vpop.f32.mrf.mxu3 }
 0x8ef   : > { %v2526_v29 = vpop.f32.mrf.mxu1 }
 0x8f0   : > { %v2553_v30 = vsub.f32 %v2526_v29, %v4650_v7  ;;  %v2549_v57 = vpop.f32.mrf.mxu2  ;;  %v2356_v29 = vadd.f32 %v2352_v55, %v4735_v9 }
 0x8f1   : > { %v2554_v31 = vsub.f32 %v2549_v57, %v4654_v14  ;;  %v3967_v14 = vld [vmem:[%s5079_s16 + $0x28] sm:$0xff] }
 0x8f2   : > { %v2555_v32 = vsel %vm2043_vm10, %v2553_v30, -inf  ;;  %v2489_v39 = vsel %vm2043_vm10, %v3967_v14, 0 }
 0x8f3   : > { %2556 = vmax.xlane.f32.xlu2 %v2555_v32  ;;  %v2558_v33 = vsel %vm2043_vm10, %v2554_v31, -inf  ;;  %2497 = vmatpush.bf16.xpose.msrb.mxu0 %v2489_v39 }
 0x8f4   : > { %2559 = vmax.xlane.f32.xlu1 %v2558_v33 }
 0x8f7   : > { %v2528_v34 = vpop.f32.mrf.mxu1 }
 0x8f8   : > { %v2551_v35 = vpop.f32.mrf.mxu2 }
 0x8fb   : > { %2498 = vmatpush.bf16.xpose.msrb.mxu0 %v2486_v40 }
 0x90b   : > { %2600 = vrot.lane.b32.xlu2 %v4693_v15, %s4231_s22 }
 0x92f   : > { %v2422_v36 = vpop.xlane.xlu0 %2421 }
 0x930   : > { %4102 = vrcp.f32 %v2422_v36 }
 0x936   : > { %v4103_v37 = vpop.eup %4102 }
 0x937   : > { %v2426_v7 = vmul.f32 %v4103_v37, %v4101_v26  ;;  %v4050_v26 = vld [vmem:[%s5081_s25] ss:$0 sm:$0xff] }
 0x939   : > { %v2428_v38 = vpack.c.bf16 %v2426_v7, %v2426_v7 }
 0x93b   : > { %3854 = vmatmul.msk.bf16.vlgmr.msrb.gmra.mxu3 %vm2043_vm10, %v2428_v38 }
 0x966   : > { %v2557_v42 = vpop.xlane.xlu2 %2556 }
 0x967   : > { %v2561_v43 = vsub.f32 %v2553_v30, %v2557_v42  ;;  %v2560_v44 = vpop.xlane.xlu1 %2559  ;;  %v3973_v42 = vld [vmem:[%s5082_s5 + $0x18] sm:$0xff] }
 0x968   : > { %v2562_v45 = vsub.f32 %v2554_v31, %v2560_v44  ;;  %v3972_v44 = vld [vmem:[%s5082_s5 + $0x10] sm:$0xff] }
 0x969   : > { %v2563_v15 = vmul.f32 1.442695, %v2561_v43  ;;  %v2763_v43 = vsel %vm1617_vm1, %v3973_v42, 0 }
 0x96a   : > { %v2565_v47 = vmul.f32 1.442695, %v2562_v45  ;;  %2769 = vmatpush.bf16.xpose.msra.mxu2 %v2763_v43  ;;  %v2760_v45 = vsel %vm1617_vm1, %v3972_v44, 0 }
 0x96b   : > { %4104 = vpow2.f32 %v2563_v15  ;;  %v3971_v15 = vld [vmem:[%s5082_s5 + $0x8] sm:$0xff] }
 0x96c   : > { %4106 = vpow2.f32 %v2565_v47  ;;  %v2757_v47 = vsel %vm1617_vm1, %v3971_v15, 0 }
 0x96e   : > { %v2601_v48 = vpop.permute.xlu2 %2600 }
 0x96f   : > { %v2606_v2 = vsel %vm2117_vm11, %v2601_v48, 0  ;;  %v3970_v48 = vld [vmem:[%s5082_s5] sm:$0xff] }
 0x970   : > { %2615 = vmatpush.bf16.msra.mxu0 %v2606_v2 }
 0x971   : > { %v4105_v49 = vpop.eup %4104 }
 0x972   : > { %v4107_v50 = vpop.eup %4106  ;;  %v2567_v52 = vsel %vm2043_vm10, %v4105_v49, 0.0  ;;  %2770 = vmatpush.bf16.xpose.msra.mxu2 %v2760_v45 }
 0x973   : > { %2568 = vadd.xlane.f32.xlu0 %v2567_v52  ;;  %v2570_v53 = vsel %vm2043_vm10, %v4107_v50, 0.0 }
 0x974   : > { %2571 = vadd.xlane.f32.xlu1 %v2570_v53 }
 0x97a   : > { %2771 = vmatpush.bf16.xpose.msra.mxu2 %v2757_v47 }
 0x987   : > { %2579 = vrot.lane.b32.xlu0 %v4702_v22, %s4231_s22 }
 0x9be   : > { %v2467_v56 = vpop.f32.mrf.mxu3 }
 0x9bf   : > { %v2471_v58 = vpack.c.bf16 %v2467_v56, %v2446_v21 }
 0x9c1   : > { %3863 = vmatmul.msk.bf16.vlgmr.msrb.gmra.mxu0 %vm2043_vm10, %v2471_v58 }
 0x9c6   : > { %v2469_v59 = vpop.f32.mrf.mxu3 }
 0x9e6   : > { %v2569_v61 = vpop.xlane.xlu0 %2568 }
 0x9e7   : > { %v2572_v60 = vpop.xlane.xlu1 %2571 }
 0x9e8   : > { %4108 = vrcp.f32 %v2572_v60 }
 0x9e9   : > { %4110 = vrcp.f32 %v2569_v61 }
 0x9ee   : > { %v4109_v62 = vpop.eup %4108 }
 0x9ef   : > { %v2576_v63 = vmul.f32 %v4109_v62, %v4107_v50  ;;  %v4111_v1 = vpop.eup %4110 }
 0x9f0   : > { %v2575_v22 = vmul.f32 %v4111_v1, %v4105_v49  ;;  %v2754_v49 = vsel %vm1617_vm1, %v3970_v48, 0 }
 0x9f1   : > { %v2578_v0 = vpack.c.bf16 %v2576_v63, %v2576_v63  ;;  %2772 = vmatpush.bf16.xpose.msra.mxu2 %v2754_v49 }
 0x9f2   : > { %v2577_v8 = vpack.c.bf16 %v2575_v22, %v2575_v22 }
 0x9f3   : > { %3867 = vmatmul.msk.bf16.vlgmr.msra.gmra.mxu0 %vm2043_vm10, %v2578_v0 }
 0x9f9   : > { %v2580_v4 = vpop.permute.xlu0 %2579 }
 0x9fa   : > { %v2585_v5 = vsel %vm2117_vm11, %v2580_v4, 0 }
 0x9fb   : > { %2594 = vmatpush.bf16.msra.mxu3 %v2585_v5 }
 0x9fe   : > { %3866 = vmatmul.msk.bf16.vlgmr.msra.gmra.mxu3 %vm2043_vm10, %v2577_v8  ;;  %v4051_v8 = vld [vmem:[%s5086_s3] ss:$0 sm:$0xff] }
 0xa3e   : > { %v2500_v11 = vpop.f32.mrf.mxu0 }
 0xa3f   : > { %v2505_v13 = vadd.f32 %v2500_v11, %v2355_v10 }
 0xa46   : > { %v2502_v19 = vpop.f32.mrf.mxu0 }
 0xa47   : > { %v2506_v57 = vadd.f32 %v2502_v19, %v2356_v29 }
 0xa70   : > { %v2617_v20 = vpop.f32.mrf.mxu0 }
 0xa78   : > { %v2619_v51 = vpop.f32.mrf.mxu0 }
 0xa81   : > { %v2596_v24 = vpop.f32.mrf.mxu3 }
 0xa82   : > { %v2621_v25 = vpack.c.bf16 %v2617_v20, %v2596_v24  ;;  %v4053_v24 = vld [vmem:[%s5088_s19] ss:$0 sm:$0xff] }
 0xa84   : > { %3876 = vmatmul.msk.bf16.vlgmr.msra.gmra.mxu1 %vm2043_vm10, %v2621_v25 }
 0xa89   : > { %v2598_v6 = vpop.f32.mrf.mxu3 }
 0xb01   : > { %v2650_v27 = vpop.f32.mrf.mxu1 }
 0xb02   : > { %v2655_v21 = vadd.f32 %v2650_v27, %v2505_v13 }
 0xb04   : > { %v2661_v28 = vadd.f32 %v4050_v26, %v2655_v21 }
 0xb06   : > { %v4774_v30 = vadd.f32 %v2661_v28, %v4585_v41 }
 0xb08   : > { %v2665_v31 = vsel %vm1617_vm1, %v4774_v30, 0.0 }
 0xb09   : > { %2666 = vadd.xlane.f32.xlu1 %v2665_v31  ;;  %v2652_v32 = vpop.f32.mrf.mxu1 }
 0xb0a   : > { %v2656_v33 = vadd.f32 %v2652_v32, %v2506_v57 }
 0xb0c   : > { %v2662_v34 = vadd.f32 %v4050_v26, %v2656_v33 }
 0xb0e   : > { %v4779_v35 = vadd.f32 %v2662_v34, %v4590_v46 }
 0xb10   : > { %v2668_v36 = vsel %vm1617_vm1, %v4779_v35, 0.0 }
 0xb11   : > { %2669 = vadd.xlane.f32.xlu1 %v2668_v36 }
 0xb7c   : > { %v2667_v9 = vpop.xlane.xlu1 %2666 }
 0xb7d   : > { %v2671_v41 = vmul.f32 %v2667_v9, %v4548_v12 }
 0xb7f   : > { %v2673_v37 = vsub.f32 %v4774_v30, %v2671_v41 }
 0xb81   : > { %v2675_v7 = vmul.f32 %v2673_v37, %v2673_v37 }
 0xb83   : > { %v2677_v38 = vsel %vm1617_vm1, %v2675_v7, 0.0 }
 0xb84   : > { %2678 = vadd.xlane.f32.xlu0 %v2677_v38  ;;  %v2670_v14 = vpop.xlane.xlu1 %2669 }
 0xb85   : > { %v2672_v46 = vmul.f32 %v2670_v14, %v4548_v12 }
 0xb87   : > { %v2674_v39 = vsub.f32 %v4779_v35, %v2672_v46 }
 0xb89   : > { %v2676_v23 = vmul.f32 %v2674_v39, %v2674_v39 }
 0xb8b   : > { %v2680_v40 = vsel %vm1617_vm1, %v2676_v23, 0.0 }
 0xb8c   : > { %2681 = vadd.xlane.f32.xlu1 %v2680_v40 }
 0xbf7   : > { %v2679_v2 = vpop.xlane.xlu0 %2678 }
 0xbf8   : > { %v2683_v50 = vmul.f32 %v2679_v2, %v4548_v12  ;;  %v2834_v2 = vlaneseq }
 0xbfa   : > { %v2685_v52 = vadd.f32 1e-05, %v2683_v50 }
 0xbfc   : > { %4112 = vrsqrt.f32 %v2685_v52  ;;  %vm2693_vm13 = vweird.f32 %v2685_v52 }
 0xbff   : > { %v2682_v53 = vpop.xlane.xlu1 %2681 }
 0xc00   : > { %v2684_v54 = vmul.f32 %v2682_v53, %v4548_v12  ;;  %v3975_v53 = vld [vmem:[%s4513_s24 + $0x8] sm:$0xff] }
 0xc02   : > { %v4113_v55 = vpop.eup %4112  ;;  %v2686_v56 = vadd.f32 1e-05, %v2684_v54 }
 0xc03   : > { %v2688_v58 = vmul.f32 %v4113_v55, %v2685_v52  ;;  %vm2694_vm12 = vweird.f32 %v4113_v55  ;;  %v4814_v52 = vshrl.u32 %v2834_v2, 7 }
 0xc04   : > { %4114 = vrsqrt.f32 %v2686_v56  ;;  %vm2695_vm14 = vmor %vm2693_vm13, %vm2694_vm12  ;;  %vm2703_vm0 = vweird.f32 %v2686_v56 }
 0xc05   : > { %v2689_v59 = vmul.f32 %v4113_v55, %v2688_v58  ;;  %vm2842_vm12 = vcmp.ge.s32.totalorder %v4814_v52, 3  ;;  %vm2854_vm13 = vcmp.ge.s32.totalorder %v4814_v52, 2 }
 0xc07   : > { %v2690_v60 = vmul.f32 0.5, %v2689_v59  ;;  %v3974_v59 = vld [vmem:[%s4513_s24] sm:$0xff] }
 0xc09   : > { %v2691_v61 = vsub.f32 1.5, %v2690_v60 }
 0xc0a   : > { %v4115_v62 = vpop.eup %4114 }
 0xc0b   : > { %v2692_v63 = vmul.f32 %v4113_v55, %v2691_v61  ;;  %v2698_v0 = vmul.f32 %v4115_v62, %v2686_v56  ;;  %vm2704_vm15 = vweird.f32 %v4115_v62  ;;  %v4821_v56 = vld [vmem:[%s5089_s28] sm:$0x7f] }
 0xc0c   : > { %vm2705_vm2 = vmor %vm2703_vm0, %vm2704_vm15  ;;  %v2847_v58 = vperm.slane %v4821_v56, 0  ;;  %vm2885_vm15 = vcmp.lt.s32.totalorder %v4814_v52, 7  ;;  %vm2896_vm0 = vcmp.lt.s32.totalorder %v4814_v52, 6 }
 0xc0d   : > { %v2699_v1 = vmul.f32 %v4115_v62, %v2698_v0  ;;  %v2696_v22 = vsel %vm2695_vm14, %v4113_v55, %v2692_v63  ;;  %v3035_v55 = vsel %vm1617_vm1, %v3975_v53, 0  ;;  %v3032_v0 = vsel %vm1617_vm1, %v3974_v59, 0 }
 0xc0e   : > { %v2707_v10 = vmul.f32 %v2696_v22, %v2673_v37  ;;  %3043 = vmatpush.bf16.xpose.msrb.mxu3 %v3035_v55  ;;  %vm2865_vm14 = vcmp.ge.s32.totalorder %v4814_v52, 1 }
 0xc0f   : > { %v2700_v4 = vmul.f32 0.5, %v2699_v1  ;;  %v2858_v1 = vperm.slane %v4821_v56, 1 }
 0xc10   : > { %v2713_v3 = vmul.f32 %v4051_v8, %v2707_v10 }
 0xc11   : > { %v2701_v5 = vsub.f32 1.5, %v2700_v4 }
 0xc12   : > { %v2719_v19 = vadd.f32 %v4052_v16, %v2713_v3 }
 0xc13   : > { %v2702_v11 = vmul.f32 %v4115_v62, %v2701_v5 }
 0xc15   : > { %v2706_v13 = vsel %vm2705_vm2, %v4115_v62, %v2702_v11  ;;  %v4054_v62 = vld [vmem:[%s1561_s10] ss:$0 sm:$0xff]  ;;  %vm2907_vm2 = vcmp.lt.s32.totalorder %v4814_v52, 5 }
 0xc16   : > { %v2708_v17 = vmul.f32 %v2706_v13, %v2674_v39  ;;  %3044 = vmatpush.bf16.xpose.msrb.mxu3 %v3032_v0 }
 0xc18   : > { %v2714_v18 = vmul.f32 %v4051_v8, %v2708_v17  ;;  %v2869_v8 = vperm.slane %v4821_v56, 2 }
 0xc1a   : > { %v2720_v20 = vadd.f32 %v4052_v16, %v2714_v18  ;;  %v2878_v16 = vperm.slane %v4821_v56, 3 }
 0xc1c   : > { %v2729_v51 = vpack.c.bf16 %v2720_v20, %v2719_v19 }
 0xc1e   : > { %3893 = vmatmul.msk.bf16.vlgmr.msra.gmra.mxu2 %vm1617_vm1, %v2729_v51 }
 0xca1   : > { %v2774_v25 = vpop.f32.mrf.mxu2 }
 0xca2   : > { %v2783_v6 = vadd.f32 %v4053_v24, %v2774_v25 }
 0xca4   : > { %v3894_v26 = vmul.f32 -1.442695, %v2783_v6 }
 0xca6   : > { %4116 = vpow2.f32 %v3894_v26 }
 0xca9   : > { %v2776_v27 = vpop.f32.mrf.mxu2 }
 0xcaa   : > { %v4809_v21 = vadd.f32 %v4053_v24, %v2776_v27 }
 0xcac   : > { %v4117_v28 = vpop.eup %4116  ;;  %v3895_v29 = vmul.f32 -1.442695, %v4809_v21 }
 0xcad   : > { %v2791_v57 = vadd.f32 1.0, %v4117_v28 }
 0xcae   : > { %4118 = vpow2.f32 %v3895_v29 }
 0xcaf   : > { %4120 = vrcp.f32 %v2791_v57  ;;  %v2804_v9 = vand.u32 2147483648, %v2791_v57  ;;  %v2802_v37 = vand.u32 2147483647, %v2791_v57  ;;  %vm2798_vm4 = vweird.f32 %v2791_v57 }
 0xcb1   : > { %v2805_v14 = vor.u32 1.1754944e-38, %v2804_v9  ;;  %vm2803_vm6 = vcmp.eq.f32.partialorder %v2802_v37, 8.507059e+37 }
 0xcb4   : > { %v4119_v31 = vpop.eup %4118 }
 0xcb5   : > { %v4121_v32 = vpop.eup %4120  ;;  %v2792_v33 = vadd.f32 1.0, %v4119_v31 }
 0xcb6   : > { %v2794_v34 = vmul.f32 %v4121_v32, %v2791_v57  ;;  %vm2799_vm3 = vweird.f32 %v4121_v32 }
 0xcb7   : > { %4122 = vrcp.f32 %v2792_v33  ;;  %vm2800_vm5 = vmor %vm2798_vm4, %vm2799_vm3  ;;  %v2819_v42 = vand.u32 2147483648, %v2792_v33  ;;  %v2817_v44 = vand.u32 2147483647, %v2792_v33  ;;  %vm2813_vm8 = vweird.f32 %v2792_v33 }
 0xcb8   : > { %v2795_v36 = vsub.f32 1.0, %v2794_v34 }
 0xcb9   : > { %v2820_v15 = vor.u32 1.1754944e-38, %v2819_v42  ;;  %vm2818_vm11 = vcmp.eq.f32.partialorder %v2817_v44, 8.507059e+37 }
 0xcba   : > { %v2796_v41 = vmul.f32 %v4121_v32, %v2795_v36 }
 0xcbc   : > { %v2797_v7 = vadd.f32 %v4121_v32, %v2796_v41  ;;  %v2900_v41 = vperm.slane %v4821_v56, 5 }
 0xcbd   : > { %v4123_v38 = vpop.eup %4122 }
 0xcbe   : > { %v2801_v46 = vsel %vm2800_vm5, %v4121_v32, %v2797_v7  ;;  %v2809_v39 = vmul.f32 %v4123_v38, %v2792_v33  ;;  %vm2814_vm7 = vweird.f32 %v4123_v38 }
 0xcbf   : > { %v2806_v23 = vsel %vm2803_vm6, %v2805_v14, %v2801_v46  ;;  %vm2815_vm10 = vmor %vm2813_vm8, %vm2814_vm7  ;;  %v4233_v14 = vmov 16.0  }
 0xcc0   : > { %2825 = vrot.lane.b32.xlu2 %v2806_v23, %s4232_s30  ;;  %v2810_v40 = vsub.f32 1.0, %v2809_v39  ;;  %4124 = vrcp.f32 %v4233_v14 }
 0xcc2   : > { %v2811_v43 = vmul.f32 %v4123_v38, %v2810_v40 }
 0xcc4   : > { %v2812_v45 = vadd.f32 %v4123_v38, %v2811_v43 }
 0xcc6   : > { %v2816_v47 = vsel %vm2815_vm10, %v4123_v38, %v2812_v45  ;;  %v4125_v53 = vpop.eup %4124 }
 0xcc7   : > { %v2821_v48 = vsel %vm2818_vm11, %v2820_v15, %v2816_v47  ;;  %v2911_v15 = vperm.slane %v4821_v56, 6  ;;  %vm2930_vm3 = vweird.f32 %v4125_v53 }
 0xcc8   : > { %2827 = vrot.lane.b32.xlu1 %v2821_v48, %s4232_s30 }
 0xd1a   : > { %v2826_v49 = vpop.permute.xlu2 %2825 }
 0xd1b   : > { %v4812_v50 = vmul.f32 %v2826_v49, %v2783_v6  ;;  %v2889_v6 = vperm.slane %v4821_v56, 4 }
 0xd1d   : > { %v2840_v54 = vrot.slane %v4812_v50, 5  ;;  %v2852_v61 = vrot.slane %v4812_v50, 6  ;;  %v2863_v4 = vrot.slane %v4812_v50, 7  ;;  %v2883_v18 = vrot.slane %v4812_v50, 1 }
 0xd1e   : > { %v2879_v26 = vmul.f32 %v2878_v16, %v4812_v50  ;;  %v2894_v28 = vrot.slane %v4812_v50, 2  ;;  %v2905_v7 = vrot.slane %v4812_v50, 3 }
 0xd1f   : > { %v2845_v60 = vsel %vm2842_vm12, %v2840_v54, 0.0  ;;  %v2856_v22 = vsel %vm2854_vm13, %v2852_v61, 0.0  ;;  %v2867_v11 = vsel %vm2865_vm14, %v2863_v4, 0.0  ;;  %v2887_v27 = vsel %vm2885_vm15, %v2883_v18, 0.0 }
 0xd20   : > { %v2848_v63 = vmul.f32 %v2847_v58, %v2845_v60  ;;  %v2859_v10 = vmul.f32 %v2858_v1, %v2856_v22  ;;  %v2870_v3 = vmul.f32 %v2869_v8, %v2867_v11  ;;  %v2890_v34 = vmul.f32 %v2889_v6, %v2887_v27 }
 0xd21   : > { %v2898_v37 = vsel %vm2896_vm0, %v2894_v28, 0.0  ;;  %v2909_v48 = vsel %vm2907_vm2, %v2905_v7, 0.0  ;;  %v2947_v7 = vld [vmem:[%s1564_s14] sm:$0x1] }
 0xd22   : > { %v2850_v5 = vadd.f32 %v4054_v62, %v2848_v63  ;;  %v2901_v45 = vmul.f32 %v2900_v41, %v2898_v37  ;;  %v2912_v59 = vmul.f32 %v2911_v15, %v2909_v48  ;;  %v2926_v63 = vmul.f32 16.0, %v4125_v53 }
 0xd24   : > { %v2861_v13 = vadd.f32 %v2859_v10, %v2850_v5  ;;  %v2927_v52 = vsub.f32 1.0, %v2926_v63 }
 0xd26   : > { %v2872_v20 = vadd.f32 %v2870_v3, %v2861_v13  ;;  %v2928_v5 = vmul.f32 %v4125_v53, %v2927_v52 }
 0xd28   : > { %v2881_v57 = vadd.f32 %v2879_v26, %v2872_v20  ;;  %v2929_v11 = vadd.f32 %v4125_v53, %v2928_v5 }
 0xd2a   : > { %v2892_v23 = vadd.f32 %v2890_v34, %v2881_v57  ;;  %v2931_v3 = vsel %vm2930_vm3, %v4125_v53, %v2929_v11 }
 0xd2c   : > { %v2903_v50 = vadd.f32 %v2901_v45, %v2892_v23 }
 0xd3a   : > { %v2828_v17 = vpop.permute.xlu1 %2827 }
 0xd3b   : > { %v2832_v19 = vmul.f32 %v2828_v17, %v4809_v21 }
 0xd3d   : > { %v2841_v51 = vrot.slane %v2832_v19, 5  ;;  %v2853_v24 = vrot.slane %v2832_v19, 6  ;;  %v2864_v25 = vrot.slane %v2832_v19, 7  ;;  %v2884_v33 = vrot.slane %v2832_v19, 1 }
 0xd3e   : > { %v2895_v38 = vrot.slane %v2832_v19, 2  ;;  %v2906_v42 = vrot.slane %v2832_v19, 3  ;;  %v2880_v44 = vmul.f32 %v2878_v16, %v2832_v19 }
 0xd3f   : > { %v2846_v29 = vsel %vm2842_vm12, %v2841_v51, 0.0  ;;  %v2857_v21 = vsel %vm2854_vm13, %v2853_v24, 0.0  ;;  %v2868_v32 = vsel %vm2865_vm14, %v2864_v25, 0.0  ;;  %v2888_v40 = vsel %vm2885_vm15, %v2884_v33, 0.0 }
 0xd40   : > { %v2849_v31 = vmul.f32 %v2847_v58, %v2846_v29  ;;  %v2860_v9 = vmul.f32 %v2858_v1, %v2857_v21  ;;  %v2871_v39 = vmul.f32 %v2869_v8, %v2868_v32  ;;  %v2899_v47 = vsel %vm2896_vm0, %v2895_v38, 0.0 }
 0xd41   : > { %v2891_v49 = vmul.f32 %v2889_v6, %v2888_v40  ;;  %v2910_v54 = vsel %vm2907_vm2, %v2906_v42, 0.0  ;;  %v2902_v58 = vmul.f32 %v2900_v41, %v2899_v47 }
 0xd42   : > { %v2851_v36 = vadd.f32 %v4054_v62, %v2849_v31  ;;  %v2913_v61 = vmul.f32 %v2911_v15, %v2910_v54  ;;  %v2914_v62 = vadd.f32 %v2912_v59, %v2903_v50 }
 0xd44   : > { %v2862_v46 = vadd.f32 %v2860_v9, %v2851_v36  ;;  %v2916_v1 = vsel %vm1617_vm1, %v2914_v62, 0.0 }
 0xd46   : > { %v2873_v43 = vadd.f32 %v2871_v39, %v2862_v46  ;;  %v2960_v39 = vld [vmem:[%s1567_s15] sm:$0x1] }
 0xd48   : > { %v2882_v2 = vadd.f32 %v2880_v44, %v2873_v43 }
 0xd4a   : > { %v2893_v55 = vadd.f32 %v2891_v49, %v2882_v2 }
 0xd4c   : > { %v2904_v60 = vadd.f32 %v2902_v58, %v2893_v55 }
 0xd4e   : > { %v2915_v0 = vadd.f32 %v2913_v61, %v2904_v60 }
 0xd50   : > { %v2917_v56 = vsel %vm1617_vm1, %v2915_v0, 0.0 }
 0xd51   : > { %v2918_v22 = vadd.f32 %v2917_v56, %v2916_v1 }
 0xd53   : > { %v2919_v4 = vrot.slane %v2918_v22, 4 }
 0xd55   : > { %v2920_v8 = vadd.f32 %v2919_v4, %v2918_v22 }
 0xd57   : > { %v2921_v10 = vrot.slane %v2920_v8, 2 }
 0xd59   : > { %v2922_v13 = vadd.f32 %v2921_v10, %v2920_v8 }
 0xd5b   : > { %v2923_v16 = vrot.slane %v2922_v13, 1 }
 0xd5d   : > { %v2924_v17 = vadd.f32 %v2923_v16, %v2922_v13 }
 0xd5f   : > { %v2932_v18 = vmul.f32 %v2931_v3, %v2924_v17 }
 0xd61   : > { %v2933_v19 = vsub.f32 %v2914_v62, %v2932_v18  ;;  %v2934_v20 = vsub.f32 %v2915_v0, %v2932_v18 }
 0xd63   : > { %v2935_v51 = vmul.f32 %v2933_v19, %v2933_v19  ;;  %v2936_v24 = vmul.f32 %v2934_v20, %v2934_v20  ;;  %v4055_v20 = vld [vmem:[%s1575_s18] ss:$0 sm:$0xff] }
 0xd65   : > { %v2937_v25 = vsel %vm1617_vm1, %v2935_v51, 0.0  ;;  %v2938_v6 = vsel %vm1617_vm1, %v2936_v24, 0.0 }
 0xd66   : > { %v2939_v26 = vadd.f32 %v2938_v6, %v2937_v25 }
 0xd68   : > { %v2940_v27 = vrot.slane %v2939_v26, 4 }
 0xd6a   : > { %v2941_v28 = vadd.f32 %v2940_v27, %v2939_v26 }
 0xd6c   : > { %v2942_v29 = vrot.slane %v2941_v28, 2 }
 0xd6e   : > { %v2943_v21 = vadd.f32 %v2942_v29, %v2941_v28 }
 0xd70   : > { %v2944_v57 = vrot.slane %v2943_v21, 1 }
 0xd72   : > { %v2945_v31 = vadd.f32 %v2944_v57, %v2943_v21 }
 0xd74   : > { %v2946_v32 = vmul.f32 %v2945_v31, %v2931_v3 }
 0xd76   : > { %v2948_v33 = vadd.f32 1e-05, %v2946_v32 }
 0xd78   : > { %4126 = vrsqrt.f32 %v2948_v33  ;;  %vm2955_vm5 = vweird.f32 %v2948_v33 }
 0xd7e   : > { %v4127_v34 = vpop.eup %4126 }
 0xd7f   : > { %v2950_v36 = vmul.f32 %v4127_v34, %v2948_v33  ;;  %vm2956_vm4 = vweird.f32 %v4127_v34 }
 0xd80   : > { %vm2957_vm6 = vmor %vm2955_vm5, %vm2956_vm4 }
 0xd81   : > { %v2951_v9 = vmul.f32 %v4127_v34, %v2950_v36 }
 0xd83   : > { %v2952_v41 = vmul.f32 0.5, %v2951_v9 }
 0xd85   : > { %v2953_v37 = vsub.f32 1.5, %v2952_v41  ;;  %v3979_v41 = vld [vmem:[%s4523_s23 + $0x18] sm:$0xff] }
 0xd87   : > { %v2954_v38 = vmul.f32 %v4127_v34, %v2953_v37  ;;  %v3157_v37 = vsel %vm1617_vm1, %v3979_v41, 0 }
 0xd88   : > { %3163 = vmatpush.bf16.xpose.msrb.mxu0 %v3157_v37 }
 0xd89   : > { %v2958_v14 = vsel %vm2957_vm6, %v4127_v34, %v2954_v38 }
 0xd8a   : > { %v2959_v46 = vmul.f32 %v2958_v14, %v2947_v7  ;;  %v3978_v7 = vld [vmem:[%s4523_s23 + $0x10] sm:$0xff]  ;;  %v3977_v14 = vld [vmem:[%s4523_s23 + $0x8] sm:$0xff] }
 0xd8b   : > { %v3154_v38 = vsel %vm1617_vm1, %v3978_v7, 0 }
 0xd8c   : > { %v2961_v23 = vmul.f32 %v2959_v46, %v2932_v18  ;;  %v2964_v40 = vperm.slane %v2959_v46, 0  ;;  %v3151_v46 = vsel %vm1617_vm1, %v3977_v14, 0 }
 0xd8e   : > { %v2962_v42 = vsub.f32 %v2960_v39, %v2961_v23  ;;  %v2966_v43 = vmul.f32 %v2964_v40, %v2914_v62  ;;  %v2967_v44 = vmul.f32 %v2964_v40, %v2915_v0  ;;  %v3976_v39 = vld [vmem:[%s4523_s23] sm:$0xff] }
 0xd8f   : > { %v3148_v40 = vsel %vm1617_vm1, %v3976_v39, 0 }
 0xd90   : > { %v2969_v45 = vperm.slane %v2962_v42, 0  ;;  %3164 = vmatpush.bf16.xpose.msrb.mxu0 %v3154_v38 }
 0xd92   : > { %v2971_v15 = vadd.f32 %v2969_v45, %v2966_v43  ;;  %v2972_v47 = vadd.f32 %v2969_v45, %v2967_v44 }
 0xd94   : > { %v3896_v48 = vmul.f32 -1.442695, %v2971_v15  ;;  %v3897_v2 = vmul.f32 -1.442695, %v2972_v47 }
 0xd96   : > { %4128 = vpow2.f32 %v3896_v48 }
 0xd97   : > { %4130 = vpow2.f32 %v3897_v2 }
 0xd98   : > { %3165 = vmatpush.bf16.xpose.msrb.mxu0 %v3151_v46 }
 0xd9c   : > { %v4129_v49 = vpop.eup %4128 }
 0xd9d   : > { %v4131_v50 = vpop.eup %4130  ;;  %v2979_v53 = vadd.f32 1.0, %v4129_v49 }
 0xd9e   : > { %v2980_v54 = vadd.f32 1.0, %v4131_v50 }
 0xd9f   : > { %4132 = vrcp.f32 %v2979_v53  ;;  %v2992_v62 = vand.u32 2147483648, %v2979_v53  ;;  %v2990_v1 = vand.u32 2147483647, %v2979_v53  ;;  %vm2986_vm10 = vweird.f32 %v2979_v53 }
 0xda0   : > { %4134 = vrcp.f32 %v2980_v54  ;;  %v3007_v56 = vand.u32 2147483648, %v2980_v54  ;;  %v3005_v22 = vand.u32 2147483647, %v2980_v54  ;;  %vm3001_vm12 = vweird.f32 %v2980_v54  ;;  %3166 = vmatpush.bf16.xpose.msrb.mxu0 %v3148_v40 }
 0xda1   : > { %v2993_v5 = vor.u32 1.1754944e-38, %v2992_v62  ;;  %vm2991_vm13 = vcmp.eq.f32.partialorder %v2990_v1, 8.507059e+37  ;;  %v4056_v62 = vld [vmem:[%s1578_s9] ss:$0 sm:$0xff] }
 0xda2   : > { %v3008_v11 = vor.u32 1.1754944e-38, %v3007_v56  ;;  %vm3006_vm15 = vcmp.eq.f32.partialorder %v3005_v22, 8.507059e+37  ;;  %v4057_v56 = vld [vmem:[%s1581_s6] ss:$0 sm:$0xff] }
 0xda5   : > { %v4133_v55 = vpop.eup %4132 }
 0xda6   : > { %v4135_v58 = vpop.eup %4134  ;;  %v2982_v59 = vmul.f32 %v4133_v55, %v2979_v53  ;;  %vm2987_vm7 = vweird.f32 %v4133_v55 }
 0xda7   : > { %v2997_v60 = vmul.f32 %v4135_v58, %v2980_v54  ;;  %vm3002_vm8 = vweird.f32 %v4135_v58  ;;  %vm2988_vm11 = vmor %vm2986_vm10, %vm2987_vm7 }
 0xda8   : > { %v2983_v61 = vsub.f32 1.0, %v2982_v59  ;;  %vm3003_vm14 = vmor %vm3001_vm12, %vm3002_vm8 }
 0xda9   : > { %v2998_v63 = vsub.f32 1.0, %v2997_v60 }
 0xdaa   : > { %v2984_v0 = vmul.f32 %v4133_v55, %v2983_v61 }
 0xdab   : > { %v2999_v52 = vmul.f32 %v4135_v58, %v2998_v63 }
 0xdac   : > { %v2985_v4 = vadd.f32 %v4133_v55, %v2984_v0 }
 0xdad   : > { %v3000_v8 = vadd.f32 %v4135_v58, %v2999_v52 }
 0xdae   : > { %v2989_v10 = vsel %vm2988_vm11, %v4133_v55, %v2985_v4 }
 0xdaf   : > { %v2994_v13 = vsel %vm2991_vm13, %v2993_v5, %v2989_v10  ;;  %v3004_v16 = vsel %vm3003_vm14, %v4135_v58, %v3000_v8 }
 0xdb0   : > { %v3009_v3 = vsel %vm3006_vm15, %v3008_v11, %v3004_v16  ;;  %v3011_v17 = vmul.f32 %v2994_v13, %v2971_v15  ;;  %v3981_v11 = vld [vmem:[%s4529_s12 + $0x8] sm:$0xff]  ;;  %v4058_v16 = vld [vmem:[%s1589_s2] ss:$0 sm:$0xff] }
 0xdb1   : > { %v3012_v18 = vmul.f32 %v3009_v3, %v2972_v47  ;;  %v3241_v13 = vsel %vm1800_vm9, %v3981_v11, 0 }
 0xdb2   : > { %3249 = vmatpush.bf16.xpose.msrb.mxu1 %v3241_v13 }
 0xdb3   : > { %v3017_v19 = vpack.c.bf16 %v3012_v18, %v3011_v17  ;;  %v3980_v18 = vld [vmem:[%s4529_s12] sm:$0xff]  ;;  %s5099_s12 = sld [smem:[#allocation43_spill]] }
 0xdb5   : > { %3906 = vmatmul.msk.bf16.vlgmr.msrb.gmra.mxu3 %vm1617_vm1, %v3017_v19 }
 0xdb9   : > { %p3935_p5 = scmp.ne.s32.totalorder %s5099_s12, 1 }
 0xe38   : > { %v3046_v51 = vpop.f32.mrf.mxu3 }
 0xe39   : > { %v3055_v24 = vadd.f32 %v4055_v20, %v3046_v51 }
 0xe3b   : > { %v4882_v25 = vadd.f32 %v3055_v24, %v4774_v30 }
 0xe3d   : > { %v3059_v6 = vsel %vm1617_vm1, %v4882_v25, 0.0 }
 0xe3e   : > { %3060 = vadd.xlane.f32.xlu2 %v3059_v6 }
 0xe40   : > { %v3048_v26 = vpop.f32.mrf.mxu3 }
 0xe41   : > { %v3056_v27 = vadd.f32 %v4055_v20, %v3048_v26  ;;  %v3238_v20 = vsel %vm1800_vm9, %v3980_v18, 0 }
 0xe42   : > { %3250 = vmatpush.bf16.xpose.msrb.mxu1 %v3238_v20 }
 0xe43   : > { %v4887_v28 = vadd.f32 %v3056_v27, %v4779_v35 }
 0xe45   : > { %v3062_v29 = vsel %vm1617_vm1, %v4887_v28, 0.0 }
 0xe46   : > { %3063 = vadd.xlane.f32.xlu1 %v3062_v29 }
 0xeb1   : > { %v3061_v21 = vpop.xlane.xlu2 %3060 }
 0xeb2   : > { %v3065_v57 = vmul.f32 %v3061_v21, %v4548_v12 }
 0xeb4   : > { %v3067_v30 = vsub.f32 %v4882_v25, %v3065_v57 }
 0xeb6   : > { %v3069_v31 = vmul.f32 %v3067_v30, %v3067_v30 }
 0xeb8   : > { %v3071_v32 = vsel %vm1617_vm1, %v3069_v31, 0.0 }
 0xeb9   : > { %3072 = vadd.xlane.f32.xlu0 %v3071_v32  ;;  %v3064_v33 = vpop.xlane.xlu1 %3063 }
 0xeba   : > { %v3066_v35 = vmul.f32 %v3064_v33, %v4548_v12 }
 0xebc   : > { %v3068_v34 = vsub.f32 %v4887_v28, %v3066_v35 }
 0xebe   : > { %v3070_v36 = vmul.f32 %v3068_v34, %v3068_v34 }
 0xec0   : > { %v3074_v9 = vsel %vm1617_vm1, %v3070_v36, 0.0 }
 0xec1   : > { %3075 = vadd.xlane.f32.xlu0 %v3074_v9 }
 0xf2c   : > { %v3073_v23 = vpop.xlane.xlu0 %3072 }
 0xf2d   : > { %v3077_v42 = vmul.f32 %v3073_v23, %v4548_v12 }
 0xf2f   : > { %v3079_v43 = vadd.f32 1e-05, %v3077_v42 }
 0xf31   : > { %4136 = vrsqrt.f32 %v3079_v43  ;;  %vm3087_vm2 = vweird.f32 %v3079_v43 }
 0xf34   : > { %v3076_v44 = vpop.xlane.xlu0 %3075 }
 0xf35   : > { %v3078_v45 = vmul.f32 %v3076_v44, %v4548_v12 }
 0xf37   : > { %v4137_v15 = vpop.eup %4136  ;;  %v3080_v47 = vadd.f32 1e-05, %v3078_v45 }
 0xf38   : > { %v3082_v48 = vmul.f32 %v4137_v15, %v3079_v43  ;;  %vm3088_vm0 = vweird.f32 %v4137_v15 }
 0xf39   : > { %4138 = vrsqrt.f32 %v3080_v47  ;;  %vm3089_vm3 = vmor %vm3087_vm2, %vm3088_vm0  ;;  %vm3097_vm5 = vweird.f32 %v3080_v47 }
 0xf3a   : > { %v3083_v2 = vmul.f32 %v4137_v15, %v3082_v48 }
 0xf3c   : > { %v3084_v49 = vmul.f32 0.5, %v3083_v2 }
 0xf3e   : > { %v3085_v50 = vsub.f32 1.5, %v3084_v49 }
 0xf3f   : > { %v4139_v53 = vpop.eup %4138 }
 0xf40   : > { %v3086_v54 = vmul.f32 %v4137_v15, %v3085_v50  ;;  %v3092_v55 = vmul.f32 %v4139_v53, %v3080_v47  ;;  %vm3098_vm4 = vweird.f32 %v4139_v53  ;;  %v4059_v47 = vld [vmem:[%s1597_s20] ss:$0 sm:$0xff] }
 0xf41   : > { %vm3099_vm6 = vmor %vm3097_vm5, %vm3098_vm4 }
 0xf42   : > { %v3093_v58 = vmul.f32 %v4139_v53, %v3092_v55  ;;  %v3090_v59 = vsel %vm3089_vm3, %v4137_v15, %v3086_v54 }
 0xf43   : > { %v3101_v63 = vmul.f32 %v3090_v59, %v3067_v30 }
 0xf44   : > { %v3094_v60 = vmul.f32 0.5, %v3093_v58 }
 0xf45   : > { %v3107_v52 = vmul.f32 %v4056_v62, %v3101_v63 }
 0xf46   : > { %v3095_v61 = vsub.f32 1.5, %v3094_v60 }
 0xf47   : > { %v3113_v5 = vadd.f32 %v4057_v56, %v3107_v52 }
 0xf48   : > { %v3096_v0 = vmul.f32 %v4139_v53, %v3095_v61 }
 0xf4a   : > { %v3100_v1 = vsel %vm3099_vm6, %v4139_v53, %v3096_v0 }
 0xf4b   : > { %v3102_v22 = vmul.f32 %v3100_v1, %v3068_v34 }
 0xf4d   : > { %v3108_v4 = vmul.f32 %v4056_v62, %v3102_v22 }
 0xf4f   : > { %v3114_v8 = vadd.f32 %v4057_v56, %v3108_v4 }
 0xf51   : > { %v3123_v10 = vpack.c.bf16 %v3114_v8, %v3113_v5 }
 0xf53   : > { %3923 = vmatmul.msk.bf16.vlgmr.msrb.gmra.mxu0 %vm1617_vm1, %v3123_v10 }
 0xfd0   : > { %v3168_v3 = vpop.f32.mrf.mxu0 }
 0xfd1   : > { %v3177_v17 = vadd.f32 %v4058_v16, %v3168_v3 }
 0xfd3   : > { %v3924_v19 = vmul.f32 -1.442695, %v3177_v17 }
 0xfd5   : > { %4140 = vpow2.f32 %v3924_v19 }
 0xfd8   : > { %v3170_v51 = vpop.f32.mrf.mxu0 }
 0xfd9   : > { %v3178_v24 = vadd.f32 %v4058_v16, %v3170_v51 }
 0xfdb   : > { %v4141_v6 = vpop.eup %4140  ;;  %v3925_v26 = vmul.f32 -1.442695, %v3178_v24 }
 0xfdc   : > { %v3185_v27 = vadd.f32 1.0, %v4141_v6  ;;  %v4060_v6 = vld [vmem:[%s1600_s27] ss:$0 sm:$0xff] }
 0xfdd   : > { %4142 = vpow2.f32 %v3925_v26 }
 0xfde   : > { %4144 = vrcp.f32 %v3185_v27  ;;  %v3198_v36 = vand.u32 2147483648, %v3185_v27  ;;  %vm3192_vm8 = vweird.f32 %v3185_v27  ;;  %v3196_v9 = vand.u32 2147483647, %v3185_v27 }
 0xfe0   : > { %v3199_v46 = vor.u32 1.1754944e-38, %v3198_v36  ;;  %vm3197_vm12 = vcmp.eq.f32.partialorder %v3196_v9, 8.507059e+37 }
 0xfe3   : > { %v4143_v29 = vpop.eup %4142 }
 0xfe4   : > { %v4145_v21 = vpop.eup %4144  ;;  %v3186_v57 = vadd.f32 1.0, %v4143_v29 }
 0xfe5   : > { %v3188_v30 = vmul.f32 %v4145_v21, %v3185_v27  ;;  %vm3193_vm7 = vweird.f32 %v4145_v21 }
 0xfe6   : > { %4146 = vrcp.f32 %v3186_v57  ;;  %vm3194_vm10 = vmor %vm3192_vm8, %vm3193_vm7  ;;  %v3213_v37 = vand.u32 2147483648, %v3186_v57  ;;  %v3211_v14 = vand.u32 2147483647, %v3186_v57  ;;  %vm3207_vm13 = vweird.f32 %v3186_v57 }
 0xfe7   : > { %v3189_v31 = vsub.f32 1.0, %v3188_v30 }
 0xfe8   : > { %v3214_v40 = vor.u32 1.1754944e-38, %v3213_v37  ;;  %vm3212_vm15 = vcmp.eq.f32.partialorder %v3211_v14, 8.507059e+37 }
 0xfe9   : > { %v3190_v32 = vmul.f32 %v4145_v21, %v3189_v31 }
 0xfeb   : > { %v3191_v35 = vadd.f32 %v4145_v21, %v3190_v32 }
 0xfec   : > { %v4147_v33 = vpop.eup %4146 }
 0xfed   : > { %v3203_v34 = vmul.f32 %v4147_v33, %v3186_v57  ;;  %v3195_v7 = vsel %vm3194_vm10, %v4145_v21, %v3191_v35  ;;  %vm3208_vm11 = vweird.f32 %v4147_v33 }
 0xfee   : > { %v3200_v23 = vsel %vm3197_vm12, %v3199_v46, %v3195_v7  ;;  %vm3209_vm14 = vmor %vm3207_vm13, %vm3208_vm11 }
 0xfef   : > { %v3204_v41 = vsub.f32 1.0, %v3203_v34  ;;  %v3217_v44 = vmul.f32 %v3200_v23, %v3177_v17 }
 0xff1   : > { %v3205_v38 = vmul.f32 %v4147_v33, %v3204_v41 }
 0xff3   : > { %v3206_v39 = vadd.f32 %v4147_v33, %v3205_v38 }
 0xff5   : > { %v3210_v42 = vsel %vm3209_vm14, %v4147_v33, %v3206_v39 }
 0xff6   : > { %v3215_v43 = vsel %vm3212_vm15, %v3214_v40, %v3210_v42 }
 0xff7   : > { %v3218_v45 = vmul.f32 %v3215_v43, %v3178_v24 }
 0xff9   : > { %v3223_v15 = vpack.c.bf16 %v3218_v45, %v3217_v44 }
 0xffb   : > { %3934 = vmatmul.msk.bf16.vlgmr.msrb.gmra.mxu1 %vm1800_vm9, %v3223_v15 }
0x1078   : > { %v3252_v48 = vpop.f32.mrf.mxu1 }
0x1079   : > { %v3261_v2 = vadd.f32 %v4059_v47, %v3252_v48 }
0x107b   : > { %v3263_v49 = vmul.f32 0.5, %v3261_v2 }
0x107d   : > { %v3265_v50 = vadd.f32 %v3263_v49, %v4882_v25 }
0x107f   : > { %v3267_v53 = vsel %vm1617_vm1, %v3265_v50, 0.0 }
0x1080   : > { %3268 = vadd.xlane.f32.xlu2 %v3267_v53  ;;  %v3254_v54 = vpop.f32.mrf.mxu1 }
0x1081   : > { %v3262_v55 = vadd.f32 %v4059_v47, %v3254_v54 }
0x1083   : > { %v3264_v58 = vmul.f32 0.5, %v3262_v55 }
0x1085   : > { %v3266_v59 = vadd.f32 %v3264_v58, %v4887_v28 }
0x1087   : > { %v3270_v60 = vsel %vm1617_vm1, %v3266_v59, 0.0 }
0x1088   : > { %3271 = vadd.xlane.f32.xlu0 %v3270_v60 }
0x10f3   : > { %v3269_v61 = vpop.xlane.xlu2 %3268 }
0x10f4   : > { %v3273_v62 = vmul.f32 %v3269_v61, %v4548_v12 }
0x10f6   : > { %v3275_v63 = vsub.f32 %v3265_v50, %v3273_v62 }
0x10f8   : > { %v3277_v0 = vmul.f32 %v3275_v63, %v3275_v63 }
0x10fa   : > { %v3279_v1 = vsel %vm1617_vm1, %v3277_v0, 0.0 }
0x10fb   : > { %3280 = vadd.xlane.f32.xlu2 %v3279_v1  ;;  %v3272_v25 = vpop.xlane.xlu0 %3271 }
0x10fc   : > { %v3274_v56 = vmul.f32 %v3272_v25, %v4548_v12 }
0x10fe   : > { %v3276_v52 = vsub.f32 %v3266_v59, %v3274_v56 }
0x1100   : > { %v3278_v22 = vmul.f32 %v3276_v52, %v3276_v52 }
0x1102   : > { %v3282_v4 = vsel %vm1617_vm1, %v3278_v22, 0.0 }
0x1103   : > { %3283 = vadd.xlane.f32.xlu0 %v3282_v4 }
0x116e   : > { %v3281_v28 = vpop.xlane.xlu2 %3280 }
0x116f   : > { %v3285_v5 = vmul.f32 %v3281_v28, %v4548_v12 }
0x1171   : > { %v3287_v8 = vadd.f32 1e-05, %v3285_v5 }
0x1173   : > { %4148 = vrsqrt.f32 %v3287_v8  ;;  %vm3295_vm0 = vweird.f32 %v3287_v8 }
0x1176   : > { %v3284_v10 = vpop.xlane.xlu0 %3283 }
0x1177   : > { %v3286_v11 = vmul.f32 %v3284_v10, %v4548_v12  ;;  %v4061_v12 = vld [vmem:[%s1603_s13] ss:$0 sm:$0xff] }
0x1179   : > { %v4149_v13 = vpop.eup %4148  ;;  %v3288_v16 = vadd.f32 1e-05, %v3286_v11 }
0x117a   : > { %v3290_v3 = vmul.f32 %v4149_v13, %v3287_v8  ;;  %vm3296_vm9 = vweird.f32 %v4149_v13 }
0x117b   : > { %4150 = vrsqrt.f32 %v3288_v16  ;;  %vm3297_vm2 = vmor %vm3295_vm0, %vm3296_vm9  ;;  %vm3305_vm4 = vweird.f32 %v3288_v16 }
0x117c   : > { %v3291_v17 = vmul.f32 %v4149_v13, %v3290_v3 }
0x117e   : > { %v3292_v18 = vmul.f32 0.5, %v3291_v17 }
0x1180   : > { %v3293_v19 = vsub.f32 1.5, %v3292_v18 }
0x1181   : > { %v4151_v20 = vpop.eup %4150 }
0x1182   : > { %v3294_v51 = vmul.f32 %v4149_v13, %v3293_v19  ;;  %v3300_v24 = vmul.f32 %v4151_v20, %v3288_v16  ;;  %vm3306_vm3 = vweird.f32 %v4151_v20 }
0x1183   : > { %vm3307_vm5 = vmor %vm3305_vm4, %vm3306_vm3 }
0x1184   : > { %v3298_v26 = vsel %vm3297_vm2, %v4149_v13, %v3294_v51  ;;  %v3301_v27 = vmul.f32 %v4151_v20, %v3300_v24 }
0x1185   : > { %v3309_v29 = vmul.f32 %v3298_v26, %v3275_v63 }
0x1186   : > { %v3302_v21 = vmul.f32 0.5, %v3301_v27 }
0x1187   : > { %v3315_v57 = vmul.f32 %v4060_v6, %v3309_v29 }
0x1188   : > { %v3303_v30 = vsub.f32 1.5, %v3302_v21 }
0x1189   : > { %v3321_v31 = vadd.f32 %v4061_v12, %v3315_v57 }
0x118a   : > { %v3304_v32 = vmul.f32 %v4151_v20, %v3303_v30 }
0x118b   : > { %3323 = vst.msk [vmem:[#allocation2] sm:$0xff] %vm1617_vm1, %v3321_v31 }
0x118c   : > { %v3308_v33 = vsel %vm3307_vm5, %v4151_v20, %v3304_v32 }
0x118d   : > { %v3310_v35 = vmul.f32 %v3308_v33, %v3276_v52 }
0x118f   : > { %v3316_v34 = vmul.f32 %v4060_v6, %v3310_v35  ;;  %3328 = sbr.rel (%p3935_p5) target bundleno = 4502 (0x1196), region = 172 }
0x1191   : > { %v3322_v36 = vadd.f32 %v4061_v12, %v3316_v34 }
0x1193   : > { %3324 = vst.msk [vmem:[#allocation2 + $0x8] sm:$0xff] %vm1617_vm1, %v3322_v36 }
0x1194   : > { %3329 = vst.msk [vmem:[#allocation3] sm:$0xff] %vm1617_vm1, %v3321_v31 }
0x1195   : > { %3330 = vst.msk [vmem:[#allocation3 + $0x8] sm:$0xff] %vm1617_vm1, %v3322_v36 }
0x1196 PF: > { %s5100_s20 = sld [smem:[#allocation43_spill]]  ;;  %s4234_s2 = smov [#allocation3]  }
0x1197   : > { %s5101_s0 = sld [smem:[#allocation41_spill]]  ;;  %s3336_s27 = sshll.u32 %s4234_s2, 4  ;;  %s3337_s27 = int_to_ptr.vmem [resolvable:$true] %s3336_s27 }
0x119c   : > { %p3986_p6 = scmp.eq.s32.totalorder %s5100_s20, 1 }
0x119d   : > { %s3338_s13 = sshll.u32 %s5101_s0, 4  ;;  %s4172_s22 = scalar_lea.hbm %s5101_s0, 16  ;;  %s3339_s13 = int_to_ptr.hbm [resolvable:$true] %s3338_s13 }
0x119e   : > { %s4166_s11 = sshra.s32 %s3339_s13, 4  ;;  %s4167_s11 = int_to_ptr.hbm [resolvable:$true] %s4166_s11 }
0x119f   : > { %s4168_s16 = scalar_lea.hbm %s4167_s11, 16  ;;  %p4173_p10 = scmp.lt.s32.totalorder %s4167_s11, %s5101_s0 }
0x11a0   : > { %p4169_p7 = scmp.ne.s32.totalorder %s4167_s11, %s4168_s16  ;;  %p4174_p11 = scmp.lt.s32.totalorder %s4172_s22, %s4168_s16 }
0x11a2   : > { %p4170_p8 = pnand %p4169_p7, %p3986_p6  ;;  %p4175_p12 = por %p4174_p11, %p4173_p10 }
0x11a4   : > { %p4171_p9 = pneg %p4170_p8 }
0x11a6   : > { %p4176_p13 = pnand %p4175_p12, %p4171_p9 }
0x11a8   : > { %4179 = shalt.err (!%p4176_p13)
}
0x11a9   : > { %s4235_s26 = smov 128   ;;  %s4236_s25 = smov 8  }
0x11aa   : > { %3983 = dma.vmem_to_hbm [thread:$0]  (%p3986_p6), %s3337_s27, 256, %s3339_s13, [#allocation4], %s4235_s26, %s4235_s26, %s4236_s25  }
0x11ab   : > { %4185 = dma.done.wait (%p3986_p6), [#allocation4], 256  }
0x11ac   : > { %4187 = vsyncadd (%p3986_p6), [#allocation4], 4294967040 }
0x11ad PF: > { %s5102_s5 = sld [smem:[#allocation42_spill]] }
0x11b3   : > { %s84_s28 = sadd.s32 1, %s5102_s5  }
0x11b4   : > { %p81_p0 = scmp.ge.s32.totalorder %s84_s28, 4  }
0x11b6   :  { %83 = sbr.rel (!%p81_p0) target bundleno = 86 (0x56), region = 334 }
0x11bb   :  { %3355 = vsyncpa [#allocation4], 1 }
0x11bc   :  { %3357 = vsyncpa [#allocation4 + $0x1], 1 }

</bundles_post_ra>
